<compile_context>
chip_gen: v6e
topology: v6e:2x2x1
jax: 0.10.0
libtpu: 0.0.40
codegen_flags: <defaults>
</compile_context>

<pallas_src>
import functools

import jax
import jax.numpy as jnp
from jax import lax
from jax.experimental import pallas as pl
from jax.experimental.pallas import tpu as pltpu


# Offsets (di, dj) of the "+1" tap in each of the 8 fixed 3x3 filters;
# the center tap (1, 1) carries the "-1", so filter k = neighbor_k - center.
_NEIGHBOR_OFFSETS = ((0, 0), (0, 1), (0, 2),
                     (1, 0),         (1, 2),
                     (2, 0), (2, 1), (2, 2))


def _contrast_depth_loss_kernel(out_ref, lab_ref, part_ref, *,
                                Hc, Wc, Bb, B, need_mask):
    # (H, W, Bb) tile: batch on the 128-lane axis, W on sublanes, H major.
    o = out_ref[...].astype(jnp.float32)
    l = lab_ref[...].astype(jnp.float32)

    # Linearity: conv_k(out) - conv_k(label) == conv_k(out - label);
    # form the single difference map once and only shift it.
    diff = o - l                                      # (H, W, Bb)

    if need_mask:
        # Ragged tail block: zero the lanes past the true batch size so
        # (undefined) out-of-bounds input reads contribute exactly 0.
        start = pl.program_id(0) * Bb
        lane = lax.broadcasted_iota(jnp.int32, (1, 1, Bb), 2)
        diff = jnp.where(start + lane < B, diff, 0.0)

    center = diff[1:1 + Hc, 1:1 + Wc, :]              # (Hc, Wc, Bb)

    acc = jnp.zeros_like(center)
    for (di, dj) in _NEIGHBOR_OFFSETS:
        # di -> major-axis slice (free), dj -> sublane slice (XLU).
        d = diff[di:di + Hc, dj:dj + Wc, :] - center
        ad = jnp.abs(d)
        # SmoothL1 with beta = 1.0, min-form (no compare+select):
        #   |d| <  1: 0.5*d^2 ;  |d| >= 1: |d| - 0.5
        m = jnp.minimum(ad, 1.0)
        acc = acc + m * (ad - 0.5 * m)

    # Per-image partial sums: reduce only over the spatial (major/sublane)
    # axes -> no cross-lane reduction; lane-dense (1, 1, Bb) store.
    part_ref[0, 0, :] = jnp.sum(acc, axis=(0, 1))


def contrast_depth_loss(out, label):
    """SmoothL1(contrast_depth_conv(out), contrast_depth_conv(label)).

    out, label: (B, 1, H, W) or (B, H, W) arrays. Returns a scalar f32 loss.
    """
    if out.ndim == 4:
        if out.shape[1] != 1:
            raise ValueError("contrast_depth_loss expects single-channel maps")
        out = out[:, 0]
        label = label[:, 0]
    B, H, W = out.shape
    if H < 3 or W < 3:
        raise ValueError("contrast_depth_loss requires H >= 3 and W >= 3")
    Hc, Wc = H - 2, W - 2
    denom = B * 8 * Hc * Wc            # mean over (B, 8, H-2, W-2)

    # Batch-on-lanes layout; pure layout plumbing (XLA fuses the transpose).
    out_t = jnp.transpose(out, (1, 2, 0))     # (H, W, B)
    lab_t = jnp.transpose(label, (1, 2, 0))

    itemsize = jnp.dtype(out.dtype).itemsize
    img_bytes = H * W * itemsize              # lane-dense: VMEM == raw bytes
    # Per-input block budget: 2 inputs x 2 pipeline buffers <= ~24 MiB, well
    # inside v7x's 64 MiB physical VMEM / 32 MiB default scoped limit.
    budget = 6 * 1024 * 1024
    if B <= 128:
        Bb = B                                # single (possibly thin) block
    else:
        cap = max(128, (budget // img_bytes) // 128 * 128)
        # Keep >= 4 grid blocks so v7x's two TensorCores both get work.
        quarter = -(-B // 4)
        quarter = -(-quarter // 128) * 128
        Bb = min(cap, max(128, quarter))
    num_blocks = -(-B // Bb)
    need_mask = (B % Bb) != 0                 # ragged tail handled in-kernel

    kernel = functools.partial(_contrast_depth_loss_kernel,
                               Hc=Hc, Wc=Wc, Bb=Bb, B=B, need_mask=need_mask)

    cost = pl.CostEstimate(
        flops=B * 8 * Hc * Wc * 7,
        transcendentals=0,
        bytes_accessed=2 * B * H * W * itemsize + num_blocks * Bb * 4)

    partials = pl.pallas_call(
        kernel,
        out_shape=jax.ShapeDtypeStruct((num_blocks, 1, Bb), jnp.float32),
        grid_spec=pltpu.PrefetchScalarGridSpec(
            num_scalar_prefetch=0,
            grid=(num_blocks,),
            in_specs=[
                pl.BlockSpec((H, W, Bb), lambda b: (0, 0, b)),
                pl.BlockSpec((H, W, Bb), lambda b: (0, 0, b)),
            ],
            out_specs=pl.BlockSpec((1, 1, Bb), lambda b: (b, 0, 0)),
        ),
        compiler_params=pltpu.CompilerParams(
            dimension_semantics=("parallel",),
            vmem_limit_bytes=32 * 1024 * 1024),
        cost_estimate=cost,
    )(out_t, lab_t)

    # Padded tail lanes were zeroed in-kernel, so a plain sum is exact.
    return jnp.sum(partials) / jnp.float32(denom)


def _reference_loss(out, label):
    """Pure-JAX reference of the PyTorch module (sanity check)."""
    out = out[:, 0] if out.ndim == 4 else out
    label = label[:, 0] if label.ndim == 4 else label
    H, W = out.shape[1:]
    Hc, Wc = H - 2, W - 2
    oc = out[:, 1:1 + Hc, 1:1 + Wc]
    lc = label[:, 1:1 + Hc, 1:1 + Wc]
    losses = []
    for (di, dj) in _NEIGHBOR_OFFSETS:
        co = out[:, di:di + Hc, dj:dj + Wc] - oc
        cl = label[:, di:di + Hc, dj:dj + Wc] - lc
        d = co - cl
        ad = jnp.abs(d)
        losses.append(jnp.where(ad < 1.0, 0.5 * d * d, ad - 0.5))
    stacked = jnp.stack(losses, axis=1)   # (B, 8, Hc, Wc)
    return jnp.mean(stacked)


if __name__ == "__main__":
    key = jax.random.PRNGKey(0)
    k1, k2 = jax.random.split(key)
    B, C, H, W = 2, 1, 16, 16
    out = jax.random.normal(k1, (B, C, H, W), dtype=jnp.float32)
    label = jax.random.normal(k2, (B, C, H, W), dtype=jnp.float32)

    loss = contrast_depth_loss(out, label)
    jax.block_until_ready(loss)

    ref = _reference_loss(out, label)
    assert jnp.allclose(loss, ref, atol=1e-5, rtol=1e-5), (loss, ref)

    print("KERNEL_OK")
</pallas_src>

<mosaic_0001>
module attributes {stable_mosaic.version = 11 : i64} {
  func.func @_contrast_depth_loss_kernel(%arg0: i32, %arg1: memref<16x16x2xf32, #tpu.memory_space<vmem>>, %arg2: memref<16x16x2xf32, #tpu.memory_space<vmem>>, %arg3: memref<1x1x2xf32, #tpu.memory_space<vmem>>) attributes {dimension_semantics = [#tpu.dimension_semantics<parallel>], iteration_bounds = array<i64: 1>, scalar_prefetch = 0 : i64, scratch_operands = 0 : i64, tpu.core_type = #tpu.core_type<tc>, window_params = [{transform_indices = @transform_0, window_bounds = array<i64: 16, 16, 2>}, {transform_indices = @transform_1, window_bounds = array<i64: 16, 16, 2>}, {transform_indices = @transform_2, window_bounds = array<i64: 1, 1, 2>}]} {
    %c0 = arith.constant 0 : index
    %c0_0 = arith.constant 0 : index
    %c0_1 = arith.constant 0 : index
    %0 = vector.load %arg1[%c0, %c0_0, %c0_1] : memref<16x16x2xf32, #tpu.memory_space<vmem>>, vector<16x16x2xf32>
    %c0_2 = arith.constant 0 : index
    %c0_3 = arith.constant 0 : index
    %c0_4 = arith.constant 0 : index
    %1 = vector.load %arg2[%c0_2, %c0_3, %c0_4] : memref<16x16x2xf32, #tpu.memory_space<vmem>>, vector<16x16x2xf32>
    %2 = arith.subf %0, %1 : vector<16x16x2xf32>
    %3 = vector.extract_strided_slice %2 {offsets = [1, 1, 0], sizes = [14, 14, 2], strides = [1, 1, 1]} : vector<16x16x2xf32> to vector<14x14x2xf32>
    %cst = arith.constant 0.000000e+00 : f32
    %4 = vector.broadcast %cst : f32 to vector<14x14x2xf32>
    %5 = vector.extract_strided_slice %2 {offsets = [0, 0, 0], sizes = [14, 14, 2], strides = [1, 1, 1]} : vector<16x16x2xf32> to vector<14x14x2xf32>
    %6 = arith.subf %5, %3 : vector<14x14x2xf32>
    %7 = math.absf %6 : vector<14x14x2xf32>
    %cst_5 = arith.constant 1.000000e+00 : f32
    %8 = vector.broadcast %cst_5 : f32 to vector<14x14x2xf32>
    %9 = arith.minimumf %7, %8 : vector<14x14x2xf32>
    %cst_6 = arith.constant 5.000000e-01 : f32
    %10 = vector.broadcast %cst_6 : f32 to vector<14x14x2xf32>
    %11 = arith.mulf %10, %9 : vector<14x14x2xf32>
    %12 = arith.subf %7, %11 : vector<14x14x2xf32>
    %13 = arith.mulf %9, %12 : vector<14x14x2xf32>
    %14 = arith.addf %4, %13 : vector<14x14x2xf32>
    %15 = vector.extract_strided_slice %2 {offsets = [0, 1, 0], sizes = [14, 14, 2], strides = [1, 1, 1]} : vector<16x16x2xf32> to vector<14x14x2xf32>
    %16 = arith.subf %15, %3 : vector<14x14x2xf32>
    %17 = math.absf %16 : vector<14x14x2xf32>
    %cst_7 = arith.constant 1.000000e+00 : f32
    %18 = vector.broadcast %cst_7 : f32 to vector<14x14x2xf32>
    %19 = arith.minimumf %17, %18 : vector<14x14x2xf32>
    %cst_8 = arith.constant 5.000000e-01 : f32
    %20 = vector.broadcast %cst_8 : f32 to vector<14x14x2xf32>
    %21 = arith.mulf %20, %19 : vector<14x14x2xf32>
    %22 = arith.subf %17, %21 : vector<14x14x2xf32>
    %23 = arith.mulf %19, %22 : vector<14x14x2xf32>
    %24 = arith.addf %14, %23 : vector<14x14x2xf32>
    %25 = vector.extract_strided_slice %2 {offsets = [0, 2, 0], sizes = [14, 14, 2], strides = [1, 1, 1]} : vector<16x16x2xf32> to vector<14x14x2xf32>
    %26 = arith.subf %25, %3 : vector<14x14x2xf32>
    %27 = math.absf %26 : vector<14x14x2xf32>
    %cst_9 = arith.constant 1.000000e+00 : f32
    %28 = vector.broadcast %cst_9 : f32 to vector<14x14x2xf32>
    %29 = arith.minimumf %27, %28 : vector<14x14x2xf32>
    %cst_10 = arith.constant 5.000000e-01 : f32
    %30 = vector.broadcast %cst_10 : f32 to vector<14x14x2xf32>
    %31 = arith.mulf %30, %29 : vector<14x14x2xf32>
    %32 = arith.subf %27, %31 : vector<14x14x2xf32>
    %33 = arith.mulf %29, %32 : vector<14x14x2xf32>
    %34 = arith.addf %24, %33 : vector<14x14x2xf32>
    %35 = vector.extract_strided_slice %2 {offsets = [1, 0, 0], sizes = [14, 14, 2], strides = [1, 1, 1]} : vector<16x16x2xf32> to vector<14x14x2xf32>
    %36 = arith.subf %35, %3 : vector<14x14x2xf32>
    %37 = math.absf %36 : vector<14x14x2xf32>
    %cst_11 = arith.constant 1.000000e+00 : f32
    %38 = vector.broadcast %cst_11 : f32 to vector<14x14x2xf32>
    %39 = arith.minimumf %37, %38 : vector<14x14x2xf32>
    %cst_12 = arith.constant 5.000000e-01 : f32
    %40 = vector.broadcast %cst_12 : f32 to vector<14x14x2xf32>
    %41 = arith.mulf %40, %39 : vector<14x14x2xf32>
    %42 = arith.subf %37, %41 : vector<14x14x2xf32>
    %43 = arith.mulf %39, %42 : vector<14x14x2xf32>
    %44 = arith.addf %34, %43 : vector<14x14x2xf32>
    %45 = vector.extract_strided_slice %2 {offsets = [1, 2, 0], sizes = [14, 14, 2], strides = [1, 1, 1]} : vector<16x16x2xf32> to vector<14x14x2xf32>
    %46 = arith.subf %45, %3 : vector<14x14x2xf32>
    %47 = math.absf %46 : vector<14x14x2xf32>
    %cst_13 = arith.constant 1.000000e+00 : f32
    %48 = vector.broadcast %cst_13 : f32 to vector<14x14x2xf32>
    %49 = arith.minimumf %47, %48 : vector<14x14x2xf32>
    %cst_14 = arith.constant 5.000000e-01 : f32
    %50 = vector.broadcast %cst_14 : f32 to vector<14x14x2xf32>
    %51 = arith.mulf %50, %49 : vector<14x14x2xf32>
    %52 = arith.subf %47, %51 : vector<14x14x2xf32>
    %53 = arith.mulf %49, %52 : vector<14x14x2xf32>
    %54 = arith.addf %44, %53 : vector<14x14x2xf32>
    %55 = vector.extract_strided_slice %2 {offsets = [2, 0, 0], sizes = [14, 14, 2], strides = [1, 1, 1]} : vector<16x16x2xf32> to vector<14x14x2xf32>
    %56 = arith.subf %55, %3 : vector<14x14x2xf32>
    %57 = math.absf %56 : vector<14x14x2xf32>
    %cst_15 = arith.constant 1.000000e+00 : f32
    %58 = vector.broadcast %cst_15 : f32 to vector<14x14x2xf32>
    %59 = arith.minimumf %57, %58 : vector<14x14x2xf32>
    %cst_16 = arith.constant 5.000000e-01 : f32
    %60 = vector.broadcast %cst_16 : f32 to vector<14x14x2xf32>
    %61 = arith.mulf %60, %59 : vector<14x14x2xf32>
    %62 = arith.subf %57, %61 : vector<14x14x2xf32>
    %63 = arith.mulf %59, %62 : vector<14x14x2xf32>
    %64 = arith.addf %54, %63 : vector<14x14x2xf32>
    %65 = vector.extract_strided_slice %2 {offsets = [2, 1, 0], sizes = [14, 14, 2], strides = [1, 1, 1]} : vector<16x16x2xf32> to vector<14x14x2xf32>
    %66 = arith.subf %65, %3 : vector<14x14x2xf32>
    %67 = math.absf %66 : vector<14x14x2xf32>
    %cst_17 = arith.constant 1.000000e+00 : f32
    %68 = vector.broadcast %cst_17 : f32 to vector<14x14x2xf32>
    %69 = arith.minimumf %67, %68 : vector<14x14x2xf32>
    %cst_18 = arith.constant 5.000000e-01 : f32
    %70 = vector.broadcast %cst_18 : f32 to vector<14x14x2xf32>
    %71 = arith.mulf %70, %69 : vector<14x14x2xf32>
    %72 = arith.subf %67, %71 : vector<14x14x2xf32>
    %73 = arith.mulf %69, %72 : vector<14x14x2xf32>
    %74 = arith.addf %64, %73 : vector<14x14x2xf32>
    %75 = vector.extract_strided_slice %2 {offsets = [2, 2, 0], sizes = [14, 14, 2], strides = [1, 1, 1]} : vector<16x16x2xf32> to vector<14x14x2xf32>
    %76 = arith.subf %75, %3 : vector<14x14x2xf32>
    %77 = math.absf %76 : vector<14x14x2xf32>
    %cst_19 = arith.constant 1.000000e+00 : f32
    %78 = vector.broadcast %cst_19 : f32 to vector<14x14x2xf32>
    %79 = arith.minimumf %77, %78 : vector<14x14x2xf32>
    %cst_20 = arith.constant 5.000000e-01 : f32
    %80 = vector.broadcast %cst_20 : f32 to vector<14x14x2xf32>
    %81 = arith.mulf %80, %79 : vector<14x14x2xf32>
    %82 = arith.subf %77, %81 : vector<14x14x2xf32>
    %83 = arith.mulf %79, %82 : vector<14x14x2xf32>
    %84 = arith.addf %74, %83 : vector<14x14x2xf32>
    %cst_21 = arith.constant dense<0.000000e+00> : vector<2xf32>
    %85 = vector.multi_reduction <add>, %84, %cst_21 [0, 1] : vector<14x14x2xf32> to vector<2xf32>
    %c0_22 = arith.constant 0 : index
    %c0_23 = arith.constant 0 : index
    %c0_24 = arith.constant 0 : index
    %86 = vector.load %arg3[%c0_22, %c0_23, %c0_24] : memref<1x1x2xf32, #tpu.memory_space<vmem>>, vector<1x1x2xf32>
    %87 = vector.shape_cast %86 : vector<1x1x2xf32> to vector<2xf32>
    %88 = vector.shape_cast %85 : vector<2xf32> to vector<1x1x2xf32>
    tpu.vector_store %arg3[%c0_22, %c0_23, %c0_24], %88 {strides = array<i32>} : memref<1x1x2xf32, #tpu.memory_space<vmem>>, vector<1x1x2xf32>,
    return
  }
  func.func @transform_0(%arg0: i32) -> (i32, i32, i32) {
    %c0_i32 = arith.constant 0 : i32
    %c0_i32_0 = arith.constant 0 : i32
    %c0_i32_1 = arith.constant 0 : i32
    return %c0_i32, %c0_i32_0, %arg0 : i32, i32, i32
  }
  func.func @transform_1(%arg0: i32) -> (i32, i32, i32) {
    %c0_i32 = arith.constant 0 : i32
    %c0_i32_0 = arith.constant 0 : i32
    %c0_i32_1 = arith.constant 0 : i32
    return %c0_i32, %c0_i32_0, %arg0 : i32, i32, i32
  }
  func.func @transform_2(%arg0: i32) -> (i32, i32, i32) {
    %c0_i32 = arith.constant 0 : i32
    %c0_i32_0 = arith.constant 0 : i32
    %c0_i32_1 = arith.constant 0 : i32
    return %arg0, %c0_i32, %c0_i32_0 : i32, i32, i32
  }
}

</mosaic_0001>

<bundles_post_ra>
// kernel: tpu_custom_call.1
= control target key start
LH: loop header
LB: loop body
LE: loop exit
PB: predicated region body
PF: predicated region fallthrough
CT: control target
= control target key end

     0   :  { %7 = vsyncpa [#allocation3], 0  ;;  %vm136_vm0 = vcmask 1046528   ;;  %vm697_vm1 = vcmask 1040384   ;;  %vm964_vm2 = vcmask 1045504   ;;  %vm2337_vm3 = vcmask 15360   ;;  %s6174_s0 = inlined_call_operand.vmem [shape: f32[16,16,2], index: 0, kind: input, shape index: {}]   ;;  %s6175_s1 = inlined_call_operand.vmem [shape: f32[16,16,2], index: 1, kind: input, shape index: {}]   ;;  %s6176_s2 = inlined_call_operand.hbm [shape: f32[1,1,2], index: 2, kind: output, shape index: {}]  }
   0x1   :  { %v14_v0 = vld [vmem:[%s6174_s0 + $0x10] sm:$0xff]  ;;  %v15_v1 = vld [vmem:[%s6174_s0 + $0x18] sm:$0xff]  ;;  %v12_v4 = vld [vmem:[%s6174_s0] sm:$0xff]  ;;  %vm2339_vm4 = vcmask 13312   ;;  %vm2400_vm5 = vcmask 8192  }
   0x2   :  { %v46_v2 = vld [vmem:[%s6175_s1 + $0x10] sm:$0xff]  ;;  %v47_v3 = vld [vmem:[%s6175_s1 + $0x18] sm:$0xff]  ;;  %v16_v5 = vld [vmem:[%s6174_s0 + $0x20] sm:$0xff] }
   0x3   :  { %v13_v6 = vld [vmem:[%s6174_s0 + $0x8] sm:$0xff]  ;;  %v18_v8 = vld [vmem:[%s6174_s0 + $0x30] sm:$0xff]  ;;  %v44_v9 = vld [vmem:[%s6175_s1] sm:$0xff]  ;;  %v2506_v17 = vsub.f32 %v14_v0, %v46_v2  ;;  %v2508_v18 = vsub.f32 %v15_v1, %v47_v3 }
   0x4   :  { %v17_v7 = vld [vmem:[%s6174_s0 + $0x28] sm:$0xff]  ;;  %v19_v10 = vld [vmem:[%s6174_s0 + $0x38] sm:$0xff]  ;;  %v20_v11 = vld [vmem:[%s6174_s0 + $0x40] sm:$0xff]  ;;  %v2564_v37 = vsub.f32 %v12_v4, %v44_v9 }
   0x5   :  { %v21_v12 = vld [vmem:[%s6174_s0 + $0x48] sm:$0xff]  ;;  %v22_v13 = vld [vmem:[%s6174_s0 + $0x50] sm:$0xff]  ;;  %v48_v15 = vld [vmem:[%s6175_s1 + $0x20] sm:$0xff]  ;;  %6521 = vst [vmem:[#allocation5_spill] sm:$0xff] %v2506_v17  ;;  %v137_v49 = vrot.slane %v2506_v17, 1  ;;  %v2597_v50 = vrot.slane %v2508_v18, 1 }
   0x6   :  { %v45_v14 = vld [vmem:[%s6175_s1 + $0x8] sm:$0xff]  ;;  %6522 = vst [vmem:[#allocation6_spill] sm:$0xff] %v2508_v18  ;;  %v23_v19 = vld [vmem:[%s6174_s0 + $0x58] sm:$0xff]  ;;  %v24_v20 = vld [vmem:[%s6174_s0 + $0x60] sm:$0xff]  ;;  %v2566_v38 = vsub.f32 %v16_v5, %v48_v15 }
   0x7   :  { %v49_v16 = vld [vmem:[%s6175_s1 + $0x28] sm:$0xff]  ;;  %v26_v22 = vld [vmem:[%s6174_s0 + $0x70] sm:$0xff]  ;;  %v51_v24 = vld [vmem:[%s6175_s1 + $0x38] sm:$0xff]  ;;  %6523 = vst [vmem:[#allocation7_spill] sm:$0xff] %v2564_v37  ;;  %v2591_v47 = vsub.f32 %v13_v6, %v45_v14 }
   0x8   :  { %v25_v21 = vld [vmem:[%s6174_s0 + $0x68] sm:$0xff]  ;;  %v50_v23 = vld [vmem:[%s6175_s1 + $0x30] sm:$0xff]  ;;  %v52_v25 = vld [vmem:[%s6175_s1 + $0x40] sm:$0xff]  ;;  %6524 = vst [vmem:[#allocation8_spill] sm:$0xff] %v2566_v38  ;;  %v2568_v39 = vsub.f32 %v17_v7, %v49_v16  ;;  %v2617_v57 = vsub.f32 %v19_v10, %v51_v24 }
   0x9   :  { %v27_v26 = vld [vmem:[%s6174_s0 + $0x78] sm:$0xff]  ;;  %v28_v27 = vld [vmem:[%s6174_s0 + $0x80] sm:$0xff]  ;;  %v53_v28 = vld [vmem:[%s6175_s1 + $0x48] sm:$0xff]  ;;  %6526 = vst [vmem:[#allocation10_spill] sm:$0xff] %v2591_v47  ;;  %v2593_v48 = vsub.f32 %v18_v8, %v50_v23  ;;  %v2619_v58 = vsub.f32 %v20_v11, %v52_v25 }
   0xa   :  { %v54_v29 = vld [vmem:[%s6175_s1 + $0x50] sm:$0xff]  ;;  %v55_v30 = vld [vmem:[%s6175_s1 + $0x58] sm:$0xff]  ;;  %v29_v31 = vld [vmem:[%s6174_s0 + $0x88] sm:$0xff]  ;;  %6525 = vst [vmem:[#allocation9_spill] sm:$0xff] %v2568_v39  ;;  %v2621_v59 = vsub.f32 %v21_v12, %v53_v28  ;;  %v140_v12 = vrot.slane %v2566_v38, 1 }
   0xb   :  { %v30_v32 = vld [vmem:[%s6174_s0 + $0x90] sm:$0xff]  ;;  %v31_v33 = vld [vmem:[%s6174_s0 + $0x98] sm:$0xff]  ;;  %v56_v34 = vld [vmem:[%s6175_s1 + $0x60] sm:$0xff]  ;;  %6527 = vst [vmem:[#allocation11_spill] sm:$0xff] %v2593_v48  ;;  %v2623_v60 = vsub.f32 %v22_v13, %v54_v29  ;;  %v2643_v3 = vsub.f32 %v23_v19, %v55_v30  ;;  %v2666_v13 = vrot.slane %v2568_v39, 1 }
   0xc   :  { %v57_v35 = vld [vmem:[%s6175_s1 + $0x68] sm:$0xff]  ;;  %v58_v36 = vld [vmem:[%s6175_s1 + $0x70] sm:$0xff]  ;;  %v32_v40 = vld [vmem:[%s6174_s0 + $0xa0] sm:$0xff]  ;;  %6528 = vst [vmem:[#allocation12_spill] sm:$0xff] %v2597_v50  ;;  %v2645_v4 = vsub.f32 %v24_v20, %v56_v34 }
   0xd   :  { %v33_v41 = vld [vmem:[%s6174_s0 + $0xa8] sm:$0xff]  ;;  %v34_v42 = vld [vmem:[%s6174_s0 + $0xb0] sm:$0xff]  ;;  %v35_v43 = vld [vmem:[%s6174_s0 + $0xb8] sm:$0xff]  ;;  %6529 = vst [vmem:[#allocation13_spill] sm:$0xff] %v2617_v57  ;;  %v2647_v5 = vsub.f32 %v25_v21, %v57_v35  ;;  %v2649_v6 = vsub.f32 %v26_v22, %v58_v36  ;;  %v2685_v22 = vsel %vm136_vm0, %v137_v49, %v2597_v50  ;;  %v2716_v36 = vsel %vm136_vm0, %v140_v12, %v2666_v13 }
   0xe   :  { %v59_v44 = vld [vmem:[%s6175_s1 + $0x78] sm:$0xff]  ;;  %v60_v45 = vld [vmem:[%s6175_s1 + $0x80] sm:$0xff]  ;;  %v61_v46 = vld [vmem:[%s6175_s1 + $0x88] sm:$0xff]  ;;  %6530 = vst [vmem:[#allocation14_spill] sm:$0xff] %v2619_v58 }
   0xf   :  { %v36_v51 = vld [vmem:[%s6174_s0 + $0xc0] sm:$0xff]  ;;  %v37_v52 = vld [vmem:[%s6174_s0 + $0xc8] sm:$0xff]  ;;  %v38_v53 = vld [vmem:[%s6174_s0 + $0xd0] sm:$0xff]  ;;  %6531 = vst [vmem:[#allocation15_spill] sm:$0xff] %v2621_v59  ;;  %v2660_v10 = vsub.f32 %v27_v26, %v59_v44  ;;  %v2662_v11 = vsub.f32 %v28_v27, %v60_v45  ;;  %v2677_v19 = vsub.f32 %v29_v31, %v61_v46  ;;  %v149_v44 = vrot.slane %v2623_v60, 1 }
  0x10   :  { %v62_v54 = vld [vmem:[%s6175_s1 + $0x90] sm:$0xff]  ;;  %v63_v55 = vld [vmem:[%s6175_s1 + $0x98] sm:$0xff]  ;;  %v64_v56 = vld [vmem:[%s6175_s1 + $0xa0] sm:$0xff]  ;;  %6532 = vst [vmem:[#allocation16_spill] sm:$0xff] %v2623_v60  ;;  %v2729_v45 = vrot.slane %v2643_v3, 1  ;;  %v152_v46 = vrot.slane %v2645_v4, 1 }
  0x11   :  { %v39_v61 = vld [vmem:[%s6174_s0 + $0xd8] sm:$0xff]  ;;  %v40_v62 = vld [vmem:[%s6174_s0 + $0xe0] sm:$0xff]  ;;  %v41_v63 = vld [vmem:[%s6174_s0 + $0xe8] sm:$0xff]  ;;  %6533 = vst [vmem:[#allocation17_spill] sm:$0xff] %v2643_v3  ;;  %v2679_v20 = vsub.f32 %v30_v32, %v62_v54  ;;  %v2681_v21 = vsub.f32 %v31_v33, %v63_v55  ;;  %v2693_v25 = vsub.f32 %v32_v40, %v64_v56  ;;  %v143_v32 = vrot.slane %v2593_v48, 1 }
  0x12   :  { %v65_v0 = vld [vmem:[%s6175_s1 + $0xa8] sm:$0xff]  ;;  %v66_v1 = vld [vmem:[%s6175_s1 + $0xb0] sm:$0xff]  ;;  %v67_v2 = vld [vmem:[%s6175_s1 + $0xb8] sm:$0xff]  ;;  %6534 = vst [vmem:[#allocation18_spill] sm:$0xff] %v2645_v4  ;;  %v2733_v49 = vrot.slane %v2647_v5, 1  ;;  %v2743_v54 = vrot.slane %v2660_v10, 1 }
  0x13   :  { %6535 = vst [vmem:[#allocation19_spill] sm:$0xff] %v2647_v5  ;;  %6536 = vst [vmem:[#allocation20_spill] sm:$0xff] %v2649_v6  ;;  %v68_v7 = vld [vmem:[%s6175_s1 + $0xc0] sm:$0xff]  ;;  %v69_v8 = vld [vmem:[%s6175_s1 + $0xc8] sm:$0xff]  ;;  %v2695_v26 = vsub.f32 %v33_v41, %v65_v0  ;;  %v2697_v27 = vsub.f32 %v34_v42, %v66_v1  ;;  %v2699_v28 = vsub.f32 %v35_v43, %v67_v2  ;;  %v2721_v41 = vrot.slane %v2617_v57, 1 }
  0x14   :  { %v70_v9 = vld [vmem:[%s6175_s1 + $0xd0] sm:$0xff]  ;;  %6537 = vst [vmem:[#allocation21_spill] sm:$0xff] %v2660_v10  ;;  %6538 = vst [vmem:[#allocation22_spill] sm:$0xff] %v2662_v11  ;;  %v71_v14 = vld [vmem:[%s6175_s1 + $0xd8] sm:$0xff]  ;;  %v2701_v29 = vsub.f32 %v36_v51, %v68_v7  ;;  %v2703_v30 = vsub.f32 %v37_v52, %v69_v8  ;;  %v146_v42 = vrot.slane %v2619_v58, 1  ;;  %v2725_v43 = vrot.slane %v2621_v59, 1 }
  0x15   :  { %6539 = vst [vmem:[#allocation23_spill] sm:$0xff] %v2666_v13  ;;  %v72_v15 = vld [vmem:[%s6175_s1 + $0xe0] sm:$0xff]  ;;  %v73_v16 = vld [vmem:[%s6175_s1 + $0xe8] sm:$0xff]  ;;  %6540 = vst [vmem:[#allocation24_spill] sm:$0xff] %v2677_v19  ;;  %v2705_v31 = vsub.f32 %v38_v53, %v70_v9  ;;  %v2708_v33 = vsub.f32 %v39_v61, %v71_v14  ;;  %v155_v53 = vrot.slane %v2649_v6, 1  ;;  %v158_v55 = vrot.slane %v2662_v11, 1 }
  0x16   :  { %6541 = vst [vmem:[#allocation25_spill] sm:$0xff] %v2679_v20  ;;  %6542 = vst [vmem:[#allocation26_spill] sm:$0xff] %v2681_v21  ;;  %v42_v23 = vld [vmem:[%s6174_s0 + $0xf0] sm:$0xff]  ;;  %v2710_v34 = vsub.f32 %v40_v62, %v72_v15  ;;  %v2712_v35 = vsub.f32 %v41_v63, %v73_v16  ;;  %v43_v51 = vld [vmem:[%s6174_s0 + $0xf8] sm:$0xff]  ;;  %v2747_v56 = vrot.slane %v2677_v19, 1  ;;  %v161_v61 = vrot.slane %v2679_v20, 1 }
  0x17   :  { %6543 = vst [vmem:[#allocation27_spill] sm:$0xff] %v2685_v22  ;;  %v74_v24 = vld [vmem:[%s6175_s1 + $0xf0] sm:$0xff]  ;;  %6544 = vst [vmem:[#allocation28_spill] sm:$0xff] %v2693_v25  ;;  %v75_v52 = vld [vmem:[%s6175_s1 + $0xf8] sm:$0xff]  ;;  %v2751_v62 = vrot.slane %v2681_v21, 1  ;;  %v164_v63 = vrot.slane %v2693_v25, 1  ;;  %v2769_v12 = vsel %vm136_vm0, %v143_v32, %v2721_v41  ;;  %v2777_v16 = vsel %vm136_vm0, %v146_v42, %v2725_v43 }
  0x18   :  { %6545 = vst [vmem:[#allocation29_spill] sm:$0xff] %v2695_v26  ;;  %6546 = vst [vmem:[#allocation30_spill] sm:$0xff] %v2697_v27  ;;  %v2718_v40 = vsub.f32 %v42_v23, %v74_v24  ;;  %v2755_v0 = vrot.slane %v2695_v26, 1  ;;  %v167_v1 = vrot.slane %v2697_v27, 1  ;;  %v2759_v2 = vrot.slane %v2699_v28, 1  ;;  %s2439_s0 = smov [#allocation2]  }
  0x19   :  { %6547 = vst [vmem:[#allocation31_spill] sm:$0xff] %v2699_v28  ;;  %6548 = vst [vmem:[#allocation32_spill] sm:$0xff] %v2701_v29  ;;  %v170_v7 = vrot.slane %v2701_v29, 1  ;;  %v2763_v8 = vrot.slane %v2703_v30, 1  ;;  %v2765_v9 = vsub.f32 %v43_v51, %v75_v52  ;;  %v173_v14 = vrot.slane %v2705_v31, 1  ;;  %s2408_s1 = sshll.u32 %s2439_s0, 4  ;;  %s2409_s1 = int_to_ptr.vmem [resolvable:$true] %s2408_s1 }
  0x1a   :  { %6549 = vst [vmem:[#allocation33_spill] sm:$0xff] %v2703_v30  ;;  %6550 = vst [vmem:[#allocation34_spill] sm:$0xff] %v2705_v31  ;;  %v2773_v15 = vrot.slane %v2708_v33, 1  ;;  %v2781_v23 = vsel %vm136_vm0, %v149_v44, %v2729_v45  ;;  %v176_v24 = vrot.slane %v2710_v34, 1  ;;  %v2785_v51 = vrot.slane %v2712_v35, 1  ;;  %s2417_s25 = scalar_lea.vmem %s2409_s1, 16  ;;  %p2422_p1 = scmp.lt.s32.totalorder %s2409_s1, %s2409_s1 }
  0x1b   :  { %6551 = vst [vmem:[#allocation35_spill] sm:$0xff] %v2708_v33  ;;  %6552 = vst [vmem:[#allocation36_spill] sm:$0xff] %v2710_v34  ;;  %v2789_v32 = vsel %vm136_vm0, %v152_v46, %v2733_v49  ;;  %v2793_v52 = vsel %vm136_vm0, %v155_v53, %v2743_v54  ;;  %v2797_v42 = vsel %vm136_vm0, %v158_v55, %v2747_v56  ;;  %p2418_p0 = scmp.ne.s32.totalorder %s2409_s1, %s2417_s25  ;;  %s2421_s26 = scalar_lea.vmem %s2409_s1, 32 }
  0x1c   :  { %6553 = vst [vmem:[#allocation37_spill] sm:$0xff] %v2712_v35  ;;  %6554 = vst [vmem:[#allocation38_spill] sm:$0xff] %v2716_v36  ;;  %v2801_v44 = vsel %vm136_vm0, %v161_v61, %v2751_v62  ;;  %v2809_v46 = vsel %vm136_vm0, %v167_v1, %v2759_v2  ;;  %v2813_v53 = vsel %vm136_vm0, %v170_v7, %v2763_v8  ;;  %p2423_p2 = scmp.lt.s32.totalorder %s2421_s26, %s2417_s25 }
  0x1d   :  { %6555 = vst [vmem:[#allocation39_spill] sm:$0xff] %v2718_v40  ;;  %6556 = vst [vmem:[#allocation40_spill] sm:$0xff] %v2721_v41  ;;  %v207_v55 = vsub.f32 %v2564_v37, %v2685_v22  ;;  %v2819_v40 = vsel %vm136_vm0, %v173_v14, %v2773_v15  ;;  %v208_v61 = vsub.f32 %v2591_v47, %v2597_v50 }
  0x1e   :  { %6557 = vst [vmem:[#allocation41_spill] sm:$0xff] %v2725_v43  ;;  %6558 = vst [vmem:[#allocation42_spill] sm:$0xff] %v2729_v45  ;;  %v210_v1 = vsub.f32 %v2508_v18, %v2666_v13  ;;  %v2829_v7 = vsel %vm136_vm0, %v176_v24, %v2785_v51  ;;  %v211_v22 = vsub.f32 %v2566_v38, %v2769_v12  ;;  %p2424_p3 = por %p2423_p2, %p2422_p1 }
  0x1f   :  { %6559 = vst [vmem:[#allocation43_spill] sm:$0xff] %v2733_v49  ;;  %6560 = vst [vmem:[#allocation44_spill] sm:$0xff] %v2743_v54  ;;  %v212_v14 = vsub.f32 %v2568_v39, %v2721_v41  ;;  %v213_v35 = vsub.f32 %v2593_v48, %v2777_v16  ;;  %v214_v50 = vsub.f32 %v2617_v57, %v2725_v43  ;;  %v2879_v34 = vand.u32 2147483647, %v207_v55 }
  0x20   :  { %6561 = vst [vmem:[#allocation45_spill] sm:$0xff] %v2747_v56  ;;  %6562 = vst [vmem:[#allocation46_spill] sm:$0xff] %v2751_v62  ;;  %v216_v13 = vsub.f32 %v2621_v59, %v2729_v45  ;;  %v217_v24 = vsub.f32 %v2623_v60, %v2789_v32  ;;  %v219_v41 = vsub.f32 %v2645_v4, %v2793_v52  ;;  %p2425_p4 = pnand %p2424_p3, %p2418_p0 }
  0x21   :  { %6563 = vst [vmem:[#allocation47_spill] sm:$0xff] %v2755_v0  ;;  %6564 = vst [vmem:[#allocation48_spill] sm:$0xff] %v2759_v2  ;;  %v221_v43 = vsub.f32 %v2649_v6, %v2797_v42  ;;  %v223_v45 = vsub.f32 %v2662_v11, %v2801_v44 }
  0x22   :  { %6565 = vst [vmem:[#allocation49_spill] sm:$0xff] %v2763_v8  ;;  %6566 = vst [vmem:[#allocation50_spill] sm:$0xff] %v2765_v9  ;;  %v2805_v9 = vsel %vm136_vm0, %v164_v63, %v2755_v0  ;;  %v209_v63 = vsub.f32 %v2506_v17, %v2716_v36  ;;  %v215_v36 = vsub.f32 %v2619_v58, %v2781_v23 }
  0x23   :  { %6567 = vst [vmem:[#allocation51_spill] sm:$0xff] %v2769_v12  ;;  %6568 = vst [vmem:[#allocation52_spill] sm:$0xff] %v2773_v15  ;;  %v218_v12 = vsub.f32 %v2643_v3, %v2733_v49  ;;  %v225_v49 = vsub.f32 %v2679_v20, %v2805_v9 }
  0x24   :  { %6569 = vst [vmem:[#allocation53_spill] sm:$0xff] %v2777_v16  ;;  %6570 = vst [vmem:[#allocation54_spill] sm:$0xff] %v2781_v23  ;;  %v220_v16 = vsub.f32 %v2647_v5, %v2743_v54  ;;  %v222_v23 = vsub.f32 %v2660_v10, %v2747_v56  ;;  %v227_v54 = vsub.f32 %v2693_v25, %v2809_v46 }
  0x25   :  { %6571 = vst [vmem:[#allocation55_spill] sm:$0xff] %v2785_v51  ;;  %6572 = vst [vmem:[#allocation56_spill] sm:$0xff] %v2789_v32  ;;  %v224_v32 = vsub.f32 %v2677_v19, %v2751_v62  ;;  %v229_v56 = vsub.f32 %v2697_v27, %v2813_v53  ;;  %v231_v62 = vsub.f32 %v2701_v29, %v2819_v40  ;;  %v2885_v27 = vand.u32 2147483647, %v210_v1 }
  0x26   :  { %6573 = vst [vmem:[#allocation57_spill] sm:$0xff] %v2793_v52  ;;  %6574 = vst [vmem:[#allocation58_spill] sm:$0xff] %v2797_v42  ;;  %v226_v52 = vsub.f32 %v2681_v21, %v2755_v0  ;;  %v228_v42 = vsub.f32 %v2695_v26, %v2759_v2  ;;  %v233_v0 = vsub.f32 %v2705_v31, %v2829_v7  ;;  %v2881_v2 = vand.u32 2147483647, %v208_v61 }
  0x27   :  { %6575 = vst [vmem:[#allocation59_spill] sm:$0xff] %v2801_v44  ;;  %6576 = vst [vmem:[#allocation60_spill] sm:$0xff] %v2805_v9  ;;  %v230_v44 = vsub.f32 %v2699_v28, %v2763_v8  ;;  %v232_v9 = vsub.f32 %v2703_v30, %v2773_v15  ;;  %v2887_v8 = vand.u32 2147483647, %v211_v22  ;;  %v2893_v30 = vand.u32 2147483647, %v213_v35 }
  0x28   :  { %6577 = vst [vmem:[#allocation61_spill] sm:$0xff] %v2809_v46  ;;  %6578 = vst [vmem:[#allocation62_spill] sm:$0xff] %v2813_v53  ;;  %v234_v46 = vsub.f32 %v2708_v33, %v2785_v51  ;;  %v2883_v53 = vand.u32 2147483647, %v209_v63  ;;  %v2897_v51 = vand.u32 2147483647, %v215_v36 }
  0x29   :  { %6579 = vst [vmem:[#allocation63_spill] sm:$0xff] %v2819_v40  ;;  %6580 = vst [vmem:[#allocation64_spill] sm:$0xff] %v2829_v7  ;;  %v2889_v40 = vand.u32 2147483647, %v212_v14  ;;  %v2895_v7 = vand.u32 2147483647, %v214_v50 }
  0x2a   :  { %v2901_v61 = vand.u32 2147483647, %v216_v13  ;;  %v2903_v63 = vand.u32 2147483647, %v217_v24  ;;  %v2905_v22 = vand.u32 2147483647, %v218_v12 }
  0x2b   :  { %v2909_v14 = vand.u32 2147483647, %v219_v41  ;;  %v2911_v35 = vand.u32 2147483647, %v220_v16  ;;  %v2913_v50 = vand.u32 2147483647, %v221_v43 }
  0x2c   :  { %v2917_v15 = vand.u32 2147483647, %v222_v23  ;;  %v2919_v13 = vand.u32 2147483647, %v223_v45  ;;  %v2921_v24 = vand.u32 2147483647, %v224_v32 }
  0x2d   :  { %6581 = vst [vmem:[#allocation65_spill] sm:$0xff] %v2911_v35  ;;  %v2925_v55 = vand.u32 2147483647, %v225_v49  ;;  %v2927_v41 = vand.u32 2147483647, %v226_v52  ;;  %v6589_v32 = vmin.f32 %v2885_v27, 1.0 }
  0x2e   :  { %6582 = vst [vmem:[#allocation66_spill] sm:$0xff] %v2917_v15  ;;  %v2929_v16 = vand.u32 2147483647, %v227_v54  ;;  %v2933_v1 = vand.u32 2147483647, %v228_v42  ;;  %v6586_v54 = vmin.f32 %v2879_v34, 1.0 }
  0x2f   :  { %6583 = vst [vmem:[#allocation67_spill] sm:$0xff] %v2925_v55  ;;  %v2935_v23 = vand.u32 2147483647, %v229_v56  ;;  %v2937_v45 = vand.u32 2147483647, %v230_v44  ;;  %v6587_v42 = vmin.f32 %v2881_v2, 1.0 }
  0x30   :  { %v2941_v36 = vand.u32 2147483647, %v231_v62  ;;  %v2943_v49 = vand.u32 2147483647, %v232_v9  ;;  %v2945_v52 = vand.u32 2147483647, %v233_v0 }
  0x31   :  { %v2949_v12 = vand.u32 2147483647, %v234_v46  ;;  %v291_v58 = vmul.f32 0.5, %v6586_v54  ;;  %v292_v56 = vmul.f32 0.5, %v6587_v42  ;;  %v6588_v44 = vmin.f32 %v2883_v53, 1.0 }
  0x32   :  { %6584 = vst [vmem:[#allocation68_spill] sm:$0xff] %v2941_v36  ;;  %6585 = vst [vmem:[#allocation69_spill] sm:$0xff] %v2945_v52  ;;  %v294_v62 = vmul.f32 0.5, %v6589_v32  ;;  %v6590_v9 = vmin.f32 %v2887_v8, 1.0  ;;  %v6591_v0 = vmin.f32 %v2889_v40, 1.0  ;;  %v6592_v46 = vmin.f32 %v2893_v30, 1.0 }
  0x33   :  { %v293_v57 = vmul.f32 0.5, %v6588_v44  ;;  %v6593_v54 = vmin.f32 %v2895_v7, 1.0  ;;  %v6594_v42 = vmin.f32 %v2897_v51, 1.0  ;;  %v6595_v44 = vmin.f32 %v2901_v61, 1.0 }
  0x34   :  { %v295_v48 = vmul.f32 0.5, %v6590_v9  ;;  %v296_v43 = vmul.f32 0.5, %v6591_v0  ;;  %v297_v39 = vmul.f32 0.5, %v6592_v46  ;;  %v6596_v32 = vmin.f32 %v2903_v63, 1.0 }
  0x35   :  { %v298_v38 = vmul.f32 0.5, %v6593_v54  ;;  %v299_v18 = vmul.f32 0.5, %v6594_v42  ;;  %v300_v47 = vmul.f32 0.5, %v6595_v44  ;;  %v6597_v9 = vmin.f32 %v2905_v22, 1.0 }
  0x36   :  { %v301_v17 = vmul.f32 0.5, %v6596_v32  ;;  %v6598_v0 = vmin.f32 %v2909_v14, 1.0  ;;  %v6599_v46 = vmin.f32 %v2911_v35, 1.0  ;;  %v6600_v54 = vmin.f32 %v2913_v50, 1.0 }
  0x37   :  { %v302_v37 = vmul.f32 0.5, %v6597_v9  ;;  %v6601_v42 = vmin.f32 %v2917_v15, 1.0  ;;  %v6602_v44 = vmin.f32 %v2919_v13, 1.0  ;;  %v6603_v32 = vmin.f32 %v2921_v24, 1.0 }
  0x38   :  { %v303_v33 = vmul.f32 0.5, %v6598_v0  ;;  %v304_v31 = vmul.f32 0.5, %v6599_v46  ;;  %v305_v29 = vmul.f32 0.5, %v6600_v54  ;;  %v6604_v9 = vmin.f32 %v2925_v55, 1.0 }
  0x39   :  { %v306_v28 = vmul.f32 0.5, %v6601_v42  ;;  %v307_v26 = vmul.f32 0.5, %v6602_v44  ;;  %v308_v25 = vmul.f32 0.5, %v6603_v32  ;;  %v6605_v0 = vmin.f32 %v2927_v41, 1.0 }
  0x3a   :  { %v309_v21 = vmul.f32 0.5, %v6604_v9  ;;  %v6606_v46 = vmin.f32 %v2929_v16, 1.0  ;;  %v6607_v54 = vmin.f32 %v2933_v1, 1.0  ;;  %v6608_v42 = vmin.f32 %v2935_v23, 1.0 }
  0x3b   :  { %v310_v20 = vmul.f32 0.5, %v6605_v0  ;;  %v6609_v44 = vmin.f32 %v2937_v45, 1.0  ;;  %v6610_v32 = vmin.f32 %v2941_v36, 1.0  ;;  %v6611_v9 = vmin.f32 %v2943_v49, 1.0 }
  0x3c   :  { %v311_v19 = vmul.f32 0.5, %v6606_v46  ;;  %v312_v11 = vmul.f32 0.5, %v6607_v54  ;;  %v313_v10 = vmul.f32 0.5, %v6608_v42  ;;  %v6612_v0 = vmin.f32 %v2945_v52, 1.0 }
  0x3d   :  { %v314_v6 = vmul.f32 0.5, %v6609_v44  ;;  %v315_v5 = vmul.f32 0.5, %v6610_v32  ;;  %v316_v60 = vmul.f32 0.5, %v6611_v9  ;;  %v6613_v46 = vmin.f32 %v2949_v12, 1.0 }
  0x3e   :  { %v317_v4 = vmul.f32 0.5, %v6612_v0  ;;  %v319_v54 = vsub.f32 %v2879_v34, %v291_v58  ;;  %v320_v3 = vsub.f32 %v2881_v2, %v292_v56  ;;  %v321_v42 = vsub.f32 %v2883_v53, %v293_v57 }
  0x3f   :  { %v318_v59 = vmul.f32 0.5, %v6613_v46  ;;  %v322_v44 = vsub.f32 %v2885_v27, %v294_v62  ;;  %v323_v36 = vsub.f32 %v2887_v8, %v295_v48  ;;  %v324_v32 = vsub.f32 %v2889_v40, %v296_v43 }
  0x40   :  { %v325_v9 = vsub.f32 %v2893_v30, %v297_v39  ;;  %v326_v52 = vsub.f32 %v2895_v7, %v298_v38  ;;  %v327_v0 = vsub.f32 %v2897_v51, %v299_v18  ;;  %v328_v46 = vsub.f32 %v2901_v61, %v300_v47 }
  0x41   :  { %v329_v58 = vsub.f32 %v2903_v63, %v301_v17  ;;  %v330_v56 = vsub.f32 %v2905_v22, %v302_v37  ;;  %v331_v57 = vsub.f32 %v2909_v14, %v303_v33  ;;  %v332_v62 = vsub.f32 %v2911_v35, %v304_v31  ;;  %v6614_v35 = vld [vmem:[#allocation68_spill] sm:$0xff] }
  0x42   :  { %v333_v48 = vsub.f32 %v2913_v50, %v305_v29  ;;  %v334_v43 = vsub.f32 %v2917_v15, %v306_v28  ;;  %v335_v39 = vsub.f32 %v2919_v13, %v307_v26  ;;  %v336_v38 = vsub.f32 %v2921_v24, %v308_v25  ;;  %v6615_v15 = vld [vmem:[#allocation69_spill] sm:$0xff] }
  0x43   :  { %v337_v18 = vsub.f32 %v2925_v55, %v309_v21  ;;  %v338_v47 = vsub.f32 %v2927_v41, %v310_v20  ;;  %v339_v17 = vsub.f32 %v2929_v16, %v311_v19  ;;  %v340_v37 = vsub.f32 %v2933_v1, %v312_v11 }
  0x44   :  { %v341_v33 = vsub.f32 %v2935_v23, %v313_v10  ;;  %v342_v31 = vsub.f32 %v2937_v45, %v314_v6  ;;  %v343_v29 = vsub.f32 %v6614_v35, %v315_v5  ;;  %v344_v28 = vsub.f32 %v2943_v49, %v316_v60 }
  0x45   :  { %v345_v26 = vsub.f32 %v6615_v15, %v317_v4  ;;  %v346_v25 = vsub.f32 %v2949_v12, %v318_v59  ;;  %v6616_v21 = vmin.f32 %v2879_v34, 1.0  ;;  %v6618_v19 = vmin.f32 %v2881_v2, 1.0 }
  0x46   :  { %v6620_v10 = vmin.f32 %v2883_v53, 1.0  ;;  %v6622_v5 = vmin.f32 %v2885_v27, 1.0  ;;  %v6624_v60 = vmin.f32 %v2887_v8, 1.0  ;;  %v6626_v59 = vmin.f32 %v2889_v40, 1.0 }
  0x47   :  { %v3067_v55 = vmul.f32 %v319_v54, %v6616_v21  ;;  %v3071_v20 = vmul.f32 %v320_v3, %v6618_v19  ;;  %v6628_v2 = vmin.f32 %v2893_v30, 1.0  ;;  %v6630_v53 = vmin.f32 %v2895_v7, 1.0  ;;  %v6647_v21 = vld [vmem:[#allocation66_spill] sm:$0xff]  ;;  %v6654_v19 = vld [vmem:[#allocation67_spill] sm:$0xff] }
  0x48   :  { %v3075_v11 = vmul.f32 %v321_v42, %v6620_v10  ;;  %v3079_v6 = vmul.f32 %v322_v44, %v6622_v5  ;;  %v3083_v4 = vmul.f32 %v323_v36, %v6624_v60  ;;  %v3087_v34 = vmul.f32 %v324_v32, %v6626_v59  ;;  %v6675_v59 = vld [vmem:[#allocation17_spill] sm:$0xff] }
  0x49   :  { %6617 = vst [vmem:[#allocation68_spill] sm:$0xff] %v3067_v55  ;;  %6619 = vst [vmem:[#allocation69_spill] sm:$0xff] %v3071_v20  ;;  %v3091_v3 = vmul.f32 %v325_v9, %v6628_v2  ;;  %v3095_v54 = vmul.f32 %v326_v52, %v6630_v53  ;;  %v6632_v27 = vmin.f32 %v2897_v51, 1.0  ;;  %v6634_v8 = vmin.f32 %v2901_v61, 1.0  ;;  %v6642_v9 = vld [vmem:[#allocation65_spill] sm:$0xff]  ;;  %v6677_v2 = vld [vmem:[#allocation18_spill] sm:$0xff] }
  0x4a   :  { %6621 = vst [vmem:[#allocation70_spill] sm:$0xff] %v3075_v11  ;;  %6623 = vst [vmem:[#allocation71_spill] sm:$0xff] %v3079_v6  ;;  %v6636_v40 = vmin.f32 %v2903_v63, 1.0  ;;  %v6638_v30 = vmin.f32 %v2905_v22, 1.0  ;;  %v6640_v7 = vmin.f32 %v2909_v14, 1.0  ;;  %v6643_v51 = vmin.f32 %v6642_v9, 1.0 }
  0x4b   :  { %6625 = vst [vmem:[#allocation72_spill] sm:$0xff] %v3083_v4  ;;  %6627 = vst [vmem:[#allocation73_spill] sm:$0xff] %v3087_v34  ;;  %v3099_v42 = vmul.f32 %v327_v0, %v6632_v27  ;;  %v3103_v36 = vmul.f32 %v328_v46, %v6634_v8  ;;  %v6645_v61 = vmin.f32 %v2913_v50, 1.0  ;;  %v6648_v63 = vmin.f32 %v6647_v21, 1.0  ;;  %v6678_v53 = vld [vmem:[#allocation16_spill] sm:$0xff]  ;;  %v6681_v8 = vld [vmem:[#allocation21_spill] sm:$0xff] }
  0x4c   :  { %6629 = vst [vmem:[#allocation74_spill] sm:$0xff] %v3091_v3  ;;  %6631 = vst [vmem:[#allocation75_spill] sm:$0xff] %v3095_v54  ;;  %v3107_v44 = vmul.f32 %v329_v58, %v6636_v40  ;;  %v3111_v32 = vmul.f32 %v330_v56, %v6638_v30  ;;  %v3115_v52 = vmul.f32 %v331_v57, %v6640_v7  ;;  %v6650_v22 = vmin.f32 %v2919_v13, 1.0  ;;  %v6684_v30 = vld [vmem:[#allocation25_spill] sm:$0xff]  ;;  %v6685_v9 = vld [vmem:[#allocation26_spill] sm:$0xff] }
  0x4d   :  { %6633 = vst [vmem:[#allocation76_spill] sm:$0xff] %v3099_v42  ;;  %6635 = vst [vmem:[#allocation77_spill] sm:$0xff] %v3103_v36  ;;  %v3119_v0 = vmul.f32 %v332_v62, %v6643_v51  ;;  %v3123_v46 = vmul.f32 %v333_v48, %v6645_v61  ;;  %v3127_v58 = vmul.f32 %v334_v43, %v6648_v63  ;;  %v6652_v14 = vmin.f32 %v2921_v24, 1.0  ;;  %v6686_v61 = vld [vmem:[#allocation28_spill] sm:$0xff]  ;;  %v6687_v63 = vld [vmem:[#allocation29_spill] sm:$0xff] }
  0x4e   :  { %6637 = vst [vmem:[#allocation78_spill] sm:$0xff] %v3107_v44  ;;  %6639 = vst [vmem:[#allocation79_spill] sm:$0xff] %v3111_v32  ;;  %v3131_v56 = vmul.f32 %v335_v39, %v6650_v22  ;;  %v6655_v10 = vmin.f32 %v6654_v19, 1.0  ;;  %v6657_v50 = vmin.f32 %v2927_v41, 1.0  ;;  %v6659_v5 = vmin.f32 %v2929_v16, 1.0 }
  0x4f   :  { %6641 = vst [vmem:[#allocation80_spill] sm:$0xff] %v3115_v52  ;;  %6644 = vst [vmem:[#allocation65_spill] sm:$0xff] %v3119_v0  ;;  %v3135_v57 = vmul.f32 %v336_v38, %v6652_v14  ;;  %v6661_v13 = vmin.f32 %v2933_v1, 1.0  ;;  %v6663_v24 = vmin.f32 %v2935_v23, 1.0  ;;  %v6665_v60 = vmin.f32 %v2937_v45, 1.0  ;;  %v6676_v45 = vld [vmem:[#allocation15_spill] sm:$0xff] }
  0x50   :  { %6646 = vst [vmem:[#allocation81_spill] sm:$0xff] %v3123_v46  ;;  %6649 = vst [vmem:[#allocation66_spill] sm:$0xff] %v3127_v58  ;;  %v3139_v62 = vmul.f32 %v337_v18, %v6655_v10  ;;  %v3143_v48 = vmul.f32 %v338_v47, %v6657_v50  ;;  %v3147_v43 = vmul.f32 %v339_v17, %v6659_v5  ;;  %v6667_v41 = vmin.f32 %v6614_v35, 1.0  ;;  %v6688_v14 = vld [vmem:[#allocation30_spill] sm:$0xff]  ;;  %v6689_v10 = vld [vmem:[#allocation31_spill] sm:$0xff] }
  0x51   :  { %6651 = vst [vmem:[#allocation82_spill] sm:$0xff] %v3131_v56  ;;  %6653 = vst [vmem:[#allocation83_spill] sm:$0xff] %v3135_v57  ;;  %v3151_v39 = vmul.f32 %v340_v37, %v6661_v13  ;;  %v3155_v38 = vmul.f32 %v341_v33, %v6663_v24  ;;  %v3159_v18 = vmul.f32 %v342_v31, %v6665_v60  ;;  %v6669_v16 = vmin.f32 %v2943_v49, 1.0  ;;  %v6680_v49 = vld [vmem:[#allocation20_spill] sm:$0xff]  ;;  %v6691_v24 = vld [vmem:[#allocation33_spill] sm:$0xff] }
  0x52   :  { %6656 = vst [vmem:[#allocation67_spill] sm:$0xff] %v3139_v62  ;;  %6658 = vst [vmem:[#allocation84_spill] sm:$0xff] %v3143_v48  ;;  %v3163_v47 = vmul.f32 %v343_v29, %v6667_v41  ;;  %v6671_v1 = vmin.f32 %v6615_v15, 1.0  ;;  %v6673_v23 = vmin.f32 %v2949_v12, 1.0  ;;  %v412_v31 = vsub.f32 %v6676_v45, %v6675_v59  ;;  %v6679_v29 = vld [vmem:[#allocation19_spill] sm:$0xff]  ;;  %v6690_v5 = vld [vmem:[#allocation32_spill] sm:$0xff] }
  0x53   :  { %6660 = vst [vmem:[#allocation85_spill] sm:$0xff] %v3147_v43  ;;  %6662 = vst [vmem:[#allocation86_spill] sm:$0xff] %v3151_v39  ;;  %v3167_v17 = vmul.f32 %v344_v28, %v6669_v16  ;;  %v413_v35 = vsub.f32 %v6678_v53, %v6677_v2  ;;  %v414_v27 = vsub.f32 %v6675_v59, %v6679_v29  ;;  %v6692_v41 = vld [vmem:[#allocation34_spill] sm:$0xff] }
  0x54   :  { %6664 = vst [vmem:[#allocation87_spill] sm:$0xff] %v3155_v38  ;;  %6666 = vst [vmem:[#allocation88_spill] sm:$0xff] %v3159_v18  ;;  %v3171_v37 = vmul.f32 %v345_v26, %v6671_v1  ;;  %v3175_v33 = vmul.f32 %v346_v25, %v6673_v23  ;;  %v415_v28 = vsub.f32 %v6677_v2, %v6680_v49  ;;  %v6682_v26 = vld [vmem:[#allocation22_spill] sm:$0xff]  ;;  %v6683_v25 = vld [vmem:[#allocation24_spill] sm:$0xff]  ;;  %v3264_v48 = vand.u32 2147483647, %v412_v31 }
  0x55   :  { %6668 = vst [vmem:[#allocation89_spill] sm:$0xff] %v3163_v47  ;;  %6670 = vst [vmem:[#allocation90_spill] sm:$0xff] %v3167_v17  ;;  %v416_v15 = vsub.f32 %v6679_v29, %v6681_v8  ;;  %v417_v12 = vsub.f32 %v6680_v49, %v6682_v26  ;;  %v418_v40 = vsub.f32 %v6681_v8, %v6683_v25  ;;  %v6693_v1 = vld [vmem:[#allocation35_spill] sm:$0xff]  ;;  %v6700_v29 = vld [vmem:[#allocation6_spill] sm:$0xff]  ;;  %v3266_v17 = vand.u32 2147483647, %v413_v35 }
  0x56   :  { %6672 = vst [vmem:[#allocation91_spill] sm:$0xff] %v3171_v37  ;;  %6674 = vst [vmem:[#allocation92_spill] sm:$0xff] %v3175_v33  ;;  %v419_v7 = vsub.f32 %v6682_v26, %v6684_v30  ;;  %v420_v51 = vsub.f32 %v6683_v25, %v6685_v9  ;;  %v421_v21 = vsub.f32 %v6684_v30, %v6686_v61  ;;  %v6694_v30 = vld [vmem:[#allocation36_spill] sm:$0xff]  ;;  %v6695_v25 = vld [vmem:[#allocation37_spill] sm:$0xff]  ;;  %v3268_v37 = vand.u32 2147483647, %v414_v27 }
  0x57   :  { %v422_v22 = vsub.f32 %v6685_v9, %v6687_v63  ;;  %v423_v19 = vsub.f32 %v6686_v61, %v6688_v14  ;;  %v424_v50 = vsub.f32 %v6687_v63, %v6689_v10  ;;  %v425_v13 = vsub.f32 %v6688_v14, %v6690_v5  ;;  %v6696_v26 = vld [vmem:[#allocation7_spill] sm:$0xff]  ;;  %v6697_v63 = vld [vmem:[#allocation5_spill] sm:$0xff]  ;;  %v6699_v14 = vld [vmem:[#allocation10_spill] sm:$0xff] }
  0x58   :  { %v426_v60 = vsub.f32 %v6689_v10, %v6691_v24  ;;  %v427_v16 = vsub.f32 %v6690_v5, %v6692_v41  ;;  %v428_v23 = vsub.f32 %v6691_v24, %v6693_v1  ;;  %v429_v9 = vsub.f32 %v6692_v41, %v6694_v30  ;;  %v6702_v5 = vld [vmem:[#allocation8_spill] sm:$0xff]  ;;  %v6704_v30 = vld [vmem:[#allocation9_spill] sm:$0xff] }
  0x59   :  { %v430_v61 = vsub.f32 %v6693_v1, %v6695_v25  ;;  %v6698_v8 = vsub.f32 %v6696_v26, %v6697_v63  ;;  %v6701_v10 = vsub.f32 %v6699_v14, %v6700_v29  ;;  %v6703_v59 = vsub.f32 %v6697_v63, %v6702_v5  ;;  %v6706_v25 = vld [vmem:[#allocation11_spill] sm:$0xff]  ;;  %v6708_v1 = vld [vmem:[#allocation13_spill] sm:$0xff] }
  0x5a   :  { %v6705_v41 = vsub.f32 %v6700_v29, %v6704_v30  ;;  %v6707_v26 = vsub.f32 %v6702_v5, %v6706_v25  ;;  %v6709_v14 = vsub.f32 %v6704_v30, %v6708_v1  ;;  %v3272_v62 = vand.u32 2147483647, %v415_v28 }
  0x5b   :  { %v3218_v49 = vand.u32 2147483647, %v6698_v8  ;;  %v3223_v2 = vand.u32 2147483647, %v6701_v10  ;;  %v3228_v24 = vand.u32 2147483647, %v6703_v59 }
  0x5c   :  { %v3233_v33 = vand.u32 2147483647, %v6705_v41  ;;  %v3238_v8 = vand.u32 2147483647, %v6707_v26  ;;  %v3243_v10 = vand.u32 2147483647, %v6709_v14  ;;  %v6713_v41 = vsub.f32 %v6708_v1, %v6676_v45 }
  0x5d   :  { %v6711_v59 = vld [vmem:[#allocation14_spill] sm:$0xff]  ;;  %v3276_v57 = vand.u32 2147483647, %v417_v12  ;;  %v3280_v58 = vand.u32 2147483647, %v418_v40  ;;  %v6729_v43 = vmin.f32 %v3218_v49, 1.0 }
  0x5e   :  { %v6712_v47 = vsub.f32 %v6706_v25, %v6711_v59  ;;  %v3255_v38 = vand.u32 2147483647, %v6713_v41  ;;  %v6714_v26 = vsub.f32 %v6711_v59, %v6678_v53  ;;  %v3274_v41 = vand.u32 2147483647, %v416_v15 }
  0x5f   :  { %6719 = vst [vmem:[#allocation94_spill] sm:$0xff] %v3280_v58  ;;  %v3282_v31 = vand.u32 2147483647, %v419_v7  ;;  %v3284_v35 = vand.u32 2147483647, %v420_v51  ;;  %v6731_v63 = vmin.f32 %v3228_v24, 1.0 }
  0x60   :  { %v3250_v18 = vand.u32 2147483647, %v6712_v47  ;;  %v3260_v39 = vand.u32 2147483647, %v6714_v26  ;;  %6717 = vst [vmem:[#allocation93_spill] sm:$0xff] %v3274_v41  ;;  %v6732_v56 = vmin.f32 %v3233_v33, 1.0 }
  0x61   :  { %v3288_v14 = vand.u32 2147483647, %v421_v21  ;;  %v3290_v28 = vand.u32 2147483647, %v422_v22  ;;  %v3292_v15 = vand.u32 2147483647, %v423_v19 }
  0x62   :  { %v3296_v47 = vand.u32 2147483647, %v424_v50  ;;  %v3298_v40 = vand.u32 2147483647, %v425_v13  ;;  %v3300_v7 = vand.u32 2147483647, %v426_v60 }
  0x63   :  { %6721 = vst [vmem:[#allocation95_spill] sm:$0xff] %v3288_v14  ;;  %v3304_v26 = vand.u32 2147483647, %v427_v16  ;;  %v3306_v21 = vand.u32 2147483647, %v428_v23  ;;  %v487_v60 = vmul.f32 0.5, %v6729_v43 }
  0x64   :  { %6723 = vst [vmem:[#allocation96_spill] sm:$0xff] %v3300_v7  ;;  %v3308_v22 = vand.u32 2147483647, %v429_v9  ;;  %v3312_v27 = vand.u32 2147483647, %v430_v61  ;;  %v6730_v50 = vmin.f32 %v3223_v2, 1.0 }
  0x65   :  { %6725 = vst [vmem:[#allocation97_spill] sm:$0xff] %v3304_v26  ;;  %v489_v19 = vmul.f32 0.5, %v6731_v63  ;;  %v490_v16 = vmul.f32 0.5, %v6732_v56  ;;  %v6733_v23 = vmin.f32 %v3238_v8, 1.0  ;;  %v6734_v9 = vmin.f32 %v3243_v10, 1.0 }
  0x66   :  { %6726 = vst [vmem:[#allocation98_spill] sm:$0xff] %v3308_v22  ;;  %v488_v13 = vmul.f32 0.5, %v6730_v50  ;;  %v6735_v61 = vmin.f32 %v3250_v18, 1.0  ;;  %v6736_v43 = vmin.f32 %v3255_v38, 1.0  ;;  %v6737_v50 = vmin.f32 %v3260_v39, 1.0 }
  0x67   :  { %v491_v12 = vmul.f32 0.5, %v6733_v23  ;;  %v492_v51 = vmul.f32 0.5, %v6734_v9  ;;  %v6738_v63 = vmin.f32 %v3264_v48, 1.0  ;;  %v6739_v56 = vmin.f32 %v3266_v17, 1.0 }
  0x68   :  { %v493_v53 = vmul.f32 0.5, %v6735_v61  ;;  %v494_v45 = vmul.f32 0.5, %v6736_v43  ;;  %v495_v59 = vmul.f32 0.5, %v6737_v50  ;;  %v6740_v23 = vmin.f32 %v3268_v37, 1.0 }
  0x69   :  { %v496_v1 = vmul.f32 0.5, %v6738_v63  ;;  %v497_v25 = vmul.f32 0.5, %v6739_v56  ;;  %v6741_v9 = vmin.f32 %v3272_v62, 1.0  ;;  %v6742_v61 = vmin.f32 %v3274_v41, 1.0 }
  0x6a   :  { %v498_v30 = vmul.f32 0.5, %v6740_v23  ;;  %v6743_v43 = vmin.f32 %v3276_v57, 1.0  ;;  %v6744_v50 = vmin.f32 %v3280_v58, 1.0  ;;  %v6745_v63 = vmin.f32 %v3282_v31, 1.0 }
  0x6b   :  { %v499_v5 = vmul.f32 0.5, %v6741_v9  ;;  %v500_v29 = vmul.f32 0.5, %v6742_v61  ;;  %v6746_v56 = vmin.f32 %v3284_v35, 1.0  ;;  %v6747_v23 = vmin.f32 %v3288_v14, 1.0 }
  0x6c   :  { %v501_v46 = vmul.f32 0.5, %v6743_v43  ;;  %v502_v0 = vmul.f32 0.5, %v6744_v50  ;;  %v503_v52 = vmul.f32 0.5, %v6745_v63  ;;  %v6748_v9 = vmin.f32 %v3290_v28, 1.0 }
  0x6d   :  { %v504_v32 = vmul.f32 0.5, %v6746_v56  ;;  %v505_v44 = vmul.f32 0.5, %v6747_v23  ;;  %v6749_v61 = vmin.f32 %v3292_v15, 1.0  ;;  %v6750_v43 = vmin.f32 %v3296_v47, 1.0 }
  0x6e   :  { %v506_v36 = vmul.f32 0.5, %v6748_v9  ;;  %v6751_v50 = vmin.f32 %v3298_v40, 1.0  ;;  %v6752_v63 = vmin.f32 %v3300_v7, 1.0  ;;  %v6753_v56 = vmin.f32 %v3304_v26, 1.0 }
  0x6f   :  { %v507_v42 = vmul.f32 0.5, %v6749_v61  ;;  %v508_v54 = vmul.f32 0.5, %v6750_v43  ;;  %v6754_v23 = vmin.f32 %v3306_v21, 1.0  ;;  %v6755_v9 = vmin.f32 %v3308_v22, 1.0 }
  0x70   :  { %v509_v3 = vmul.f32 0.5, %v6751_v50  ;;  %v510_v34 = vmul.f32 0.5, %v6752_v63  ;;  %v511_v4 = vmul.f32 0.5, %v6753_v56  ;;  %v6756_v61 = vmin.f32 %v3312_v27, 1.0 }
  0x71   :  { %v512_v6 = vmul.f32 0.5, %v6754_v23  ;;  %v513_v11 = vmul.f32 0.5, %v6755_v9  ;;  %v515_v43 = vsub.f32 %v3218_v49, %v487_v60  ;;  %v516_v55 = vsub.f32 %v3223_v2, %v488_v13 }
  0x72   :  { %v514_v20 = vmul.f32 0.5, %v6756_v61  ;;  %v517_v50 = vsub.f32 %v3228_v24, %v489_v19  ;;  %v518_v63 = vsub.f32 %v3233_v33, %v490_v16  ;;  %v519_v26 = vsub.f32 %v3238_v8, %v491_v12 }
  0x73   :  { %v520_v56 = vsub.f32 %v3243_v10, %v492_v51  ;;  %v521_v23 = vsub.f32 %v3250_v18, %v493_v53  ;;  %v522_v22 = vsub.f32 %v3255_v38, %v494_v45  ;;  %v523_v9 = vsub.f32 %v3260_v39, %v495_v59 }
  0x74   :  { %v524_v61 = vsub.f32 %v3264_v48, %v496_v1  ;;  %v525_v60 = vsub.f32 %v3266_v17, %v497_v25  ;;  %v526_v13 = vsub.f32 %v3268_v37, %v498_v30  ;;  %v527_v19 = vsub.f32 %v3272_v62, %v499_v5 }
  0x75   :  { %v528_v16 = vsub.f32 %v3274_v41, %v500_v29  ;;  %v529_v12 = vsub.f32 %v3276_v57, %v501_v46  ;;  %v530_v51 = vsub.f32 %v3280_v58, %v502_v0  ;;  %v531_v53 = vsub.f32 %v3282_v31, %v503_v52  ;;  %v6757_v41 = vld [vmem:[#allocation97_spill] sm:$0xff]  ;;  %v6758_v58 = vld [vmem:[#allocation98_spill] sm:$0xff] }
  0x76   :  { %v532_v45 = vsub.f32 %v3284_v35, %v504_v32  ;;  %v533_v59 = vsub.f32 %v3288_v14, %v505_v44  ;;  %v534_v1 = vsub.f32 %v3290_v28, %v506_v36  ;;  %v535_v25 = vsub.f32 %v3292_v15, %v507_v42 }
  0x77   :  { %v536_v30 = vsub.f32 %v3296_v47, %v508_v54  ;;  %v537_v5 = vsub.f32 %v3298_v40, %v509_v3  ;;  %v538_v29 = vsub.f32 %v3300_v7, %v510_v34  ;;  %v539_v46 = vsub.f32 %v6757_v41, %v511_v4 }
  0x78   :  { %v540_v0 = vsub.f32 %v3306_v21, %v512_v6  ;;  %v541_v52 = vsub.f32 %v6758_v58, %v513_v11  ;;  %v542_v32 = vsub.f32 %v3312_v27, %v514_v20  ;;  %v6759_v44 = vmin.f32 %v3218_v49, 1.0 }
  0x79   :  { %v6760_v36 = vmin.f32 %v3223_v2, 1.0  ;;  %v6761_v54 = vmin.f32 %v3228_v24, 1.0  ;;  %v6762_v34 = vmin.f32 %v3233_v33, 1.0  ;;  %v6763_v6 = vmin.f32 %v3238_v8, 1.0 }
  0x7a   :  { %v543_v14 = vmul.f32 %v515_v43, %v6759_v44  ;;  %v6764_v11 = vmin.f32 %v3243_v10, 1.0  ;;  %v6765_v49 = vmin.f32 %v3250_v18, 1.0  ;;  %v6767_v24 = vmin.f32 %v3260_v39, 1.0 }
  0x7b   :  { %v3432_v42 = vmul.f32 %v516_v55, %v6760_v36  ;;  %v545_v3 = vmul.f32 %v517_v50, %v6761_v54  ;;  %v3438_v7 = vmul.f32 %v518_v63, %v6762_v34  ;;  %v547_v4 = vmul.f32 %v519_v26, %v6763_v6 }
  0x7c   :  { %v3444_v20 = vmul.f32 %v520_v56, %v6764_v11  ;;  %v549_v43 = vmul.f32 %v521_v23, %v6765_v49  ;;  %v6766_v55 = vmin.f32 %v3255_v38, 1.0  ;;  %v551_v50 = vmul.f32 %v523_v9, %v6767_v24  ;;  %v6772_v38 = vld [vmem:[#allocation93_spill] sm:$0xff]  ;;  %v6785_v49 = vld [vmem:[#allocation96_spill] sm:$0xff] }
  0x7d   :  { %v6768_v33 = vmin.f32 %v3264_v48, 1.0  ;;  %v6769_v8 = vmin.f32 %v3266_v17, 1.0  ;;  %v6770_v10 = vmin.f32 %v3268_v37, 1.0  ;;  %v6771_v18 = vmin.f32 %v3272_v62, 1.0  ;;  %v6775_v48 = vld [vmem:[#allocation94_spill] sm:$0xff]  ;;  %v6779_v62 = vld [vmem:[#allocation95_spill] sm:$0xff] }
  0x7e   :  { %v3450_v2 = vmul.f32 %v522_v22, %v6766_v55  ;;  %v6773_v22 = vmin.f32 %v6772_v38, 1.0  ;;  %v6774_v39 = vmin.f32 %v3276_v57, 1.0  ;;  %v6777_v17 = vmin.f32 %v3282_v31, 1.0 }
  0x7f   :  { %v3456_v63 = vmul.f32 %v524_v61, %v6768_v33  ;;  %v553_v26 = vmul.f32 %v525_v60, %v6769_v8  ;;  %v3462_v56 = vmul.f32 %v526_v13, %v6770_v10  ;;  %v555_v23 = vmul.f32 %v527_v19, %v6771_v18 }
  0x80   :  { %v3468_v44 = vmul.f32 %v528_v16, %v6773_v22  ;;  %v557_v9 = vmul.f32 %v529_v12, %v6774_v39  ;;  %v6776_v61 = vmin.f32 %v6775_v48, 1.0  ;;  %v559_v60 = vmul.f32 %v531_v53, %v6777_v17 }
  0x81   :  { %v6778_v37 = vmin.f32 %v3284_v35, 1.0  ;;  %v6780_v19 = vmin.f32 %v6779_v62, 1.0  ;;  %v6781_v16 = vmin.f32 %v3290_v28, 1.0  ;;  %v599_v57 = vrot.slane %v543_v14, 1  ;;  %v6793_v62 = vld [vmem:[#allocation69_spill] sm:$0xff] }
  0x82   :  { %v3474_v36 = vmul.f32 %v530_v51, %v6776_v61  ;;  %v600_v12 = vrot.slane %v3432_v42, 1  ;;  %v6782_v51 = vmin.f32 %v3292_v15, 1.0  ;;  %v6783_v31 = vmin.f32 %v3296_v47, 1.0 }
  0x83   :  { %v3480_v13 = vmul.f32 %v532_v45, %v6778_v37  ;;  %v561_v54 = vmul.f32 %v533_v59, %v6780_v19  ;;  %v3486_v34 = vmul.f32 %v534_v1, %v6781_v16  ;;  %v602_v35 = vrot.slane %v545_v3, 1  ;;  %v6791_v37 = vld [vmem:[#allocation68_spill] sm:$0xff] }
  0x84   :  { %v563_v6 = vmul.f32 %v535_v25, %v6782_v51  ;;  %v3493_v53 = vmul.f32 %v536_v30, %v6783_v31  ;;  %v603_v45 = vrot.slane %v3438_v7, 1  ;;  %v6784_v11 = vmin.f32 %v3298_v40, 1.0  ;;  %v6797_v51 = vld [vmem:[#allocation71_spill] sm:$0xff]  ;;  %v6799_v31 = vld [vmem:[#allocation72_spill] sm:$0xff] }
  0x85   :  { %v6786_v28 = vmin.f32 %v6785_v49, 1.0  ;;  %v6787_v14 = vmin.f32 %v6757_v41, 1.0  ;;  %v6788_v15 = vmin.f32 %v3306_v21, 1.0  ;;  %v6789_v47 = vmin.f32 %v6758_v58, 1.0 }
  0x86   :  { %v565_v59 = vmul.f32 %v537_v5, %v6784_v11  ;;  %v6790_v3 = vmin.f32 %v3312_v27, 1.0  ;;  %v605_v40 = vrot.slane %v547_v4, 1  ;;  %v606_v5 = vrot.slane %v3444_v20, 1 }
  0x87   :  { %v3500_v1 = vmul.f32 %v538_v29, %v6786_v28  ;;  %v567_v42 = vmul.f32 %v539_v46, %v6787_v14  ;;  %v3506_v25 = vmul.f32 %v540_v0, %v6788_v15  ;;  %v569_v30 = vmul.f32 %v541_v52, %v6789_v47  ;;  %v6813_v47 = vld [vmem:[#allocation79_spill] sm:$0xff] }
  0x88   :  { %v3512_v7 = vmul.f32 %v542_v32, %v6790_v3  ;;  %v601_v29 = vsel %vm136_vm0, %v599_v57, %v600_v12  ;;  %v608_v55 = vrot.slane %v549_v43, 1  ;;  %v609_v41 = vrot.slane %v3450_v2, 1  ;;  %v6815_v3 = vld [vmem:[#allocation80_spill] sm:$0xff] }
  0x89   :  { %v611_v46 = vrot.slane %v551_v50, 1  ;;  %v604_v21 = vsel %vm136_vm0, %v602_v35, %v603_v45  ;;  %v612_v0 = vrot.slane %v3456_v63, 1  ;;  %v614_v24 = vrot.slane %v553_v26, 1  ;;  %v6801_v35 = vld [vmem:[#allocation73_spill] sm:$0xff] }
  0x8a   :  { %v615_v58 = vrot.slane %v3462_v56, 1  ;;  %v617_v52 = vrot.slane %v555_v23, 1  ;;  %v618_v27 = vrot.slane %v3468_v44, 1  ;;  %v620_v32 = vrot.slane %v557_v9, 1 }
  0x8b   :  { %v621_v4 = vrot.slane %v3474_v36, 1  ;;  %v623_v20 = vrot.slane %v559_v60, 1  ;;  %v624_v33 = vrot.slane %v3480_v13, 1  ;;  %v626_v43 = vrot.slane %v561_v54, 1 }
  0x8c   :  { %v627_v2 = vrot.slane %v3486_v34, 1  ;;  %v629_v50 = vrot.slane %v563_v6, 1  ;;  %v630_v8 = vrot.slane %v3493_v53, 1  ;;  %v632_v10 = vrot.slane %v565_v59, 1  ;;  %v6795_v34 = vld [vmem:[#allocation70_spill] sm:$0xff] }
  0x8d   :  { %v633_v63 = vrot.slane %v3500_v1, 1  ;;  %v635_v26 = vrot.slane %v567_v42, 1  ;;  %v636_v56 = vrot.slane %v3506_v25, 1  ;;  %v638_v18 = vrot.slane %v569_v30, 1  ;;  %v6803_v59 = vld [vmem:[#allocation74_spill] sm:$0xff]  ;;  %v6807_v1 = vld [vmem:[#allocation76_spill] sm:$0xff] }
  0x8e   :  { %v639_v23 = vrot.slane %v3512_v7, 1  ;;  %v607_v38 = vsel %vm136_vm0, %v605_v40, %v606_v5  ;;  %v610_v22 = vsel %vm136_vm0, %v608_v55, %v609_v41  ;;  %v613_v44 = vsel %vm136_vm0, %v611_v46, %v612_v0  ;;  %v6809_v42 = vld [vmem:[#allocation77_spill] sm:$0xff] }
  0x8f   :  { %v616_v39 = vsel %vm136_vm0, %v614_v24, %v615_v58  ;;  %v619_v9 = vsel %vm136_vm0, %v617_v52, %v618_v27  ;;  %v622_v48 = vsel %vm136_vm0, %v620_v32, %v621_v4  ;;  %v625_v61 = vsel %vm136_vm0, %v623_v20, %v624_v33  ;;  %v6817_v40 = vld [vmem:[#allocation65_spill] sm:$0xff]  ;;  %v6825_v24 = vld [vmem:[#allocation83_spill] sm:$0xff]  ;;  %v6829_v20 = vld [vmem:[#allocation84_spill] sm:$0xff] }
  0x90   :  { %v628_v36 = vsel %vm136_vm0, %v626_v43, %v627_v2  ;;  %v631_v17 = vsel %vm136_vm0, %v629_v50, %v630_v8  ;;  %v634_v60 = vsel %vm136_vm0, %v632_v10, %v633_v63  ;;  %v3539_v13 = vadd.f32 %v601_v29, %v6791_v37  ;;  %v6819_v29 = vld [vmem:[#allocation81_spill] sm:$0xff]  ;;  %v6833_v10 = vld [vmem:[#allocation86_spill] sm:$0xff] }
  0x91   :  { %v3542_v19 = vadd.f32 %v600_v12, %v6793_v62  ;;  %v637_v54 = vsel %vm136_vm0, %v635_v26, %v636_v56  ;;  %v640_v16 = vsel %vm136_vm0, %v638_v18, %v639_v23  ;;  %v3547_v57 = vadd.f32 %v604_v21, %v6795_v34  ;;  %v6805_v12 = vld [vmem:[#allocation75_spill] sm:$0xff]  ;;  %v6823_v21 = vld [vmem:[#allocation82_spill] sm:$0xff]  ;;  %v6850_v62 = vld [vmem:[#allocation8_spill] sm:$0xff] }
  0x92   :  { %6792 = vst [vmem:[#allocation97_spill] sm:$0xff] %v3539_v13  ;;  %v3550_v6 = vadd.f32 %v603_v45, %v6797_v51  ;;  %v3553_v53 = vadd.f32 %v607_v38, %v6799_v31  ;;  %v3556_v11 = vadd.f32 %v606_v5, %v6801_v35  ;;  %v3559_v49 = vadd.f32 %v610_v22, %v6803_v59  ;;  %v6811_v45 = vld [vmem:[#allocation78_spill] sm:$0xff]  ;;  %v6837_v38 = vld [vmem:[#allocation88_spill] sm:$0xff]  ;;  %v6852_v34 = vld [vmem:[#allocation9_spill] sm:$0xff] }
  0x93   :  { %6794 = vst [vmem:[#allocation98_spill] sm:$0xff] %v3542_v19  ;;  %6796 = vst [vmem:[#allocation93_spill] sm:$0xff] %v3547_v57  ;;  %v3562_v28 = vadd.f32 %v609_v41, %v6805_v12  ;;  %v3565_v14 = vadd.f32 %v613_v44, %v6807_v1  ;;  %v3568_v15 = vadd.f32 %v612_v0, %v6809_v42  ;;  %v6821_v41 = vld [vmem:[#allocation66_spill] sm:$0xff]  ;;  %v6853_v51 = vld [vmem:[#allocation11_spill] sm:$0xff] }
  0x94   :  { %6798 = vst [vmem:[#allocation94_spill] sm:$0xff] %v3550_v6  ;;  %6800 = vst [vmem:[#allocation95_spill] sm:$0xff] %v3553_v53  ;;  %v3571_v25 = vadd.f32 %v616_v39, %v6811_v45  ;;  %v3574_v30 = vadd.f32 %v615_v58, %v6813_v47  ;;  %v3577_v7 = vadd.f32 %v619_v9, %v6815_v3  ;;  %v6827_v58 = vld [vmem:[#allocation67_spill] sm:$0xff]  ;;  %v6841_v39 = vld [vmem:[#allocation90_spill] sm:$0xff]  ;;  %v3633_v31 = vrot.slane %v6853_v51, 7 }
  0x95   :  { %6802 = vst [vmem:[#allocation96_spill] sm:$0xff] %v3556_v11  ;;  %6804 = vst [vmem:[#allocation68_spill] sm:$0xff] %v3559_v49  ;;  %v3580_v5 = vadd.f32 %v618_v27, %v6817_v40  ;;  %v3583_v55 = vadd.f32 %v622_v48, %v6819_v29  ;;  %v3586_v46 = vadd.f32 %v621_v4, %v6821_v41  ;;  %v6831_v27 = vld [vmem:[#allocation85_spill] sm:$0xff]  ;;  %v6835_v4 = vld [vmem:[#allocation87_spill] sm:$0xff] }
  0x96   :  { %6806 = vst [vmem:[#allocation69_spill] sm:$0xff] %v3562_v28  ;;  %6808 = vst [vmem:[#allocation70_spill] sm:$0xff] %v3565_v14  ;;  %v3589_v0 = vadd.f32 %v625_v61, %v6823_v21  ;;  %v3592_v52 = vadd.f32 %v624_v33, %v6825_v24  ;;  %v3595_v32 = vadd.f32 %v628_v36, %v6827_v58  ;;  %v6839_v33 = vld [vmem:[#allocation89_spill] sm:$0xff]  ;;  %v6845_v61 = vld [vmem:[#allocation92_spill] sm:$0xff] }
  0x97   :  { %6810 = vst [vmem:[#allocation71_spill] sm:$0xff] %v3568_v15  ;;  %6812 = vst [vmem:[#allocation72_spill] sm:$0xff] %v3571_v25  ;;  %v3598_v43 = vadd.f32 %v627_v2, %v6829_v20  ;;  %v3601_v50 = vadd.f32 %v631_v17, %v6831_v27  ;;  %v3604_v26 = vadd.f32 %v630_v8, %v6833_v10  ;;  %v6843_v2 = vld [vmem:[#allocation91_spill] sm:$0xff]  ;;  %v6847_v8 = vld [vmem:[#allocation5_spill] sm:$0xff] }
  0x98   :  { %6814 = vst [vmem:[#allocation73_spill] sm:$0xff] %v3574_v30  ;;  %6816 = vst [vmem:[#allocation74_spill] sm:$0xff] %v3577_v7  ;;  %v3607_v18 = vadd.f32 %v634_v60, %v6835_v4  ;;  %v3610_v22 = vadd.f32 %v633_v63, %v6837_v38  ;;  %v3613_v44 = vadd.f32 %v637_v54, %v6839_v33  ;;  %v3625_v17 = vrot.slane %v6847_v8, 7  ;;  %v6849_v60 = vld [vmem:[#allocation6_spill] sm:$0xff]  ;;  %v6859_v1 = vld [vmem:[#allocation16_spill] sm:$0xff] }
  0x99   :  { %6818 = vst [vmem:[#allocation75_spill] sm:$0xff] %v3580_v5  ;;  %6820 = vst [vmem:[#allocation76_spill] sm:$0xff] %v3583_v55  ;;  %v3616_v9 = vadd.f32 %v636_v56, %v6841_v39  ;;  %v3619_v48 = vadd.f32 %v640_v16, %v6843_v2  ;;  %v3622_v36 = vadd.f32 %v639_v23, %v6845_v61  ;;  %v699_v37 = vrot.slane %v6849_v60, 7  ;;  %v6855_v56 = vld [vmem:[#allocation13_spill] sm:$0xff]  ;;  %v6856_v16 = vld [vmem:[#allocation14_spill] sm:$0xff] }
  0x9a   :  { %6822 = vst [vmem:[#allocation77_spill] sm:$0xff] %v3586_v46  ;;  %6824 = vst [vmem:[#allocation78_spill] sm:$0xff] %v3589_v0  ;;  %v3629_v63 = vrot.slane %v6850_v62, 7  ;;  %v702_v54 = vrot.slane %v6852_v34, 7  ;;  %v705_v35 = vrot.slane %v6855_v56, 7  ;;  %v3637_v59 = vrot.slane %v6856_v16, 7 }
  0x9b   :  { %6826 = vst [vmem:[#allocation79_spill] sm:$0xff] %v3592_v52  ;;  %6828 = vst [vmem:[#allocation80_spill] sm:$0xff] %v3595_v32  ;;  %v6858_v23 = vld [vmem:[#allocation15_spill] sm:$0xff]  ;;  %v3641_v42 = vrot.slane %v6859_v1, 7  ;;  %v6861_v45 = vld [vmem:[#allocation17_spill] sm:$0xff]  ;;  %v3674_v46 = vsel %vm697_vm1, %v3625_v17, %v699_v37 }
  0x9c   :  { %6830 = vst [vmem:[#allocation65_spill] sm:$0xff] %v3598_v43  ;;  %6832 = vst [vmem:[#allocation81_spill] sm:$0xff] %v3601_v50  ;;  %v708_v12 = vrot.slane %v6858_v23, 7  ;;  %v711_v47 = vrot.slane %v6861_v45, 7  ;;  %v6862_v3 = vld [vmem:[#allocation18_spill] sm:$0xff]  ;;  %v6864_v29 = vld [vmem:[#allocation19_spill] sm:$0xff]  ;;  %v3678_v55 = vsel %vm697_vm1, %v3629_v63, %v702_v54  ;;  %v3686_v15 = vsel %vm697_vm1, %v3633_v31, %v705_v35 }
  0x9d   :  { %6834 = vst [vmem:[#allocation66_spill] sm:$0xff] %v3604_v26  ;;  %6836 = vst [vmem:[#allocation82_spill] sm:$0xff] %v3607_v18  ;;  %v3645_v40 = vrot.slane %v6862_v3, 7  ;;  %v714_v41 = vrot.slane %v6864_v29, 7  ;;  %v6865_v21 = vld [vmem:[#allocation20_spill] sm:$0xff]  ;;  %v6867_v58 = vld [vmem:[#allocation21_spill] sm:$0xff]  ;;  %v773_v19 = vsub.f32 %v6852_v34, %v3686_v15 }
  0x9e   :  { %6838 = vst [vmem:[#allocation83_spill] sm:$0xff] %v3610_v22  ;;  %6840 = vst [vmem:[#allocation67_spill] sm:$0xff] %v3613_v44  ;;  %v3649_v24 = vrot.slane %v6865_v21, 7  ;;  %v717_v20 = vrot.slane %v6867_v58, 7  ;;  %v6868_v27 = vld [vmem:[#allocation22_spill] sm:$0xff]  ;;  %v6870_v4 = vld [vmem:[#allocation24_spill] sm:$0xff]  ;;  %v3690_v14 = vsel %vm697_vm1, %v3637_v59, %v708_v12  ;;  %v3698_v54 = vsel %vm697_vm1, %v3641_v42, %v711_v47 }
  0x9f   :  { %6842 = vst [vmem:[#allocation84_spill] sm:$0xff] %v3616_v9  ;;  %6844 = vst [vmem:[#allocation85_spill] sm:$0xff] %v3619_v48  ;;  %v3653_v10 = vrot.slane %v6868_v27, 7  ;;  %v720_v38 = vrot.slane %v6870_v4, 7  ;;  %v6871_v33 = vld [vmem:[#allocation25_spill] sm:$0xff]  ;;  %v6873_v2 = vld [vmem:[#allocation26_spill] sm:$0xff]  ;;  %v3702_v53 = vsel %vm697_vm1, %v3645_v40, %v714_v41 }
  0xa0   :  { %6846 = vst [vmem:[#allocation86_spill] sm:$0xff] %v3622_v36  ;;  %6848 = vst [vmem:[#allocation87_spill] sm:$0xff] %v3625_v17  ;;  %v3657_v39 = vrot.slane %v6871_v33, 7  ;;  %v723_v61 = vrot.slane %v6873_v2, 7  ;;  %v6874_v36 = vld [vmem:[#allocation28_spill] sm:$0xff]  ;;  %v6876_v9 = vld [vmem:[#allocation29_spill] sm:$0xff]  ;;  %v3706_v35 = vsel %vm697_vm1, %v3649_v24, %v717_v20 }
  0xa1   :  { %6851 = vst [vmem:[#allocation88_spill] sm:$0xff] %v3629_v63  ;;  %6854 = vst [vmem:[#allocation89_spill] sm:$0xff] %v3633_v31  ;;  %v3661_v48 = vrot.slane %v6874_v36, 7  ;;  %v726_v44 = vrot.slane %v6876_v9, 7  ;;  %v6877_v22 = vld [vmem:[#allocation30_spill] sm:$0xff]  ;;  %v6879_v26 = vld [vmem:[#allocation31_spill] sm:$0xff]  ;;  %v3710_v12 = vsel %vm697_vm1, %v3653_v10, %v720_v38 }
  0xa2   :  { %6857 = vst [vmem:[#allocation90_spill] sm:$0xff] %v3637_v59  ;;  %6860 = vst [vmem:[#allocation91_spill] sm:$0xff] %v3641_v42  ;;  %v3665_v18 = vrot.slane %v6877_v22, 7  ;;  %v729_v50 = vrot.slane %v6879_v26, 7  ;;  %v6880_v43 = vld [vmem:[#allocation32_spill] sm:$0xff]  ;;  %v6882_v52 = vld [vmem:[#allocation33_spill] sm:$0xff] }
  0xa3   :  { %6863 = vst [vmem:[#allocation92_spill] sm:$0xff] %v3645_v40  ;;  %6866 = vst [vmem:[#allocation99_spill] sm:$0xff] %v3649_v24  ;;  %v3669_v32 = vrot.slane %v6880_v43, 7  ;;  %v732_v0 = vrot.slane %v6882_v52, 7  ;;  %v6885_v5 = vld [vmem:[#allocation34_spill] sm:$0xff]  ;;  %v6887_v30 = vld [vmem:[#allocation35_spill] sm:$0xff]  ;;  %v3718_v47 = vsel %vm697_vm1, %v3661_v48, %v726_v44  ;;  %v770_v44 = vsub.f32 %v6847_v8, %v3629_v63 }
  0xa4   :  { %6869 = vst [vmem:[#allocation100_spill] sm:$0xff] %v3653_v10  ;;  %6872 = vst [vmem:[#allocation101_spill] sm:$0xff] %v3657_v39  ;;  %v3681_v7 = vrot.slane %v6885_v5, 7  ;;  %v735_v25 = vrot.slane %v6887_v30, 7  ;;  %v6890_v28 = vld [vmem:[#allocation36_spill] sm:$0xff]  ;;  %v6892_v49 = vld [vmem:[#allocation37_spill] sm:$0xff]  ;;  %v3722_v41 = vsel %vm697_vm1, %v3665_v18, %v729_v50  ;;  %v776_v63 = vsub.f32 %v6856_v16, %v3641_v42 }
  0xa5   :  { %6875 = vst [vmem:[#allocation102_spill] sm:$0xff] %v3661_v48  ;;  %6878 = vst [vmem:[#allocation103_spill] sm:$0xff] %v3665_v18  ;;  %v3693_v37 = vrot.slane %v6890_v28, 7  ;;  %v738_v11 = vrot.slane %v6892_v49, 7  ;;  %v3714_v28 = vsel %vm697_vm1, %v3657_v39, %v723_v61  ;;  %v3726_v20 = vsel %vm697_vm1, %v3669_v32, %v732_v0  ;;  %v6902_v49 = vld [vmem:[#allocation7_spill] sm:$0xff]  ;;  %v6903_v6 = vld [vmem:[#allocation10_spill] sm:$0xff] }
  0xa6   :  { %6881 = vst [vmem:[#allocation104_spill] sm:$0xff] %v3669_v32  ;;  %6883 = vst [vmem:[#allocation105_spill] sm:$0xff] %v3674_v46  ;;  %v3730_v38 = vsel %vm697_vm1, %v3681_v7, %v735_v25  ;;  %v768_v61 = vsub.f32 %v6902_v49, %v3625_v17  ;;  %v769_v57 = vsub.f32 %v6903_v6, %v3674_v46 }
  0xa7   :  { %6884 = vst [vmem:[#allocation106_spill] sm:$0xff] %v3678_v55  ;;  %6886 = vst [vmem:[#allocation107_spill] sm:$0xff] %v3681_v7  ;;  %v3740_v50 = vsel %vm697_vm1, %v3693_v37, %v738_v11  ;;  %v771_v0 = vsub.f32 %v6849_v60, %v3678_v55  ;;  %v772_v25 = vsub.f32 %v6850_v62, %v3633_v31 }
  0xa8   :  { %6888 = vst [vmem:[#allocation108_spill] sm:$0xff] %v3686_v15  ;;  %6889 = vst [vmem:[#allocation109_spill] sm:$0xff] %v3690_v14  ;;  %v774_v49 = vsub.f32 %v6853_v51, %v3637_v59  ;;  %v775_v6 = vsub.f32 %v6855_v56, %v3690_v14  ;;  %v777_v11 = vsub.f32 %v6858_v23, %v3698_v54  ;;  %v3790_v46 = vand.u32 2147483647, %v768_v61 }
  0xa9   :  { %6891 = vst [vmem:[#allocation110_spill] sm:$0xff] %v3693_v37  ;;  %6893 = vst [vmem:[#allocation111_spill] sm:$0xff] %v3698_v54  ;;  %v778_v55 = vsub.f32 %v6859_v1, %v3645_v40  ;;  %v779_v31 = vsub.f32 %v6861_v45, %v3702_v53  ;;  %v780_v15 = vsub.f32 %v6862_v3, %v3649_v24  ;;  %v3798_v1 = vand.u32 2147483647, %v771_v0 }
  0xaa   :  { %6894 = vst [vmem:[#allocation112_spill] sm:$0xff] %v3702_v53  ;;  %6895 = vst [vmem:[#allocation113_spill] sm:$0xff] %v3706_v35  ;;  %v781_v59 = vsub.f32 %v6864_v29, %v3706_v35  ;;  %v782_v14 = vsub.f32 %v6865_v21, %v3653_v10  ;;  %v783_v42 = vsub.f32 %v6867_v58, %v3710_v12  ;;  %v3804_v23 = vand.u32 2147483647, %v774_v49 }
  0xab   :  { %6896 = vst [vmem:[#allocation114_spill] sm:$0xff] %v3710_v12  ;;  %6897 = vst [vmem:[#allocation115_spill] sm:$0xff] %v3714_v28  ;;  %v784_v54 = vsub.f32 %v6868_v27, %v3657_v39  ;;  %v785_v40 = vsub.f32 %v6870_v4, %v3714_v28  ;;  %v786_v53 = vsub.f32 %v6871_v33, %v3661_v48  ;;  %v3814_v17 = vand.u32 2147483647, %v778_v55 }
  0xac   :  { %6898 = vst [vmem:[#allocation116_spill] sm:$0xff] %v3718_v47  ;;  %6899 = vst [vmem:[#allocation117_spill] sm:$0xff] %v3722_v41  ;;  %v787_v24 = vsub.f32 %v6873_v2, %v3718_v47  ;;  %v788_v35 = vsub.f32 %v6874_v36, %v3665_v18  ;;  %v789_v10 = vsub.f32 %v6876_v9, %v3722_v41  ;;  %v3792_v18 = vand.u32 2147483647, %v769_v57 }
  0xad   :  { %6900 = vst [vmem:[#allocation118_spill] sm:$0xff] %v3726_v20  ;;  %6901 = vst [vmem:[#allocation119_spill] sm:$0xff] %v3730_v38  ;;  %v790_v12 = vsub.f32 %v6877_v22, %v3669_v32  ;;  %v791_v39 = vsub.f32 %v6879_v26, %v3726_v20  ;;  %v792_v28 = vsub.f32 %v6880_v43, %v3681_v7  ;;  %v3794_v41 = vand.u32 2147483647, %v770_v44 }
  0xae   :  { %6904 = vst [vmem:[#allocation7_spill] sm:$0xff] %v3740_v50  ;;  %v793_v48 = vsub.f32 %v6882_v52, %v3730_v38  ;;  %v794_v47 = vsub.f32 %v6885_v5, %v3693_v37  ;;  %v795_v32 = vsub.f32 %v6887_v30, %v3740_v50  ;;  %v3800_v20 = vand.u32 2147483647, %v772_v25 }
  0xaf   :  { %v3802_v7 = vand.u32 2147483647, %v773_v19  ;;  %v3806_v38 = vand.u32 2147483647, %v775_v6  ;;  %v3808_v37 = vand.u32 2147483647, %v776_v63 }
  0xb0   :  { %v3812_v44 = vand.u32 2147483647, %v777_v11  ;;  %v3816_v50 = vand.u32 2147483647, %v779_v31  ;;  %v3820_v19 = vand.u32 2147483647, %v780_v15 }
  0xb1   :  { %v3822_v49 = vand.u32 2147483647, %v781_v59  ;;  %v3824_v6 = vand.u32 2147483647, %v782_v14  ;;  %v3828_v56 = vand.u32 2147483647, %v783_v42 }
  0xb2   :  { %v3830_v11 = vand.u32 2147483647, %v784_v54  ;;  %v3832_v55 = vand.u32 2147483647, %v785_v40  ;;  %v3836_v61 = vand.u32 2147483647, %v786_v53 }
  0xb3   :  { %6907 = vst [vmem:[#allocation10_spill] sm:$0xff] %v3822_v49  ;;  %6909 = vst [vmem:[#allocation120_spill] sm:$0xff] %v3828_v56  ;;  %v3838_v15 = vand.u32 2147483647, %v787_v24  ;;  %v3840_v59 = vand.u32 2147483647, %v788_v35 }
  0xb4   :  { %6911 = vst [vmem:[#allocation121_spill] sm:$0xff] %v3836_v61  ;;  %v3844_v0 = vand.u32 2147483647, %v789_v10  ;;  %v3846_v42 = vand.u32 2147483647, %v790_v12  ;;  %v6919_v57 = vmin.f32 %v3790_v46, 1.0 }
  0xb5   :  { %v3848_v54 = vand.u32 2147483647, %v791_v39  ;;  %v3852_v63 = vand.u32 2147483647, %v792_v28  ;;  %v3854_v53 = vand.u32 2147483647, %v793_v48 }
  0xb6   :  { %v3856_v24 = vand.u32 2147483647, %v794_v47  ;;  %v3860_v31 = vand.u32 2147483647, %v795_v32  ;;  %v852_v39 = vmul.f32 0.5, %v6919_v57  ;;  %v6920_v10 = vmin.f32 %v3792_v18, 1.0 }
  0xb7   :  { %6913 = vst [vmem:[#allocation122_spill] sm:$0xff] %v3848_v54  ;;  %6915 = vst [vmem:[#allocation123_spill] sm:$0xff] %v3852_v63  ;;  %v6921_v25 = vmin.f32 %v3794_v41, 1.0  ;;  %v6922_v16 = vmin.f32 %v3798_v1, 1.0  ;;  %v6923_v48 = vmin.f32 %v3800_v20, 1.0  ;;  %v6924_v47 = vmin.f32 %v3802_v7, 1.0 }
  0xb8   :  { %6916 = vst [vmem:[#allocation124_spill] sm:$0xff] %v3856_v24  ;;  %v853_v12 = vmul.f32 0.5, %v6920_v10  ;;  %v6925_v32 = vmin.f32 %v3804_v23, 1.0  ;;  %v6926_v57 = vmin.f32 %v3806_v38, 1.0  ;;  %v6927_v10 = vmin.f32 %v3808_v37, 1.0 }
  0xb9   :  { %v854_v33 = vmul.f32 0.5, %v6921_v25  ;;  %v855_v28 = vmul.f32 0.5, %v6922_v16  ;;  %v856_v35 = vmul.f32 0.5, %v6923_v48  ;;  %v857_v40 = vmul.f32 0.5, %v6924_v47 }
  0xba   :  { %v858_v4 = vmul.f32 0.5, %v6925_v32  ;;  %v859_v27 = vmul.f32 0.5, %v6926_v57  ;;  %v860_v14 = vmul.f32 0.5, %v6927_v10  ;;  %v6928_v25 = vmin.f32 %v3812_v44, 1.0 }
  0xbb   :  { %v6929_v16 = vmin.f32 %v3814_v17, 1.0  ;;  %v6930_v48 = vmin.f32 %v3816_v50, 1.0  ;;  %v6931_v47 = vmin.f32 %v3820_v19, 1.0  ;;  %v6932_v32 = vmin.f32 %v3822_v49, 1.0 }
  0xbc   :  { %v861_v58 = vmul.f32 0.5, %v6928_v25  ;;  %v6933_v57 = vmin.f32 %v3824_v6, 1.0  ;;  %v6934_v10 = vmin.f32 %v3828_v56, 1.0  ;;  %v6935_v25 = vmin.f32 %v3830_v11, 1.0 }
  0xbd   :  { %v862_v21 = vmul.f32 0.5, %v6929_v16  ;;  %v863_v29 = vmul.f32 0.5, %v6930_v48  ;;  %v864_v3 = vmul.f32 0.5, %v6931_v47  ;;  %v865_v45 = vmul.f32 0.5, %v6932_v32 }
  0xbe   :  { %v866_v51 = vmul.f32 0.5, %v6933_v57  ;;  %v867_v34 = vmul.f32 0.5, %v6934_v10  ;;  %v868_v62 = vmul.f32 0.5, %v6935_v25  ;;  %v6936_v16 = vmin.f32 %v3832_v55, 1.0 }
  0xbf   :  { %v6937_v48 = vmin.f32 %v3836_v61, 1.0  ;;  %v6938_v47 = vmin.f32 %v3838_v15, 1.0  ;;  %v6939_v32 = vmin.f32 %v3840_v59, 1.0  ;;  %v6940_v57 = vmin.f32 %v3844_v0, 1.0 }
  0xc0   :  { %v869_v60 = vmul.f32 0.5, %v6936_v16  ;;  %v6941_v10 = vmin.f32 %v3846_v42, 1.0  ;;  %v6942_v25 = vmin.f32 %v3848_v54, 1.0  ;;  %v6943_v16 = vmin.f32 %v3852_v63, 1.0 }
  0xc1   :  { %v870_v8 = vmul.f32 0.5, %v6937_v48  ;;  %v871_v30 = vmul.f32 0.5, %v6938_v47  ;;  %v872_v5 = vmul.f32 0.5, %v6939_v32  ;;  %v873_v52 = vmul.f32 0.5, %v6940_v57 }
  0xc2   :  { %v874_v43 = vmul.f32 0.5, %v6941_v10  ;;  %v875_v26 = vmul.f32 0.5, %v6942_v25  ;;  %v876_v22 = vmul.f32 0.5, %v6943_v16  ;;  %v6944_v48 = vmin.f32 %v3854_v53, 1.0 }
  0xc3   :  { %v6945_v47 = vmin.f32 %v3856_v24, 1.0  ;;  %v6946_v32 = vmin.f32 %v3860_v31, 1.0  ;;  %v880_v57 = vsub.f32 %v3790_v46, %v852_v39  ;;  %v881_v13 = vsub.f32 %v3792_v18, %v853_v12 }
  0xc4   :  { %v877_v9 = vmul.f32 0.5, %v6944_v48  ;;  %v882_v10 = vsub.f32 %v3794_v41, %v854_v33  ;;  %v883_v25 = vsub.f32 %v3798_v1, %v855_v28  ;;  %v884_v63 = vsub.f32 %v3800_v20, %v856_v35 }
  0xc5   :  { %v878_v36 = vmul.f32 0.5, %v6945_v47  ;;  %v879_v2 = vmul.f32 0.5, %v6946_v32  ;;  %v885_v16 = vsub.f32 %v3802_v7, %v857_v40  ;;  %v886_v48 = vsub.f32 %v3804_v23, %v858_v4 }
  0xc6   :  { %v887_v24 = vsub.f32 %v3806_v38, %v859_v27  ;;  %v888_v47 = vsub.f32 %v3808_v37, %v860_v14  ;;  %v889_v32 = vsub.f32 %v3812_v44, %v861_v58  ;;  %v890_v39 = vsub.f32 %v3814_v17, %v862_v21 }
  0xc7   :  { %v891_v12 = vsub.f32 %v3816_v50, %v863_v29  ;;  %v892_v33 = vsub.f32 %v3820_v19, %v864_v3  ;;  %v893_v28 = vsub.f32 %v3822_v49, %v865_v45  ;;  %v894_v35 = vsub.f32 %v3824_v6, %v866_v51  ;;  %v6947_v49 = vld [vmem:[#allocation123_spill] sm:$0xff] }
  0xc8   :  { %v895_v40 = vsub.f32 %v3828_v56, %v867_v34  ;;  %v896_v4 = vsub.f32 %v3830_v11, %v868_v62  ;;  %v897_v27 = vsub.f32 %v3832_v55, %v869_v60  ;;  %v898_v14 = vsub.f32 %v3836_v61, %v870_v8  ;;  %v6948_v56 = vld [vmem:[#allocation124_spill] sm:$0xff] }
  0xc9   :  { %v899_v58 = vsub.f32 %v3838_v15, %v871_v30  ;;  %v900_v21 = vsub.f32 %v3840_v59, %v872_v5  ;;  %v901_v29 = vsub.f32 %v3844_v0, %v873_v52  ;;  %v902_v3 = vsub.f32 %v3846_v42, %v874_v43 }
  0xca   :  { %v903_v45 = vsub.f32 %v3848_v54, %v875_v26  ;;  %v904_v51 = vsub.f32 %v6947_v49, %v876_v22  ;;  %v905_v34 = vsub.f32 %v3854_v53, %v877_v9  ;;  %v906_v62 = vsub.f32 %v6948_v56, %v878_v36 }
  0xcb   :  { %v907_v60 = vsub.f32 %v3860_v31, %v879_v2  ;;  %v6949_v8 = vmin.f32 %v3790_v46, 1.0  ;;  %v6950_v30 = vmin.f32 %v3792_v18, 1.0  ;;  %v6951_v52 = vmin.f32 %v3794_v41, 1.0 }
  0xcc   :  { %v6952_v26 = vmin.f32 %v3798_v1, 1.0  ;;  %v6953_v22 = vmin.f32 %v3800_v20, 1.0  ;;  %v6954_v36 = vmin.f32 %v3802_v7, 1.0  ;;  %v6955_v46 = vmin.f32 %v3804_v23, 1.0 }
  0xcd   :  { %v908_v61 = vmul.f32 %v880_v57, %v6949_v8  ;;  %v3980_v5 = vmul.f32 %v881_v13, %v6950_v30  ;;  %v910_v43 = vmul.f32 %v882_v10, %v6951_v52  ;;  %v6956_v13 = vmin.f32 %v3806_v38, 1.0  ;;  %v6962_v38 = vld [vmem:[#allocation10_spill] sm:$0xff] }
  0xce   :  { %v3986_v54 = vmul.f32 %v883_v25, %v6952_v26  ;;  %v912_v9 = vmul.f32 %v884_v63, %v6953_v22  ;;  %v3992_v2 = vmul.f32 %v885_v16, %v6954_v36  ;;  %v914_v57 = vmul.f32 %v886_v48, %v6955_v46  ;;  %v6975_v36 = vld [vmem:[#allocation122_spill] sm:$0xff] }
  0xcf   :  { %v3998_v18 = vmul.f32 %v887_v24, %v6956_v13  ;;  %v6957_v41 = vmin.f32 %v3808_v37, 1.0  ;;  %v6958_v1 = vmin.f32 %v3812_v44, 1.0  ;;  %v6959_v20 = vmin.f32 %v3814_v17, 1.0  ;;  %v6965_v44 = vld [vmem:[#allocation120_spill] sm:$0xff] }
  0xd0   :  { %v6960_v7 = vmin.f32 %v3816_v50, 1.0  ;;  %v6961_v23 = vmin.f32 %v3820_v19, 1.0  ;;  %v6963_v24 = vmin.f32 %v6962_v38, 1.0  ;;  %v6964_v37 = vmin.f32 %v3824_v6, 1.0  ;;  %v6969_v19 = vld [vmem:[#allocation121_spill] sm:$0xff] }
  0xd1   :  { %v916_v10 = vmul.f32 %v888_v47, %v6957_v41  ;;  %v4004_v25 = vmul.f32 %v889_v32, %v6958_v1  ;;  %v918_v63 = vmul.f32 %v890_v39, %v6959_v20  ;;  %v6966_v32 = vmin.f32 %v6965_v44, 1.0 }
  0xd2   :  { %v4010_v16 = vmul.f32 %v891_v12, %v6960_v7  ;;  %v920_v48 = vmul.f32 %v892_v33, %v6961_v23  ;;  %v4016_v8 = vmul.f32 %v893_v28, %v6963_v24  ;;  %v922_v47 = vmul.f32 %v894_v35, %v6964_v37 }
  0xd3   :  { %v4022_v30 = vmul.f32 %v895_v40, %v6966_v32  ;;  %v6967_v17 = vmin.f32 %v3830_v11, 1.0  ;;  %v6968_v50 = vmin.f32 %v3832_v55, 1.0  ;;  %v6970_v33 = vmin.f32 %v6969_v19, 1.0 }
  0xd4   :  { %v6971_v28 = vmin.f32 %v3838_v15, 1.0  ;;  %v965_v6 = vrot.slane %v908_v61, 2  ;;  %v966_v35 = vrot.slane %v3980_v5, 2  ;;  %v6972_v40 = vmin.f32 %v3840_v59, 1.0 }
  0xd5   :  { %v924_v39 = vmul.f32 %v896_v4, %v6967_v17  ;;  %v4028_v12 = vmul.f32 %v897_v27, %v6968_v50  ;;  %v926_v52 = vmul.f32 %v898_v14, %v6970_v33  ;;  %v6973_v11 = vmin.f32 %v3844_v0, 1.0  ;;  %v6981_v50 = vld [vmem:[#allocation97_spill] sm:$0xff]  ;;  %v6983_v33 = vld [vmem:[#allocation98_spill] sm:$0xff] }
  0xd6   :  { %v4034_v26 = vmul.f32 %v899_v58, %v6971_v28  ;;  %v928_v22 = vmul.f32 %v900_v21, %v6972_v40  ;;  %v6974_v55 = vmin.f32 %v3846_v42, 1.0  ;;  %v6976_v14 = vmin.f32 %v6975_v36, 1.0  ;;  %v6985_v28 = vld [vmem:[#allocation93_spill] sm:$0xff]  ;;  %v6993_v36 = vld [vmem:[#allocation68_spill] sm:$0xff] }
  0xd7   :  { %v4041_v4 = vmul.f32 %v901_v29, %v6973_v11  ;;  %v6977_v15 = vmin.f32 %v6947_v49, 1.0  ;;  %v6978_v58 = vmin.f32 %v3854_v53, 1.0  ;;  %v6979_v59 = vmin.f32 %v6948_v56, 1.0  ;;  %v6989_v11 = vld [vmem:[#allocation95_spill] sm:$0xff] }
  0xd8   :  { %v930_v27 = vmul.f32 %v902_v3, %v6974_v55  ;;  %v4047_v46 = vmul.f32 %v903_v45, %v6976_v14  ;;  %v6980_v21 = vmin.f32 %v3860_v31, 1.0  ;;  %v968_v42 = vrot.slane %v910_v43, 2  ;;  %v6991_v55 = vld [vmem:[#allocation96_spill] sm:$0xff] }
  0xd9   :  { %v932_v61 = vmul.f32 %v904_v51, %v6977_v15  ;;  %v4053_v5 = vmul.f32 %v905_v34, %v6978_v58  ;;  %v934_v0 = vmul.f32 %v906_v62, %v6979_v59  ;;  %v969_v3 = vrot.slane %v3986_v54, 2  ;;  %v6997_v15 = vld [vmem:[#allocation70_spill] sm:$0xff]  ;;  %v6999_v58 = vld [vmem:[#allocation71_spill] sm:$0xff]  ;;  %v7001_v59 = vld [vmem:[#allocation72_spill] sm:$0xff] }
  0xda   :  { %v4059_v29 = vmul.f32 %v907_v60, %v6980_v21  ;;  %v971_v13 = vrot.slane %v912_v9, 2  ;;  %v967_v45 = vsel %vm964_vm2, %v965_v6, %v966_v35  ;;  %v972_v49 = vrot.slane %v3992_v2, 2  ;;  %v6987_v6 = vld [vmem:[#allocation94_spill] sm:$0xff]  ;;  %v7003_v21 = vld [vmem:[#allocation73_spill] sm:$0xff] }
  0xdb   :  { %v974_v51 = vrot.slane %v914_v57, 2  ;;  %v975_v53 = vrot.slane %v3998_v18, 2  ;;  %v977_v34 = vrot.slane %v916_v10, 2  ;;  %v978_v41 = vrot.slane %v4004_v25, 2 }
  0xdc   :  { %v980_v56 = vrot.slane %v918_v63, 2  ;;  %v981_v62 = vrot.slane %v4010_v16, 2  ;;  %v983_v31 = vrot.slane %v920_v48, 2  ;;  %v984_v60 = vrot.slane %v4016_v8, 2 }
  0xdd   :  { %v986_v43 = vrot.slane %v922_v47, 2  ;;  %v987_v54 = vrot.slane %v4022_v30, 2  ;;  %v989_v9 = vrot.slane %v924_v39, 2  ;;  %v990_v1 = vrot.slane %v4028_v12, 2 }
  0xde   :  { %v992_v20 = vrot.slane %v926_v52, 2  ;;  %v993_v2 = vrot.slane %v4034_v26, 2  ;;  %v995_v57 = vrot.slane %v928_v22, 2  ;;  %v996_v18 = vrot.slane %v4041_v4, 2 }
  0xdf   :  { %v998_v10 = vrot.slane %v930_v27, 2  ;;  %v999_v25 = vrot.slane %v4047_v46, 2  ;;  %v970_v63 = vsel %vm964_vm2, %v968_v42, %v969_v3  ;;  %v973_v7 = vsel %vm964_vm2, %v971_v13, %v972_v49  ;;  %v6995_v46 = vld [vmem:[#allocation69_spill] sm:$0xff]  ;;  %v7005_v42 = vld [vmem:[#allocation74_spill] sm:$0xff]  ;;  %v7007_v13 = vld [vmem:[#allocation75_spill] sm:$0xff] }
  0xe0   :  { %v1001_v16 = vrot.slane %v932_v61, 2  ;;  %v1002_v23 = vrot.slane %v4053_v5, 2  ;;  %v976_v48 = vsel %vm964_vm2, %v974_v51, %v975_v53  ;;  %v979_v38 = vsel %vm964_vm2, %v977_v34, %v978_v41 }
  0xe1   :  { %v1004_v24 = vrot.slane %v934_v0, 2  ;;  %v1005_v8 = vrot.slane %v4059_v29, 2  ;;  %v982_v37 = vsel %vm964_vm2, %v980_v56, %v981_v62  ;;  %v985_v47 = vsel %vm964_vm2, %v983_v31, %v984_v60  ;;  %v7015_v31 = vld [vmem:[#allocation79_spill] sm:$0xff] }
  0xe2   :  { %v988_v44 = vsel %vm964_vm2, %v986_v43, %v987_v54  ;;  %v991_v32 = vsel %vm964_vm2, %v989_v9, %v990_v1  ;;  %v994_v30 = vsel %vm964_vm2, %v992_v20, %v993_v2  ;;  %v997_v17 = vsel %vm964_vm2, %v995_v57, %v996_v18  ;;  %v7019_v20 = vld [vmem:[#allocation65_spill] sm:$0xff] }
  0xe3   :  { %v1000_v39 = vsel %vm964_vm2, %v998_v10, %v999_v25  ;;  %v4087_v12 = vadd.f32 %v967_v45, %v6981_v50  ;;  %v1003_v19 = vsel %vm964_vm2, %v1001_v16, %v1002_v23  ;;  %v4091_v52 = vadd.f32 %v966_v35, %v6983_v33  ;;  %v7040_v33 = vld [vmem:[#allocation28_spill] sm:$0xff] }
  0xe4   :  { %v4094_v26 = vadd.f32 %v970_v63, %v6985_v28  ;;  %v4097_v40 = vadd.f32 %v969_v3, %v6987_v6  ;;  %v1006_v22 = vsel %vm964_vm2, %v1004_v24, %v1005_v8  ;;  %v4101_v4 = vadd.f32 %v973_v7, %v6989_v11  ;;  %v7023_v63 = vld [vmem:[#allocation66_spill] sm:$0xff]  ;;  %v7042_v6 = vld [vmem:[#allocation29_spill] sm:$0xff] }
  0xe5   :  { %6982 = vst [vmem:[#allocation123_spill] sm:$0xff] %v4087_v12  ;;  %6984 = vst [vmem:[#allocation124_spill] sm:$0xff] %v4091_v52  ;;  %v4104_v27 = vadd.f32 %v972_v49, %v6991_v55  ;;  %v4107_v14 = vadd.f32 %v976_v48, %v6993_v36  ;;  %v4110_v35 = vadd.f32 %v975_v53, %v6995_v46  ;;  %v7009_v49 = vld [vmem:[#allocation76_spill] sm:$0xff]  ;;  %v7011_v53 = vld [vmem:[#allocation77_spill] sm:$0xff] }
  0xe6   :  { %6986 = vst [vmem:[#allocation10_spill] sm:$0xff] %v4094_v26  ;;  %6988 = vst [vmem:[#allocation120_spill] sm:$0xff] %v4097_v40  ;;  %v4113_v61 = vadd.f32 %v979_v38, %v6997_v15  ;;  %v4116_v5 = vadd.f32 %v978_v41, %v6999_v58  ;;  %v4119_v0 = vadd.f32 %v982_v37, %v7001_v59  ;;  %v7013_v41 = vld [vmem:[#allocation78_spill] sm:$0xff]  ;;  %v7027_v48 = vld [vmem:[#allocation83_spill] sm:$0xff] }
  0xe7   :  { %6990 = vst [vmem:[#allocation121_spill] sm:$0xff] %v4101_v4  ;;  %6992 = vst [vmem:[#allocation122_spill] sm:$0xff] %v4104_v27  ;;  %v4122_v29 = vadd.f32 %v981_v62, %v7003_v21  ;;  %v4125_v3 = vadd.f32 %v985_v47, %v7005_v42  ;;  %v4128_v45 = vadd.f32 %v984_v60, %v7007_v13  ;;  %v7017_v62 = vld [vmem:[#allocation80_spill] sm:$0xff]  ;;  %v7021_v60 = vld [vmem:[#allocation81_spill] sm:$0xff] }
  0xe8   :  { %6994 = vst [vmem:[#allocation97_spill] sm:$0xff] %v4107_v14  ;;  %6996 = vst [vmem:[#allocation98_spill] sm:$0xff] %v4110_v35  ;;  %v4131_v51 = vadd.f32 %v988_v44, %v7009_v49  ;;  %v4134_v34 = vadd.f32 %v987_v54, %v7011_v53  ;;  %v4137_v56 = vadd.f32 %v991_v32, %v7013_v41  ;;  %v7025_v54 = vld [vmem:[#allocation82_spill] sm:$0xff]  ;;  %v7031_v37 = vld [vmem:[#allocation84_spill] sm:$0xff] }
  0xe9   :  { %6998 = vst [vmem:[#allocation93_spill] sm:$0xff] %v4113_v61  ;;  %7000 = vst [vmem:[#allocation94_spill] sm:$0xff] %v4116_v5  ;;  %v4140_v43 = vadd.f32 %v990_v1, %v7015_v31  ;;  %v4143_v9 = vadd.f32 %v994_v30, %v7017_v62  ;;  %v4146_v57 = vadd.f32 %v993_v2, %v7019_v20  ;;  %v7029_v1 = vld [vmem:[#allocation67_spill] sm:$0xff]  ;;  %v7033_v2 = vld [vmem:[#allocation85_spill] sm:$0xff] }
  0xea   :  { %7002 = vst [vmem:[#allocation95_spill] sm:$0xff] %v4119_v0  ;;  %7004 = vst [vmem:[#allocation96_spill] sm:$0xff] %v4122_v29  ;;  %v4149_v10 = vadd.f32 %v997_v17, %v7021_v60  ;;  %v4152_v7 = vadd.f32 %v996_v18, %v7023_v63  ;;  %v4155_v16 = vadd.f32 %v1000_v39, %v7025_v54  ;;  %v7035_v32 = vld [vmem:[#allocation86_spill] sm:$0xff]  ;;  %v7039_v39 = vld [vmem:[#allocation60_spill] sm:$0xff] }
  0xeb   :  { %7006 = vst [vmem:[#allocation68_spill] sm:$0xff] %v4125_v3  ;;  %7008 = vst [vmem:[#allocation69_spill] sm:$0xff] %v4128_v45  ;;  %v4158_v38 = vadd.f32 %v999_v25, %v7027_v48  ;;  %v4161_v24 = vadd.f32 %v1003_v19, %v7029_v1  ;;  %v4164_v47 = vadd.f32 %v1002_v23, %v7031_v37  ;;  %v7037_v18 = vld [vmem:[#allocation46_spill] sm:$0xff]  ;;  %v7041_v25 = vld [vmem:[#allocation47_spill] sm:$0xff] }
  0xec   :  { %7010 = vst [vmem:[#allocation70_spill] sm:$0xff] %v4131_v51  ;;  %7012 = vst [vmem:[#allocation71_spill] sm:$0xff] %v4134_v34  ;;  %v4167_v44 = vadd.f32 %v1006_v22, %v7033_v2  ;;  %v4170_v30 = vadd.f32 %v1005_v8, %v7035_v32  ;;  %v7038_v17 = vld [vmem:[#allocation26_spill] sm:$0xff]  ;;  %v1081_v28 = vsub.f32 %v7040_v33, %v7039_v39  ;;  %v7043_v19 = vld [vmem:[#allocation61_spill] sm:$0xff] }
  0xed   :  { %7014 = vst [vmem:[#allocation72_spill] sm:$0xff] %v4137_v56  ;;  %7016 = vst [vmem:[#allocation73_spill] sm:$0xff] %v4140_v43  ;;  %v1080_v50 = vsub.f32 %v7038_v17, %v7037_v18  ;;  %v1082_v11 = vsub.f32 %v7042_v6, %v7041_v25  ;;  %v7044_v55 = vld [vmem:[#allocation30_spill] sm:$0xff]  ;;  %v7045_v23 = vld [vmem:[#allocation48_spill] sm:$0xff] }
  0xee   :  { %7018 = vst [vmem:[#allocation74_spill] sm:$0xff] %v4143_v9  ;;  %7020 = vst [vmem:[#allocation75_spill] sm:$0xff] %v4146_v57  ;;  %v1083_v36 = vsub.f32 %v7044_v55, %v7043_v19  ;;  %v7046_v46 = vld [vmem:[#allocation31_spill] sm:$0xff]  ;;  %v7047_v22 = vld [vmem:[#allocation62_spill] sm:$0xff] }
  0xef   :  { %7022 = vst [vmem:[#allocation76_spill] sm:$0xff] %v4149_v10  ;;  %7024 = vst [vmem:[#allocation77_spill] sm:$0xff] %v4152_v7  ;;  %v1084_v15 = vsub.f32 %v7046_v46, %v7045_v23  ;;  %v7048_v58 = vld [vmem:[#allocation32_spill] sm:$0xff]  ;;  %v7049_v8 = vld [vmem:[#allocation49_spill] sm:$0xff] }
  0xf0   :  { %7026 = vst [vmem:[#allocation78_spill] sm:$0xff] %v4155_v16  ;;  %7028 = vst [vmem:[#allocation79_spill] sm:$0xff] %v4158_v38  ;;  %v1085_v59 = vsub.f32 %v7048_v58, %v7047_v22  ;;  %v7050_v21 = vld [vmem:[#allocation33_spill] sm:$0xff]  ;;  %v7051_v13 = vld [vmem:[#allocation63_spill] sm:$0xff] }
  0xf1   :  { %7030 = vst [vmem:[#allocation80_spill] sm:$0xff] %v4161_v24  ;;  %7032 = vst [vmem:[#allocation65_spill] sm:$0xff] %v4164_v47  ;;  %v1086_v42 = vsub.f32 %v7050_v21, %v7049_v8  ;;  %v7052_v49 = vld [vmem:[#allocation34_spill] sm:$0xff]  ;;  %v7053_v41 = vld [vmem:[#allocation52_spill] sm:$0xff] }
  0xf2   :  { %7034 = vst [vmem:[#allocation81_spill] sm:$0xff] %v4167_v44  ;;  %7036 = vst [vmem:[#allocation66_spill] sm:$0xff] %v4170_v30  ;;  %v1087_v53 = vsub.f32 %v7052_v49, %v7051_v13  ;;  %v7054_v31 = vld [vmem:[#allocation35_spill] sm:$0xff]  ;;  %v7055_v20 = vld [vmem:[#allocation64_spill] sm:$0xff] }
  0xf3   :  { %v1088_v62 = vsub.f32 %v7054_v31, %v7053_v41  ;;  %v7056_v60 = vld [vmem:[#allocation36_spill] sm:$0xff]  ;;  %v7057_v54 = vld [vmem:[#allocation5_spill] sm:$0xff]  ;;  %v7058_v48 = vld [vmem:[#allocation27_spill] sm:$0xff] }
  0xf4   :  { %v1089_v63 = vsub.f32 %v7056_v60, %v7055_v20  ;;  %v7059_v1 = vsub.f32 %v7057_v54, %v7058_v48  ;;  %v7060_v2 = vld [vmem:[#allocation55_spill] sm:$0xff]  ;;  %v7061_v32 = vld [vmem:[#allocation37_spill] sm:$0xff]  ;;  %v7062_v23 = vld [vmem:[#allocation6_spill] sm:$0xff] }
  0xf5   :  { %v1090_v22 = vsub.f32 %v7061_v32, %v7060_v2  ;;  %v7063_v19 = vld [vmem:[#allocation12_spill] sm:$0xff]  ;;  %v7066_v39 = vld [vmem:[#allocation38_spill] sm:$0xff]  ;;  %v7068_v31 = vld [vmem:[#allocation9_spill] sm:$0xff] }
  0xf6   :  { %v4195_v37 = vand.u32 2147483647, %v7059_v1  ;;  %v7064_v8 = vsub.f32 %v7062_v23, %v7063_v19  ;;  %v7065_v13 = vld [vmem:[#allocation8_spill] sm:$0xff]  ;;  %v7069_v20 = vld [vmem:[#allocation23_spill] sm:$0xff]  ;;  %v7074_v2 = vld [vmem:[#allocation13_spill] sm:$0xff] }
  0xf7   :  { %v7067_v18 = vsub.f32 %v7065_v13, %v7066_v39  ;;  %v7070_v60 = vsub.f32 %v7068_v31, %v7069_v20  ;;  %v7071_v1 = vld [vmem:[#allocation11_spill] sm:$0xff]  ;;  %v7075_v32 = vld [vmem:[#allocation40_spill] sm:$0xff]  ;;  %v7077_v46 = vld [vmem:[#allocation14_spill] sm:$0xff]  ;;  %v4309_v31 = vand.u32 2147483647, %v1088_v62 }
  0xf8   :  { %v4202_v25 = vand.u32 2147483647, %v7064_v8  ;;  %v7072_v48 = vld [vmem:[#allocation51_spill] sm:$0xff]  ;;  %v7076_v19 = vsub.f32 %v7074_v2, %v7075_v32  ;;  %v7078_v55 = vld [vmem:[#allocation53_spill] sm:$0xff]  ;;  %v7088_v32 = vld [vmem:[#allocation42_spill] sm:$0xff] }
  0xf9   :  { %v4207_v41 = vand.u32 2147483647, %v7067_v18  ;;  %v4212_v49 = vand.u32 2147483647, %v7070_v60  ;;  %v7073_v21 = vsub.f32 %v7071_v1, %v7072_v48  ;;  %v7079_v39 = vsub.f32 %v7077_v46, %v7078_v55  ;;  %v7081_v60 = vld [vmem:[#allocation15_spill] sm:$0xff]  ;;  %v7082_v33 = vld [vmem:[#allocation41_spill] sm:$0xff] }
  0xfa   :  { %v4222_v8 = vand.u32 2147483647, %v7076_v19  ;;  %v7083_v17 = vsub.f32 %v7081_v60, %v7082_v33  ;;  %v7085_v48 = vld [vmem:[#allocation54_spill] sm:$0xff]  ;;  %v7087_v19 = vld [vmem:[#allocation17_spill] sm:$0xff]  ;;  %v7092_v20 = vld [vmem:[#allocation56_spill] sm:$0xff] }
  0xfb   :  { %v4217_v58 = vand.u32 2147483647, %v7073_v21  ;;  %v4227_v18 = vand.u32 2147483647, %v7079_v39  ;;  %v7084_v21 = vld [vmem:[#allocation16_spill] sm:$0xff]  ;;  %v7089_v24 = vsub.f32 %v7087_v19, %v7088_v32  ;;  %v7091_v16 = vld [vmem:[#allocation18_spill] sm:$0xff] }
  0xfc   :  { %v4234_v30 = vand.u32 2147483647, %v7083_v17  ;;  %v7086_v44 = vsub.f32 %v7084_v21, %v7085_v48  ;;  %v7093_v6 = vsub.f32 %v7091_v16, %v7092_v20  ;;  %v7094_v17 = vld [vmem:[#allocation19_spill] sm:$0xff]  ;;  %v7098_v48 = vld [vmem:[#allocation57_spill] sm:$0xff]  ;;  %v7102_v55 = vld [vmem:[#allocation44_spill] sm:$0xff] }
  0xfd   :  { %v4244_v38 = vand.u32 2147483647, %v7089_v24  ;;  %v7095_v33 = vld [vmem:[#allocation43_spill] sm:$0xff]  ;;  %v7101_v19 = vld [vmem:[#allocation21_spill] sm:$0xff]  ;;  %v7106_v20 = vld [vmem:[#allocation58_spill] sm:$0xff]  ;;  %v7130_v62 = vmin.f32 %v4217_v58, 1.0 }
  0xfe   :  { %v4239_v47 = vand.u32 2147483647, %v7086_v44  ;;  %v4251_v54 = vand.u32 2147483647, %v7093_v6  ;;  %v7096_v7 = vsub.f32 %v7094_v17, %v7095_v33  ;;  %v7097_v44 = vld [vmem:[#allocation20_spill] sm:$0xff]  ;;  %v7103_v39 = vsub.f32 %v7101_v19, %v7102_v55  ;;  %v7105_v6 = vld [vmem:[#allocation22_spill] sm:$0xff] }
  0xff   :  { %v7099_v57 = vsub.f32 %v7097_v44, %v7098_v48  ;;  %v7107_v16 = vsub.f32 %v7105_v6, %v7106_v20  ;;  %v7109_v33 = vld [vmem:[#allocation45_spill] sm:$0xff]  ;;  %v7114_v32 = vld [vmem:[#allocation59_spill] sm:$0xff]  ;;  %v4289_v55 = vand.u32 2147483647, %v1081_v28  ;;  %v4293_v6 = vand.u32 2147483647, %v1082_v11 }
 0x100   :  { %v4256_v10 = vand.u32 2147483647, %v7096_v7  ;;  %v4268_v23 = vand.u32 2147483647, %v7103_v39  ;;  %v7108_v7 = vld [vmem:[#allocation24_spill] sm:$0xff]  ;;  %v7113_v44 = vld [vmem:[#allocation25_spill] sm:$0xff] }
 0x101   :  { %v4261_v9 = vand.u32 2147483647, %v7099_v57  ;;  %v4273_v43 = vand.u32 2147483647, %v7107_v16  ;;  %v7110_v17 = vsub.f32 %v7108_v7, %v7109_v33  ;;  %v7115_v24 = vsub.f32 %v7113_v44, %v7114_v32  ;;  %7116 = vst [vmem:[#allocation67_spill] sm:$0xff] %v4289_v55 }
 0x102   :  { %7104 = vst [vmem:[#allocation82_spill] sm:$0xff] %v4268_v23  ;;  %v4287_v39 = vand.u32 2147483647, %v1080_v50  ;;  %v4295_v33 = vand.u32 2147483647, %v1083_v36  ;;  %v7126_v16 = vmin.f32 %v4195_v37, 1.0 }
 0x103   :  { %v4278_v56 = vand.u32 2147483647, %v7110_v17  ;;  %v4285_v13 = vand.u32 2147483647, %v7115_v24  ;;  %v4297_v17 = vand.u32 2147483647, %v1084_v15 }
 0x104   :  { %v4301_v57 = vand.u32 2147483647, %v1085_v59  ;;  %v4303_v24 = vand.u32 2147483647, %v1086_v42  ;;  %v4305_v50 = vand.u32 2147483647, %v1087_v53 }
 0x105   :  { %7111 = vst [vmem:[#allocation83_spill] sm:$0xff] %v4278_v56  ;;  %7118 = vst [vmem:[#allocation84_spill] sm:$0xff] %v4297_v17  ;;  %v4311_v11 = vand.u32 2147483647, %v1089_v63  ;;  %v4313_v36 = vand.u32 2147483647, %v1090_v22 }
 0x106   :  { %7120 = vst [vmem:[#allocation85_spill] sm:$0xff] %v4305_v50  ;;  %v1147_v53 = vmul.f32 0.5, %v7126_v16  ;;  %v7127_v48 = vmin.f32 %v4202_v25, 1.0  ;;  %v7128_v42 = vmin.f32 %v4207_v41, 1.0  ;;  %v7129_v7 = vmin.f32 %v4212_v49, 1.0 }
 0x107   :  { %7122 = vst [vmem:[#allocation86_spill] sm:$0xff] %v4311_v11  ;;  %7123 = vst [vmem:[#allocation125_spill] sm:$0xff] %v4313_v36  ;;  %v1151_v15 = vmul.f32 0.5, %v7130_v62  ;;  %v7131_v63 = vmin.f32 %v4222_v8, 1.0  ;;  %v7132_v28 = vmin.f32 %v4227_v18, 1.0  ;;  %v7133_v16 = vmin.f32 %v4234_v30, 1.0 }
 0x108   :  { %v1148_v59 = vmul.f32 0.5, %v7127_v48  ;;  %v1149_v21 = vmul.f32 0.5, %v7128_v42  ;;  %v1150_v32 = vmul.f32 0.5, %v7129_v7  ;;  %v7134_v48 = vmin.f32 %v4239_v47, 1.0 }
 0x109   :  { %v1152_v22 = vmul.f32 0.5, %v7131_v63  ;;  %v1153_v60 = vmul.f32 0.5, %v7132_v28  ;;  %v1154_v46 = vmul.f32 0.5, %v7133_v16  ;;  %v7135_v42 = vmin.f32 %v4244_v38, 1.0 }
 0x10a   :  { %v1155_v2 = vmul.f32 0.5, %v7134_v48  ;;  %v7136_v7 = vmin.f32 %v4251_v54, 1.0  ;;  %v7137_v62 = vmin.f32 %v4256_v10, 1.0  ;;  %v7138_v63 = vmin.f32 %v4261_v9, 1.0 }
 0x10b   :  { %v1156_v20 = vmul.f32 0.5, %v7135_v42  ;;  %v7139_v28 = vmin.f32 %v4268_v23, 1.0  ;;  %v7140_v16 = vmin.f32 %v4273_v43, 1.0  ;;  %v7141_v48 = vmin.f32 %v4278_v56, 1.0 }
 0x10c   :  { %v1157_v1 = vmul.f32 0.5, %v7136_v7  ;;  %v1158_v44 = vmul.f32 0.5, %v7137_v62  ;;  %v1159_v19 = vmul.f32 0.5, %v7138_v63  ;;  %v7142_v42 = vmin.f32 %v4285_v13, 1.0 }
 0x10d   :  { %v1160_v34 = vmul.f32 0.5, %v7139_v28  ;;  %v1161_v51 = vmul.f32 0.5, %v7140_v16  ;;  %v1162_v45 = vmul.f32 0.5, %v7141_v48  ;;  %v7143_v7 = vmin.f32 %v4287_v39, 1.0 }
 0x10e   :  { %v1163_v3 = vmul.f32 0.5, %v7142_v42  ;;  %v7144_v62 = vmin.f32 %v4289_v55, 1.0  ;;  %v7145_v63 = vmin.f32 %v4293_v6, 1.0  ;;  %v7146_v28 = vmin.f32 %v4295_v33, 1.0 }
 0x10f   :  { %v1164_v29 = vmul.f32 0.5, %v7143_v7  ;;  %v7147_v16 = vmin.f32 %v4297_v17, 1.0  ;;  %v7148_v48 = vmin.f32 %v4301_v57, 1.0  ;;  %v7149_v42 = vmin.f32 %v4303_v24, 1.0 }
 0x110   :  { %v1165_v0 = vmul.f32 0.5, %v7144_v62  ;;  %v1166_v5 = vmul.f32 0.5, %v7145_v63  ;;  %v1167_v61 = vmul.f32 0.5, %v7146_v28  ;;  %v7150_v7 = vmin.f32 %v4305_v50, 1.0 }
 0x111   :  { %v1168_v35 = vmul.f32 0.5, %v7147_v16  ;;  %v1169_v14 = vmul.f32 0.5, %v7148_v48  ;;  %v1170_v27 = vmul.f32 0.5, %v7149_v42  ;;  %v7151_v62 = vmin.f32 %v4309_v31, 1.0 }
 0x112   :  { %v1171_v4 = vmul.f32 0.5, %v7150_v7  ;;  %v7152_v63 = vmin.f32 %v4311_v11, 1.0  ;;  %v7153_v28 = vmin.f32 %v4313_v36, 1.0  ;;  %v1175_v16 = vsub.f32 %v4195_v37, %v1147_v53 }
 0x113   :  { %v1172_v40 = vmul.f32 0.5, %v7151_v62  ;;  %v1176_v12 = vsub.f32 %v4202_v25, %v1148_v59  ;;  %v1177_v48 = vsub.f32 %v4207_v41, %v1149_v21  ;;  %v1178_v42 = vsub.f32 %v4212_v49, %v1150_v32 }
 0x114   :  { %v1173_v26 = vmul.f32 0.5, %v7152_v63  ;;  %v1174_v52 = vmul.f32 0.5, %v7153_v28  ;;  %v1179_v50 = vsub.f32 %v4217_v58, %v1151_v15  ;;  %v1180_v7 = vsub.f32 %v4222_v8, %v1152_v22 }
 0x115   :  { %v1181_v62 = vsub.f32 %v4227_v18, %v1153_v60  ;;  %v1182_v11 = vsub.f32 %v4234_v30, %v1154_v46  ;;  %v1183_v63 = vsub.f32 %v4239_v47, %v1155_v2  ;;  %v1184_v28 = vsub.f32 %v4244_v38, %v1156_v20 }
 0x116   :  { %v1185_v53 = vsub.f32 %v4251_v54, %v1157_v1  ;;  %v1186_v59 = vsub.f32 %v4256_v10, %v1158_v44  ;;  %v1187_v21 = vsub.f32 %v4261_v9, %v1159_v19  ;;  %v1188_v32 = vsub.f32 %v4268_v23, %v1160_v34  ;;  %v7154_v23 = vld [vmem:[#allocation85_spill] sm:$0xff] }
 0x117   :  { %v1189_v15 = vsub.f32 %v4273_v43, %v1161_v51  ;;  %v1190_v22 = vsub.f32 %v4278_v56, %v1162_v45  ;;  %v1191_v60 = vsub.f32 %v4285_v13, %v1163_v3  ;;  %v1192_v46 = vsub.f32 %v4287_v39, %v1164_v29  ;;  %v7155_v56 = vld [vmem:[#allocation86_spill] sm:$0xff] }
 0x118   :  { %v1193_v2 = vsub.f32 %v4289_v55, %v1165_v0  ;;  %v1194_v20 = vsub.f32 %v4293_v6, %v1166_v5  ;;  %v1195_v1 = vsub.f32 %v4295_v33, %v1167_v61  ;;  %v1196_v44 = vsub.f32 %v4297_v17, %v1168_v35 }
 0x119   :  { %v1197_v19 = vsub.f32 %v4301_v57, %v1169_v14  ;;  %v1198_v34 = vsub.f32 %v4303_v24, %v1170_v27  ;;  %v1199_v51 = vsub.f32 %v7154_v23, %v1171_v4  ;;  %v1200_v45 = vsub.f32 %v4309_v31, %v1172_v40 }
 0x11a   :  { %v1201_v3 = vsub.f32 %v7155_v56, %v1173_v26  ;;  %v1202_v29 = vsub.f32 %v4313_v36, %v1174_v52  ;;  %v7156_v0 = vmin.f32 %v4195_v37, 1.0  ;;  %v7157_v5 = vmin.f32 %v4202_v25, 1.0 }
 0x11b   :  { %v7158_v35 = vmin.f32 %v4207_v41, 1.0  ;;  %v7159_v14 = vmin.f32 %v4212_v49, 1.0  ;;  %v7160_v4 = vmin.f32 %v4217_v58, 1.0  ;;  %v7161_v40 = vmin.f32 %v4222_v8, 1.0 }
 0x11c   :  { %v1203_v55 = vmul.f32 %v1175_v16, %v7156_v0  ;;  %v1204_v61 = vmul.f32 %v1176_v12, %v7157_v5  ;;  %v7162_v52 = vmin.f32 %v4227_v18, 1.0  ;;  %v7163_v37 = vmin.f32 %v4234_v30, 1.0  ;;  %v7169_v18 = vld [vmem:[#allocation82_spill] sm:$0xff] }
 0x11d   :  { %v1205_v17 = vmul.f32 %v1177_v48, %v7158_v35  ;;  %v1206_v27 = vmul.f32 %v1178_v42, %v7159_v14  ;;  %v1207_v23 = vmul.f32 %v1179_v50, %v7160_v4  ;;  %v1208_v26 = vmul.f32 %v1180_v7, %v7161_v40 }
 0x11e   :  { %v1209_v36 = vmul.f32 %v1181_v62, %v7162_v52  ;;  %v1210_v16 = vmul.f32 %v1182_v11, %v7163_v37  ;;  %v7164_v12 = vmin.f32 %v4239_v47, 1.0  ;;  %v7165_v41 = vmin.f32 %v4244_v38, 1.0  ;;  %v7172_v47 = vld [vmem:[#allocation83_spill] sm:$0xff] }
 0x11f   :  { %v7166_v49 = vmin.f32 %v4251_v54, 1.0  ;;  %v7167_v58 = vmin.f32 %v4256_v10, 1.0  ;;  %v7168_v8 = vmin.f32 %v4261_v9, 1.0  ;;  %v7170_v62 = vmin.f32 %v7169_v18, 1.0  ;;  %v7176_v10 = vld [vmem:[#allocation67_spill] sm:$0xff] }
 0x120   :  { %v1211_v25 = vmul.f32 %v1183_v63, %v7164_v12  ;;  %v1212_v48 = vmul.f32 %v1184_v28, %v7165_v41  ;;  %v7171_v30 = vmin.f32 %v4273_v43, 1.0  ;;  %v7173_v63 = vmin.f32 %v7172_v47, 1.0  ;;  %v7180_v43 = vld [vmem:[#allocation84_spill] sm:$0xff]  ;;  %v7190_v41 = vld [vmem:[#allocation123_spill] sm:$0xff] }
 0x121   :  { %v1213_v42 = vmul.f32 %v1185_v53, %v7166_v49  ;;  %v1214_v50 = vmul.f32 %v1186_v59, %v7167_v58  ;;  %v1215_v7 = vmul.f32 %v1187_v21, %v7168_v8  ;;  %v1216_v0 = vmul.f32 %v1188_v32, %v7170_v62  ;;  %v7196_v49 = vld [vmem:[#allocation120_spill] sm:$0xff]  ;;  %v7202_v58 = vld [vmem:[#allocation97_spill] sm:$0xff] }
 0x122   :  { %v1217_v11 = vmul.f32 %v1189_v15, %v7171_v30  ;;  %v1218_v5 = vmul.f32 %v1190_v22, %v7173_v63  ;;  %v7174_v38 = vmin.f32 %v4285_v13, 1.0  ;;  %v7175_v54 = vmin.f32 %v4287_v39, 1.0  ;;  %v7184_v39 = vld [vmem:[#allocation85_spill] sm:$0xff] }
 0x123   :  { %v7177_v59 = vmin.f32 %v7176_v10, 1.0  ;;  %v7178_v9 = vmin.f32 %v4293_v6, 1.0  ;;  %v7179_v32 = vmin.f32 %v4295_v33, 1.0  ;;  %v7181_v15 = vmin.f32 %v7180_v43, 1.0  ;;  %v7188_v33 = vld [vmem:[#allocation125_spill] sm:$0xff] }
 0x124   :  { %v1219_v28 = vmul.f32 %v1191_v60, %v7174_v38  ;;  %v1220_v53 = vmul.f32 %v1192_v46, %v7175_v54  ;;  %v7182_v22 = vmin.f32 %v4301_v57, 1.0  ;;  %v7183_v13 = vmin.f32 %v4303_v24, 1.0  ;;  %v7192_v57 = vld [vmem:[#allocation124_spill] sm:$0xff]  ;;  %v7194_v24 = vld [vmem:[#allocation10_spill] sm:$0xff] }
 0x125   :  { %v1221_v35 = vmul.f32 %v1193_v2, %v7177_v59  ;;  %v1222_v21 = vmul.f32 %v1194_v20, %v7178_v9  ;;  %v1223_v14 = vmul.f32 %v1195_v1, %v7179_v32  ;;  %v1224_v4 = vmul.f32 %v1196_v44, %v7181_v15 }
 0x126   :  { %v1225_v40 = vmul.f32 %v1197_v19, %v7182_v22  ;;  %v1226_v60 = vmul.f32 %v1198_v34, %v7183_v13  ;;  %v7185_v46 = vmin.f32 %v7184_v39, 1.0  ;;  %v7186_v2 = vmin.f32 %v4309_v31, 1.0  ;;  %v7198_v31 = vld [vmem:[#allocation121_spill] sm:$0xff] }
 0x127   :  { %v7187_v6 = vmin.f32 %v7155_v56, 1.0  ;;  %v7189_v1 = vmin.f32 %v7188_v33, 1.0  ;;  %v4488_v44 = vadd.f32 %v1203_v55, %v7190_v41  ;;  %v4491_v19 = vadd.f32 %v1204_v61, %v7192_v57  ;;  %v7200_v56 = vld [vmem:[#allocation122_spill] sm:$0xff]  ;;  %v7206_v61 = vld [vmem:[#allocation93_spill] sm:$0xff] }
 0x128   :  { %v1227_v52 = vmul.f32 %v1199_v51, %v7185_v46  ;;  %v1228_v37 = vmul.f32 %v1200_v45, %v7186_v2  ;;  %v4494_v34 = vadd.f32 %v1205_v17, %v7194_v24  ;;  %v4497_v51 = vadd.f32 %v1206_v27, %v7196_v49  ;;  %v7204_v55 = vld [vmem:[#allocation98_spill] sm:$0xff]  ;;  %v7210_v27 = vld [vmem:[#allocation95_spill] sm:$0xff] }
 0x129   :  { %v1229_v20 = vmul.f32 %v1201_v3, %v7187_v6  ;;  %v1230_v12 = vmul.f32 %v1202_v29, %v7189_v1  ;;  %7191 = vst [vmem:[#allocation86_spill] sm:$0xff] %v4488_v44  ;;  %7193 = vst [vmem:[#allocation82_spill] sm:$0xff] %v4491_v19  ;;  %v4500_v45 = vadd.f32 %v1207_v23, %v7198_v31  ;;  %v7208_v17 = vld [vmem:[#allocation94_spill] sm:$0xff]  ;;  %v7212_v23 = vld [vmem:[#allocation96_spill] sm:$0xff] }
 0x12a   :  { %7195 = vst [vmem:[#allocation83_spill] sm:$0xff] %v4494_v34  ;;  %7197 = vst [vmem:[#allocation67_spill] sm:$0xff] %v4497_v51  ;;  %v4503_v3 = vadd.f32 %v1208_v26, %v7200_v56  ;;  %v4506_v29 = vadd.f32 %v1209_v36, %v7202_v58  ;;  %v4509_v8 = vadd.f32 %v1210_v16, %v7204_v55  ;;  %v7214_v26 = vld [vmem:[#allocation68_spill] sm:$0xff]  ;;  %v7216_v36 = vld [vmem:[#allocation69_spill] sm:$0xff] }
 0x12b   :  { %7199 = vst [vmem:[#allocation84_spill] sm:$0xff] %v4500_v45  ;;  %v4512_v18 = vadd.f32 %v1211_v25, %v7206_v61  ;;  %v4515_v62 = vadd.f32 %v1212_v48, %v7208_v17  ;;  %v4518_v30 = vadd.f32 %v1213_v42, %v7210_v27  ;;  %v4521_v47 = vadd.f32 %v1214_v50, %v7212_v23  ;;  %v7218_v16 = vld [vmem:[#allocation70_spill] sm:$0xff]  ;;  %v7220_v25 = vld [vmem:[#allocation71_spill] sm:$0xff]  ;;  %v7222_v48 = vld [vmem:[#allocation72_spill] sm:$0xff] }
 0x12c   :  { %7201 = vst [vmem:[#allocation85_spill] sm:$0xff] %v4503_v3  ;;  %7203 = vst [vmem:[#allocation125_spill] sm:$0xff] %v4506_v29  ;;  %v4524_v63 = vadd.f32 %v1215_v7, %v7214_v26  ;;  %v4527_v38 = vadd.f32 %v1216_v0, %v7216_v36  ;;  %v4530_v54 = vadd.f32 %v1217_v11, %v7218_v16  ;;  %v7224_v42 = vld [vmem:[#allocation73_spill] sm:$0xff]  ;;  %v7226_v50 = vld [vmem:[#allocation74_spill] sm:$0xff] }
 0x12d   :  { %7205 = vst [vmem:[#allocation123_spill] sm:$0xff] %v4509_v8  ;;  %7207 = vst [vmem:[#allocation124_spill] sm:$0xff] %v4512_v18  ;;  %v4533_v10 = vadd.f32 %v1218_v5, %v7220_v25  ;;  %v4536_v59 = vadd.f32 %v1219_v28, %v7222_v48  ;;  %v4539_v9 = vadd.f32 %v1220_v53, %v7224_v42  ;;  %v7228_v7 = vld [vmem:[#allocation75_spill] sm:$0xff]  ;;  %v7230_v0 = vld [vmem:[#allocation76_spill] sm:$0xff] }
 0x12e   :  { %7209 = vst [vmem:[#allocation10_spill] sm:$0xff] %v4515_v62  ;;  %7211 = vst [vmem:[#allocation120_spill] sm:$0xff] %v4518_v30  ;;  %v4542_v32 = vadd.f32 %v1221_v35, %v7226_v50  ;;  %v4545_v43 = vadd.f32 %v1222_v21, %v7228_v7  ;;  %v4548_v15 = vadd.f32 %v1223_v14, %v7230_v0  ;;  %v7232_v11 = vld [vmem:[#allocation77_spill] sm:$0xff]  ;;  %v7234_v5 = vld [vmem:[#allocation78_spill] sm:$0xff] }
 0x12f   :  { %7213 = vst [vmem:[#allocation121_spill] sm:$0xff] %v4521_v47  ;;  %7215 = vst [vmem:[#allocation122_spill] sm:$0xff] %v4524_v63  ;;  %v4551_v22 = vadd.f32 %v1224_v4, %v7232_v11  ;;  %v4554_v13 = vadd.f32 %v1225_v40, %v7234_v5  ;;  %v7236_v28 = vld [vmem:[#allocation79_spill] sm:$0xff]  ;;  %v7238_v53 = vld [vmem:[#allocation80_spill] sm:$0xff] }
 0x130   :  { %7217 = vst [vmem:[#allocation97_spill] sm:$0xff] %v4527_v38  ;;  %7219 = vst [vmem:[#allocation98_spill] sm:$0xff] %v4530_v54  ;;  %v4557_v39 = vadd.f32 %v1226_v60, %v7236_v28  ;;  %v4560_v46 = vadd.f32 %v1227_v52, %v7238_v53  ;;  %v7240_v35 = vld [vmem:[#allocation65_spill] sm:$0xff]  ;;  %v7244_v14 = vld [vmem:[#allocation66_spill] sm:$0xff] }
 0x131   :  { %7221 = vst [vmem:[#allocation93_spill] sm:$0xff] %v4533_v10  ;;  %7223 = vst [vmem:[#allocation94_spill] sm:$0xff] %v4536_v59  ;;  %v4563_v2 = vadd.f32 %v1228_v37, %v7240_v35  ;;  %v7242_v21 = vld [vmem:[#allocation81_spill] sm:$0xff]  ;;  %v4569_v33 = vadd.f32 %v1230_v12, %v7244_v14  ;;  %v7246_v4 = vld [vmem:[#allocation111_spill] sm:$0xff] }
 0x132   :  { %7225 = vst [vmem:[#allocation95_spill] sm:$0xff] %v4539_v9  ;;  %7227 = vst [vmem:[#allocation96_spill] sm:$0xff] %v4542_v32  ;;  %v4566_v6 = vadd.f32 %v1229_v20, %v7242_v21  ;;  %v7247_v1 = vld [vmem:[#allocation17_spill] sm:$0xff]  ;;  %v7248_v40 = vld [vmem:[#allocation92_spill] sm:$0xff] }
 0x133   :  { %7229 = vst [vmem:[#allocation68_spill] sm:$0xff] %v4545_v43  ;;  %7231 = vst [vmem:[#allocation69_spill] sm:$0xff] %v4548_v15  ;;  %v1268_v41 = vsub.f32 %v7247_v1, %v7246_v4  ;;  %v7249_v57 = vld [vmem:[#allocation18_spill] sm:$0xff]  ;;  %v7250_v60 = vld [vmem:[#allocation112_spill] sm:$0xff] }
 0x134   :  { %7233 = vst [vmem:[#allocation70_spill] sm:$0xff] %v4551_v22  ;;  %7235 = vst [vmem:[#allocation71_spill] sm:$0xff] %v4554_v13  ;;  %v1269_v24 = vsub.f32 %v7249_v57, %v7248_v40  ;;  %v7251_v49 = vld [vmem:[#allocation19_spill] sm:$0xff]  ;;  %v7253_v56 = vld [vmem:[#allocation20_spill] sm:$0xff] }
 0x135   :  { %7237 = vst [vmem:[#allocation72_spill] sm:$0xff] %v4557_v39  ;;  %7239 = vst [vmem:[#allocation73_spill] sm:$0xff] %v4560_v46  ;;  %v1270_v31 = vsub.f32 %v7251_v49, %v7250_v60  ;;  %v7252_v52 = vld [vmem:[#allocation99_spill] sm:$0xff]  ;;  %v7254_v37 = vld [vmem:[#allocation113_spill] sm:$0xff] }
 0x136   :  { %7241 = vst [vmem:[#allocation74_spill] sm:$0xff] %v4563_v2  ;;  %7243 = vst [vmem:[#allocation75_spill] sm:$0xff] %v4566_v6  ;;  %v1271_v58 = vsub.f32 %v7253_v56, %v7252_v52  ;;  %v7255_v55 = vld [vmem:[#allocation21_spill] sm:$0xff]  ;;  %v7256_v20 = vld [vmem:[#allocation100_spill] sm:$0xff] }
 0x137   :  { %7245 = vst [vmem:[#allocation76_spill] sm:$0xff] %v4569_v33  ;;  %v1272_v61 = vsub.f32 %v7255_v55, %v7254_v37  ;;  %v7257_v17 = vld [vmem:[#allocation22_spill] sm:$0xff]  ;;  %v7259_v23 = vld [vmem:[#allocation24_spill] sm:$0xff]  ;;  %v7260_v36 = vld [vmem:[#allocation101_spill] sm:$0xff]  ;;  %v4662_v59 = vand.u32 2147483647, %v1270_v31 }
 0x138   :  { %v1273_v27 = vsub.f32 %v7257_v17, %v7256_v20  ;;  %v7258_v12 = vld [vmem:[#allocation114_spill] sm:$0xff]  ;;  %v7261_v16 = vld [vmem:[#allocation25_spill] sm:$0xff]  ;;  %v7262_v48 = vld [vmem:[#allocation115_spill] sm:$0xff] }
 0x139   :  { %v1274_v26 = vsub.f32 %v7259_v23, %v7258_v12  ;;  %v1275_v25 = vsub.f32 %v7261_v16, %v7260_v36  ;;  %v7263_v42 = vld [vmem:[#allocation26_spill] sm:$0xff]  ;;  %v7265_v0 = vld [vmem:[#allocation28_spill] sm:$0xff]  ;;  %v7267_v28 = vld [vmem:[#allocation29_spill] sm:$0xff] }
 0x13a   :  { %v1276_v50 = vsub.f32 %v7263_v42, %v7262_v48  ;;  %v7264_v7 = vld [vmem:[#allocation102_spill] sm:$0xff]  ;;  %v7266_v5 = vld [vmem:[#allocation116_spill] sm:$0xff]  ;;  %v7268_v35 = vld [vmem:[#allocation103_spill] sm:$0xff] }
 0x13b   :  { %v1277_v11 = vsub.f32 %v7265_v0, %v7264_v7  ;;  %v1278_v53 = vsub.f32 %v7267_v28, %v7266_v5  ;;  %v7269_v21 = vld [vmem:[#allocation30_spill] sm:$0xff]  ;;  %v7270_v37 = vld [vmem:[#allocation117_spill] sm:$0xff]  ;;  %v7271_v20 = vld [vmem:[#allocation31_spill] sm:$0xff]  ;;  %v4676_v10 = vand.u32 2147483647, %v1275_v25 }
 0x13c   :  { %v1279_v14 = vsub.f32 %v7269_v21, %v7268_v35  ;;  %v1280_v52 = vsub.f32 %v7271_v20, %v7270_v37  ;;  %v7272_v60 = vld [vmem:[#allocation104_spill] sm:$0xff]  ;;  %v7274_v4 = vld [vmem:[#allocation118_spill] sm:$0xff]  ;;  %v7275_v36 = vld [vmem:[#allocation33_spill] sm:$0xff] }
 0x13d   :  { %v7273_v12 = vld [vmem:[#allocation32_spill] sm:$0xff]  ;;  %v1282_v16 = vsub.f32 %v7275_v36, %v7274_v4  ;;  %v7276_v23 = vld [vmem:[#allocation107_spill] sm:$0xff]  ;;  %v7277_v48 = vld [vmem:[#allocation34_spill] sm:$0xff]  ;;  %v4680_v31 = vand.u32 2147483647, %v1277_v11 }
 0x13e   :  { %v1281_v40 = vsub.f32 %v7273_v12, %v7272_v60  ;;  %v1283_v42 = vsub.f32 %v7277_v48, %v7276_v23  ;;  %v7278_v17 = vld [vmem:[#allocation119_spill] sm:$0xff]  ;;  %v7280_v55 = vld [vmem:[#allocation110_spill] sm:$0xff]  ;;  %v7281_v5 = vld [vmem:[#allocation36_spill] sm:$0xff] }
 0x13f   :  { %v7279_v7 = vld [vmem:[#allocation35_spill] sm:$0xff]  ;;  %v1285_v28 = vsub.f32 %v7281_v5, %v7280_v55  ;;  %v7282_v56 = vld [vmem:[#allocation5_spill] sm:$0xff]  ;;  %v7287_v12 = vld [vmem:[#allocation6_spill] sm:$0xff]  ;;  %7317 = vst [vmem:[#allocation79_spill] sm:$0xff] %v4680_v31  ;;  %v4694_v25 = vand.u32 2147483647, %v1282_v16 }
 0x140   :  { %v1284_v0 = vsub.f32 %v7279_v7, %v7278_v17  ;;  %v7283_v35 = vld [vmem:[#allocation87_spill] sm:$0xff]  ;;  %v7286_v20 = vld [vmem:[#allocation37_spill] sm:$0xff]  ;;  %v7290_v23 = vld [vmem:[#allocation8_spill] sm:$0xff]  ;;  %v4692_v13 = vand.u32 2147483647, %v1281_v40 }
 0x141   :  { %v7284_v21 = vsub.f32 %v7282_v56, %v7283_v35  ;;  %v7285_v37 = vld [vmem:[#allocation7_spill] sm:$0xff]  ;;  %v7288_v33 = vld [vmem:[#allocation105_spill] sm:$0xff]  ;;  %v7291_v48 = vld [vmem:[#allocation88_spill] sm:$0xff]  ;;  %7320 = vst [vmem:[#allocation80_spill] sm:$0xff] %v4694_v25 }
 0x142   :  { %v1286_v60 = vsub.f32 %v7286_v20, %v7285_v37  ;;  %v7289_v4 = vsub.f32 %v7287_v12, %v7288_v33  ;;  %v7292_v6 = vsub.f32 %v7290_v23, %v7291_v48  ;;  %v7293_v7 = vld [vmem:[#allocation9_spill] sm:$0xff]  ;;  %v7294_v55 = vld [vmem:[#allocation106_spill] sm:$0xff]  ;;  %v7300_v20 = vld [vmem:[#allocation108_spill] sm:$0xff]  ;;  %v4670_v23 = vand.u32 2147483647, %v1273_v27 }
 0x143   :  { %v4610_v49 = vand.u32 2147483647, %v7284_v21  ;;  %v7295_v5 = vsub.f32 %v7293_v7, %v7294_v55  ;;  %v7296_v21 = vld [vmem:[#allocation11_spill] sm:$0xff]  ;;  %v7297_v35 = vld [vmem:[#allocation89_spill] sm:$0xff]  ;;  %v7302_v12 = vld [vmem:[#allocation14_spill] sm:$0xff] }
 0x144   :  { %v4617_v36 = vand.u32 2147483647, %v7289_v4  ;;  %v4622_v17 = vand.u32 2147483647, %v7292_v6  ;;  %v7298_v56 = vsub.f32 %v7296_v21, %v7297_v35  ;;  %v7299_v37 = vld [vmem:[#allocation13_spill] sm:$0xff]  ;;  %v7303_v39 = vld [vmem:[#allocation90_spill] sm:$0xff] }
 0x145   :  { %v4627_v2 = vand.u32 2147483647, %v7295_v5  ;;  %v7301_v33 = vsub.f32 %v7299_v37, %v7300_v20  ;;  %v7304_v48 = vsub.f32 %v7302_v12, %v7303_v39  ;;  %v7306_v5 = vld [vmem:[#allocation15_spill] sm:$0xff]  ;;  %v7307_v22 = vld [vmem:[#allocation109_spill] sm:$0xff]  ;;  %v4664_v55 = vand.u32 2147483647, %v1271_v58 }
 0x146   :  { %v4632_v46 = vand.u32 2147483647, %v7298_v56  ;;  %v7308_v15 = vsub.f32 %v7306_v5, %v7307_v22  ;;  %v7309_v56 = vld [vmem:[#allocation16_spill] sm:$0xff]  ;;  %v7310_v35 = vld [vmem:[#allocation91_spill] sm:$0xff]  ;;  %v4668_v22 = vand.u32 2147483647, %v1272_v61 }
 0x147   :  { %v4637_v4 = vand.u32 2147483647, %v7301_v33  ;;  %v4642_v6 = vand.u32 2147483647, %v7304_v48  ;;  %v7311_v32 = vsub.f32 %v7309_v56, %v7310_v35  ;;  %v4656_v33 = vand.u32 2147483647, %v1268_v41 }
 0x148   :  { %v4649_v43 = vand.u32 2147483647, %v7308_v15  ;;  %v4660_v48 = vand.u32 2147483647, %v1269_v24  ;;  %7314 = vst [vmem:[#allocation77_spill] sm:$0xff] %v4668_v22  ;;  %v7326_v39 = vmin.f32 %v4610_v49, 1.0 }
 0x149   :  { %v4654_v9 = vand.u32 2147483647, %v7311_v32  ;;  %v4672_v32 = vand.u32 2147483647, %v1274_v26  ;;  %v4678_v24 = vand.u32 2147483647, %v1276_v50 }
 0x14a   :  { %v4684_v20 = vand.u32 2147483647, %v1278_v53  ;;  %v4686_v61 = vand.u32 2147483647, %v1279_v14  ;;  %v4688_v27 = vand.u32 2147483647, %v1280_v52 }
 0x14b   :  { %7315 = vst [vmem:[#allocation78_spill] sm:$0xff] %v4672_v32  ;;  %v4696_v50 = vand.u32 2147483647, %v1283_v42  ;;  %v4700_v41 = vand.u32 2147483647, %v1284_v0  ;;  %v1343_v42 = vmul.f32 0.5, %v7326_v39 }
 0x14c   :  { %v4702_v53 = vand.u32 2147483647, %v1285_v28  ;;  %v4704_v14 = vand.u32 2147483647, %v1286_v60  ;;  %v7327_v15 = vmin.f32 %v4617_v36, 1.0  ;;  %v7328_v16 = vmin.f32 %v4622_v17, 1.0 }
 0x14d   :  { %7321 = vst [vmem:[#allocation65_spill] sm:$0xff] %v4696_v50  ;;  %v7329_v26 = vmin.f32 %v4627_v2, 1.0  ;;  %v7330_v0 = vmin.f32 %v4632_v46, 1.0  ;;  %v7331_v28 = vmin.f32 %v4637_v4, 1.0  ;;  %v7332_v11 = vmin.f32 %v4642_v6, 1.0 }
 0x14e   :  { %7323 = vst [vmem:[#allocation81_spill] sm:$0xff] %v4702_v53  ;;  %v1344_v40 = vmul.f32 0.5, %v7327_v15  ;;  %v1345_v57 = vmul.f32 0.5, %v7328_v16  ;;  %v7333_v39 = vmin.f32 %v4649_v43, 1.0  ;;  %v7334_v15 = vmin.f32 %v4654_v9, 1.0 }
 0x14f   :  { %v1346_v35 = vmul.f32 0.5, %v7329_v26  ;;  %v1347_v52 = vmul.f32 0.5, %v7330_v0  ;;  %v1348_v60 = vmul.f32 0.5, %v7331_v28  ;;  %v1349_v1 = vmul.f32 0.5, %v7332_v11 }
 0x150   :  { %v1350_v56 = vmul.f32 0.5, %v7333_v39  ;;  %v1351_v5 = vmul.f32 0.5, %v7334_v15  ;;  %v7335_v16 = vmin.f32 %v4656_v33, 1.0  ;;  %v7336_v26 = vmin.f32 %v4660_v48, 1.0 }
 0x151   :  { %v7337_v0 = vmin.f32 %v4662_v59, 1.0  ;;  %v7338_v28 = vmin.f32 %v4664_v55, 1.0  ;;  %v7339_v11 = vmin.f32 %v4668_v22, 1.0  ;;  %v7340_v39 = vmin.f32 %v4670_v23, 1.0 }
 0x152   :  { %v1352_v58 = vmul.f32 0.5, %v7335_v16  ;;  %v1353_v12 = vmul.f32 0.5, %v7336_v26  ;;  %v7341_v15 = vmin.f32 %v4672_v32, 1.0  ;;  %v7342_v16 = vmin.f32 %v4676_v10, 1.0 }
 0x153   :  { %v1354_v37 = vmul.f32 0.5, %v7337_v0  ;;  %v1355_v21 = vmul.f32 0.5, %v7338_v28  ;;  %v1356_v7 = vmul.f32 0.5, %v7339_v11  ;;  %v1357_v54 = vmul.f32 0.5, %v7340_v39 }
 0x154   :  { %v1358_v38 = vmul.f32 0.5, %v7341_v15  ;;  %v1359_v63 = vmul.f32 0.5, %v7342_v16  ;;  %v7343_v26 = vmin.f32 %v4678_v24, 1.0  ;;  %v7344_v0 = vmin.f32 %v4680_v31, 1.0 }
 0x155   :  { %v7345_v28 = vmin.f32 %v4684_v20, 1.0  ;;  %v7346_v11 = vmin.f32 %v4686_v61, 1.0  ;;  %v7347_v39 = vmin.f32 %v4688_v27, 1.0  ;;  %v7348_v15 = vmin.f32 %v4692_v13, 1.0 }
 0x156   :  { %v1360_v47 = vmul.f32 0.5, %v7343_v26  ;;  %v1361_v30 = vmul.f32 0.5, %v7344_v0  ;;  %v7349_v16 = vmin.f32 %v4694_v25, 1.0  ;;  %v7350_v26 = vmin.f32 %v4696_v50, 1.0 }
 0x157   :  { %v1362_v62 = vmul.f32 0.5, %v7345_v28  ;;  %v1363_v18 = vmul.f32 0.5, %v7346_v11  ;;  %v1364_v8 = vmul.f32 0.5, %v7347_v39  ;;  %v1365_v29 = vmul.f32 0.5, %v7348_v15 }
 0x158   :  { %v1366_v3 = vmul.f32 0.5, %v7349_v16  ;;  %v1367_v45 = vmul.f32 0.5, %v7350_v26  ;;  %v7351_v0 = vmin.f32 %v4700_v41, 1.0  ;;  %v7352_v28 = vmin.f32 %v4702_v53, 1.0 }
 0x159   :  { %v7353_v11 = vmin.f32 %v4704_v14, 1.0  ;;  %v1371_v39 = vsub.f32 %v4610_v49, %v1343_v42  ;;  %v1372_v44 = vsub.f32 %v4617_v36, %v1344_v40  ;;  %v1373_v15 = vsub.f32 %v4622_v17, %v1345_v57 }
 0x15a   :  { %v1368_v51 = vmul.f32 0.5, %v7351_v0  ;;  %v1369_v34 = vmul.f32 0.5, %v7352_v28  ;;  %v1374_v16 = vsub.f32 %v4627_v2, %v1346_v35  ;;  %v1375_v50 = vsub.f32 %v4632_v46, %v1347_v52 }
 0x15b   :  { %v1370_v19 = vmul.f32 0.5, %v7353_v11  ;;  %v1376_v26 = vsub.f32 %v4637_v4, %v1348_v60  ;;  %v1377_v0 = vsub.f32 %v4642_v6, %v1349_v1  ;;  %v1378_v53 = vsub.f32 %v4649_v43, %v1350_v56 }
 0x15c   :  { %v1379_v28 = vsub.f32 %v4654_v9, %v1351_v5  ;;  %v1380_v11 = vsub.f32 %v4656_v33, %v1352_v58  ;;  %v1381_v42 = vsub.f32 %v4660_v48, %v1353_v12  ;;  %v1382_v40 = vsub.f32 %v4662_v59, %v1354_v37 }
 0x15d   :  { %v1383_v57 = vsub.f32 %v4664_v55, %v1355_v21  ;;  %v1384_v35 = vsub.f32 %v4668_v22, %v1356_v7  ;;  %v1385_v52 = vsub.f32 %v4670_v23, %v1357_v54  ;;  %v1386_v60 = vsub.f32 %v4672_v32, %v1358_v38  ;;  %v7354_v22 = vld [vmem:[#allocation65_spill] sm:$0xff] }
 0x15e   :  { %v1387_v1 = vsub.f32 %v4676_v10, %v1359_v63  ;;  %v1388_v56 = vsub.f32 %v4678_v24, %v1360_v47  ;;  %v1389_v5 = vsub.f32 %v4680_v31, %v1361_v30  ;;  %v1390_v58 = vsub.f32 %v4684_v20, %v1362_v62  ;;  %v7355_v32 = vld [vmem:[#allocation81_spill] sm:$0xff] }
 0x15f   :  { %v1391_v12 = vsub.f32 %v4686_v61, %v1363_v18  ;;  %v1392_v37 = vsub.f32 %v4688_v27, %v1364_v8  ;;  %v1393_v21 = vsub.f32 %v4692_v13, %v1365_v29  ;;  %v1394_v7 = vsub.f32 %v4694_v25, %v1366_v3 }
 0x160   :  { %v1395_v54 = vsub.f32 %v7354_v22, %v1367_v45  ;;  %v1396_v38 = vsub.f32 %v4700_v41, %v1368_v51  ;;  %v1397_v63 = vsub.f32 %v7355_v32, %v1369_v34  ;;  %v1398_v47 = vsub.f32 %v4704_v14, %v1370_v19 }
 0x161   :  { %v7356_v30 = vmin.f32 %v4610_v49, 1.0  ;;  %v7357_v62 = vmin.f32 %v4617_v36, 1.0  ;;  %v7358_v8 = vmin.f32 %v4622_v17, 1.0  ;;  %v7359_v3 = vmin.f32 %v4627_v2, 1.0 }
 0x162   :  { %v7360_v51 = vmin.f32 %v4632_v46, 1.0  ;;  %v7361_v34 = vmin.f32 %v4637_v4, 1.0  ;;  %v7362_v49 = vmin.f32 %v4642_v6, 1.0  ;;  %v7364_v17 = vmin.f32 %v4654_v9, 1.0 }
 0x163   :  { %v1399_v31 = vmul.f32 %v1371_v39, %v7356_v30  ;;  %v4826_v18 = vmul.f32 %v1372_v44, %v7357_v62  ;;  %v1401_v29 = vmul.f32 %v1373_v15, %v7358_v8  ;;  %v4832_v25 = vmul.f32 %v1374_v16, %v7359_v3 }
 0x164   :  { %v1403_v45 = vmul.f32 %v1375_v50, %v7360_v51  ;;  %v4838_v19 = vmul.f32 %v1376_v26, %v7361_v34  ;;  %v1405_v39 = vmul.f32 %v1377_v0, %v7362_v49  ;;  %v7363_v44 = vmin.f32 %v4649_v43, 1.0  ;;  %v7369_v43 = vld [vmem:[#allocation77_spill] sm:$0xff]  ;;  %v7382_v34 = vld [vmem:[#allocation80_spill] sm:$0xff] }
 0x165   :  { %v1407_v15 = vmul.f32 %v1379_v28, %v7364_v17  ;;  %v7365_v2 = vmin.f32 %v4656_v33, 1.0  ;;  %v7366_v46 = vmin.f32 %v4660_v48, 1.0  ;;  %v7367_v4 = vmin.f32 %v4662_v59, 1.0  ;;  %v7372_v33 = vld [vmem:[#allocation78_spill] sm:$0xff] }
 0x166   :  { %v4844_v36 = vmul.f32 %v1378_v53, %v7363_v44  ;;  %v7368_v6 = vmin.f32 %v4664_v55, 1.0  ;;  %v7370_v53 = vmin.f32 %v7369_v43, 1.0  ;;  %v7371_v9 = vmin.f32 %v4670_v23, 1.0  ;;  %v7376_v55 = vld [vmem:[#allocation79_spill] sm:$0xff] }
 0x167   :  { %v4850_v16 = vmul.f32 %v1380_v11, %v7365_v2  ;;  %v1409_v50 = vmul.f32 %v1381_v42, %v7366_v46  ;;  %v4856_v26 = vmul.f32 %v1382_v40, %v7367_v4  ;;  %v7373_v11 = vmin.f32 %v7372_v33, 1.0 }
 0x168   :  { %v1411_v0 = vmul.f32 %v1383_v57, %v7368_v6  ;;  %v4862_v30 = vmul.f32 %v1384_v35, %v7370_v53  ;;  %v1413_v28 = vmul.f32 %v1385_v52, %v7371_v9  ;;  %v7374_v48 = vmin.f32 %v4676_v10, 1.0 }
 0x169   :  { %v4868_v62 = vmul.f32 %v1386_v60, %v7373_v11  ;;  %v7375_v59 = vmin.f32 %v4678_v24, 1.0  ;;  %v7377_v57 = vmin.f32 %v7376_v55, 1.0  ;;  %v7378_v35 = vmin.f32 %v4684_v20, 1.0 }
 0x16a   :  { %v1415_v42 = vmul.f32 %v1387_v1, %v7374_v48  ;;  %v7379_v23 = vmin.f32 %v4686_v61, 1.0  ;;  %v1455_v51 = vrot.slane %v1399_v31, 2  ;;  %v1456_v60 = vrot.slane %v4826_v18, 2 }
 0x16b   :  { %v4874_v40 = vmul.f32 %v1388_v56, %v7375_v59  ;;  %v1417_v8 = vmul.f32 %v1389_v5, %v7377_v57  ;;  %v4880_v3 = vmul.f32 %v1390_v58, %v7378_v35  ;;  %v7380_v10 = vmin.f32 %v4688_v27, 1.0  ;;  %v7390_v57 = vld [vmem:[#allocation82_spill] sm:$0xff] }
 0x16c   :  { %v1419_v52 = vmul.f32 %v1391_v12, %v7379_v23  ;;  %v7381_v24 = vmin.f32 %v4692_v13, 1.0  ;;  %v7383_v49 = vmin.f32 %v7382_v34, 1.0  ;;  %v7384_v20 = vmin.f32 %v7354_v22, 1.0  ;;  %v7400_v34 = vld [vmem:[#allocation125_spill] sm:$0xff] }
 0x16d   :  { %v4887_v1 = vmul.f32 %v1392_v37, %v7380_v10  ;;  %v7385_v61 = vmin.f32 %v4700_v41, 1.0  ;;  %v7386_v31 = vmin.f32 %v7355_v32, 1.0  ;;  %v7387_v27 = vmin.f32 %v4704_v14, 1.0  ;;  %v7396_v10 = vld [vmem:[#allocation84_spill] sm:$0xff] }
 0x16e   :  { %v1421_v56 = vmul.f32 %v1393_v21, %v7381_v24  ;;  %v4893_v5 = vmul.f32 %v1394_v7, %v7383_v49  ;;  %v1423_v58 = vmul.f32 %v1395_v54, %v7384_v20  ;;  %v1458_v13 = vrot.slane %v1401_v29, 2  ;;  %v7398_v24 = vld [vmem:[#allocation85_spill] sm:$0xff]  ;;  %v7404_v20 = vld [vmem:[#allocation124_spill] sm:$0xff] }
 0x16f   :  { %v4899_v12 = vmul.f32 %v1396_v38, %v7385_v61  ;;  %v1425_v18 = vmul.f32 %v1397_v63, %v7386_v31  ;;  %v4905_v37 = vmul.f32 %v1398_v47, %v7387_v27  ;;  %v1459_v21 = vrot.slane %v4832_v25, 2  ;;  %v7406_v61 = vld [vmem:[#allocation10_spill] sm:$0xff]  ;;  %v7408_v31 = vld [vmem:[#allocation120_spill] sm:$0xff]  ;;  %v7410_v27 = vld [vmem:[#allocation121_spill] sm:$0xff] }
 0x170   :  { %v1461_v44 = vrot.slane %v1403_v45, 2  ;;  %v1462_v7 = vrot.slane %v4838_v19, 2  ;;  %v1464_v17 = vrot.slane %v1405_v39, 2  ;;  %v1457_v22 = vsel %vm964_vm2, %v1455_v51, %v1456_v60 }
 0x171   :  { %v1465_v41 = vrot.slane %v4844_v36, 2  ;;  %v1467_v54 = vrot.slane %v1407_v15, 2  ;;  %v1468_v38 = vrot.slane %v4850_v16, 2  ;;  %v1470_v32 = vrot.slane %v1409_v50, 2 }
 0x172   :  { %v1471_v63 = vrot.slane %v4856_v26, 2  ;;  %v1473_v14 = vrot.slane %v1411_v0, 2  ;;  %v1474_v47 = vrot.slane %v4862_v30, 2  ;;  %v1476_v29 = vrot.slane %v1413_v28, 2 }
 0x173   :  { %v1477_v25 = vrot.slane %v4868_v62, 2  ;;  %v1479_v45 = vrot.slane %v1415_v42, 2  ;;  %v1480_v19 = vrot.slane %v4874_v40, 2  ;;  %v1482_v39 = vrot.slane %v1417_v8, 2  ;;  %v7388_v40 = vld [vmem:[#allocation86_spill] sm:$0xff] }
 0x174   :  { %v1483_v2 = vrot.slane %v4880_v3, 2  ;;  %v1485_v46 = vrot.slane %v1419_v52, 2  ;;  %v1486_v36 = vrot.slane %v4887_v1, 2  ;;  %v1488_v15 = vrot.slane %v1421_v56, 2  ;;  %v7392_v3 = vld [vmem:[#allocation83_spill] sm:$0xff] }
 0x175   :  { %v1489_v16 = vrot.slane %v4893_v5, 2  ;;  %v1491_v50 = vrot.slane %v1423_v58, 2  ;;  %v1492_v4 = vrot.slane %v4899_v12, 2  ;;  %v1460_v26 = vsel %vm964_vm2, %v1458_v13, %v1459_v21  ;;  %v7394_v52 = vld [vmem:[#allocation67_spill] sm:$0xff]  ;;  %v7412_v13 = vld [vmem:[#allocation122_spill] sm:$0xff] }
 0x176   :  { %v1463_v6 = vsel %vm964_vm2, %v1461_v44, %v1462_v7  ;;  %v1494_v0 = vrot.slane %v1425_v18, 2  ;;  %v1495_v43 = vrot.slane %v4905_v37, 2  ;;  %v1466_v53 = vsel %vm964_vm2, %v1464_v17, %v1465_v41  ;;  %v7402_v5 = vld [vmem:[#allocation123_spill] sm:$0xff]  ;;  %v7414_v44 = vld [vmem:[#allocation97_spill] sm:$0xff]  ;;  %v7416_v17 = vld [vmem:[#allocation98_spill] sm:$0xff] }
 0x177   :  { %v1469_v30 = vsel %vm964_vm2, %v1467_v54, %v1468_v38  ;;  %v1472_v9 = vsel %vm964_vm2, %v1470_v32, %v1471_v63  ;;  %v1475_v28 = vsel %vm964_vm2, %v1473_v14, %v1474_v47  ;;  %v1478_v33 = vsel %vm964_vm2, %v1476_v29, %v1477_v25  ;;  %v7422_v14 = vld [vmem:[#allocation95_spill] sm:$0xff] }
 0x178   :  { %v1481_v11 = vsel %vm964_vm2, %v1479_v45, %v1480_v19  ;;  %v1484_v62 = vsel %vm964_vm2, %v1482_v39, %v1483_v2  ;;  %v1487_v48 = vsel %vm964_vm2, %v1485_v46, %v1486_v36  ;;  %v1490_v42 = vsel %vm964_vm2, %v1488_v15, %v1489_v16  ;;  %v7426_v39 = vld [vmem:[#allocation68_spill] sm:$0xff] }
 0x179   :  { %v1493_v59 = vsel %vm964_vm2, %v1491_v50, %v1492_v4  ;;  %v4934_v55 = vadd.f32 %v1457_v22, %v7388_v40  ;;  %v4937_v8 = vadd.f32 %v1456_v60, %v7390_v57  ;;  %v1496_v35 = vsel %vm964_vm2, %v1494_v0, %v1495_v43  ;;  %v7430_v50 = vld [vmem:[#allocation70_spill] sm:$0xff]  ;;  %v7434_v0 = vld [vmem:[#allocation72_spill] sm:$0xff] }
 0x17a   :  { %v4941_v23 = vadd.f32 %v1460_v26, %v7392_v3  ;;  %v4944_v51 = vadd.f32 %v1459_v21, %v7394_v52  ;;  %v4947_v1 = vadd.f32 %v1463_v6, %v7396_v10  ;;  %v4950_v56 = vadd.f32 %v1462_v7, %v7398_v24  ;;  %v7447_v57 = vld [vmem:[#allocation20_spill] sm:$0xff]  ;;  %v7449_v52 = vld [vmem:[#allocation21_spill] sm:$0xff]  ;;  %v7451_v24 = vld [vmem:[#allocation22_spill] sm:$0xff] }
 0x17b   :  { %7389 = vst [vmem:[#allocation66_spill] sm:$0xff] %v4934_v55  ;;  %7391 = vst [vmem:[#allocation65_spill] sm:$0xff] %v4937_v8  ;;  %v4953_v49 = vadd.f32 %v1466_v53, %v7400_v34  ;;  %v4956_v60 = vadd.f32 %v1465_v41, %v7402_v5  ;;  %v4959_v58 = vadd.f32 %v1469_v30, %v7404_v20  ;;  %v7418_v41 = vld [vmem:[#allocation93_spill] sm:$0xff]  ;;  %v7453_v5 = vld [vmem:[#allocation24_spill] sm:$0xff] }
 0x17c   :  { %7393 = vst [vmem:[#allocation81_spill] sm:$0xff] %v4941_v23  ;;  %7395 = vst [vmem:[#allocation77_spill] sm:$0xff] %v4944_v51  ;;  %v4962_v12 = vadd.f32 %v1468_v38, %v7406_v61  ;;  %v4965_v18 = vadd.f32 %v1472_v9, %v7408_v31  ;;  %v4968_v37 = vadd.f32 %v1471_v63, %v7410_v27  ;;  %v7420_v38 = vld [vmem:[#allocation94_spill] sm:$0xff]  ;;  %v7424_v63 = vld [vmem:[#allocation96_spill] sm:$0xff] }
 0x17d   :  { %7397 = vst [vmem:[#allocation78_spill] sm:$0xff] %v4947_v1  ;;  %7399 = vst [vmem:[#allocation79_spill] sm:$0xff] %v4950_v56  ;;  %v4971_v21 = vadd.f32 %v1475_v28, %v7412_v13  ;;  %v4974_v7 = vadd.f32 %v1474_v47, %v7414_v44  ;;  %v4977_v22 = vadd.f32 %v1478_v33, %v7416_v17  ;;  %v7428_v47 = vld [vmem:[#allocation69_spill] sm:$0xff]  ;;  %v7438_v9 = vld [vmem:[#allocation74_spill] sm:$0xff] }
 0x17e   :  { %7401 = vst [vmem:[#allocation80_spill] sm:$0xff] %v4953_v49  ;;  %7403 = vst [vmem:[#allocation86_spill] sm:$0xff] %v4956_v60  ;;  %v4980_v54 = vadd.f32 %v1477_v25, %v7418_v41  ;;  %v4983_v32 = vadd.f32 %v1481_v11, %v7420_v38  ;;  %v4986_v29 = vadd.f32 %v1480_v19, %v7422_v14  ;;  %v7432_v25 = vld [vmem:[#allocation71_spill] sm:$0xff]  ;;  %v7436_v19 = vld [vmem:[#allocation73_spill] sm:$0xff] }
 0x17f   :  { %7405 = vst [vmem:[#allocation82_spill] sm:$0xff] %v4959_v58  ;;  %7407 = vst [vmem:[#allocation83_spill] sm:$0xff] %v4962_v12  ;;  %v4989_v45 = vadd.f32 %v1484_v62, %v7424_v63  ;;  %v4992_v46 = vadd.f32 %v1483_v2, %v7426_v39  ;;  %v4995_v15 = vadd.f32 %v1487_v48, %v7428_v47  ;;  %v7440_v2 = vld [vmem:[#allocation75_spill] sm:$0xff]  ;;  %v7442_v11 = vld [vmem:[#allocation76_spill] sm:$0xff] }
 0x180   :  { %7409 = vst [vmem:[#allocation67_spill] sm:$0xff] %v4965_v18  ;;  %7411 = vst [vmem:[#allocation84_spill] sm:$0xff] %v4968_v37  ;;  %v4998_v26 = vadd.f32 %v1486_v36, %v7430_v50  ;;  %v5001_v6 = vadd.f32 %v1490_v42, %v7432_v25  ;;  %v5004_v53 = vadd.f32 %v1489_v16, %v7434_v0  ;;  %v7444_v36 = vld [vmem:[#allocation42_spill] sm:$0xff]  ;;  %v7445_v48 = vld [vmem:[#allocation19_spill] sm:$0xff] }
 0x181   :  { %7413 = vst [vmem:[#allocation85_spill] sm:$0xff] %v4971_v21  ;;  %7415 = vst [vmem:[#allocation125_spill] sm:$0xff] %v4974_v7  ;;  %v5007_v30 = vadd.f32 %v1493_v59, %v7436_v19  ;;  %v5010_v28 = vadd.f32 %v1492_v4, %v7438_v9  ;;  %v5013_v33 = vadd.f32 %v1496_v35, %v7440_v2  ;;  %v7446_v42 = vld [vmem:[#allocation56_spill] sm:$0xff]  ;;  %v7448_v16 = vld [vmem:[#allocation43_spill] sm:$0xff] }
 0x182   :  { %7417 = vst [vmem:[#allocation123_spill] sm:$0xff] %v4977_v22  ;;  %7419 = vst [vmem:[#allocation124_spill] sm:$0xff] %v4980_v54  ;;  %v5016_v62 = vadd.f32 %v1495_v43, %v7442_v11  ;;  %v1562_v40 = vsub.f32 %v7445_v48, %v7444_v36  ;;  %v1563_v3 = vsub.f32 %v7447_v57, %v7446_v42  ;;  %v7450_v59 = vld [vmem:[#allocation57_spill] sm:$0xff]  ;;  %v7452_v4 = vld [vmem:[#allocation44_spill] sm:$0xff] }
 0x183   :  { %7421 = vst [vmem:[#allocation10_spill] sm:$0xff] %v4983_v32  ;;  %7423 = vst [vmem:[#allocation120_spill] sm:$0xff] %v4986_v29  ;;  %v1564_v10 = vsub.f32 %v7449_v52, %v7448_v16  ;;  %v1565_v34 = vsub.f32 %v7451_v24, %v7450_v59  ;;  %v1566_v20 = vsub.f32 %v7453_v5, %v7452_v4  ;;  %v7454_v35 = vld [vmem:[#allocation58_spill] sm:$0xff]  ;;  %v7455_v61 = vld [vmem:[#allocation25_spill] sm:$0xff] }
 0x184   :  { %7425 = vst [vmem:[#allocation121_spill] sm:$0xff] %v4989_v45  ;;  %7427 = vst [vmem:[#allocation122_spill] sm:$0xff] %v4992_v46  ;;  %v1567_v31 = vsub.f32 %v7455_v61, %v7454_v35  ;;  %v7456_v43 = vld [vmem:[#allocation45_spill] sm:$0xff]  ;;  %v7457_v27 = vld [vmem:[#allocation26_spill] sm:$0xff]  ;;  %v5105_v29 = vand.u32 2147483647, %v1563_v3 }
 0x185   :  { %7429 = vst [vmem:[#allocation97_spill] sm:$0xff] %v4995_v15  ;;  %7431 = vst [vmem:[#allocation98_spill] sm:$0xff] %v4998_v26  ;;  %v1568_v13 = vsub.f32 %v7457_v27, %v7456_v43  ;;  %v7458_v44 = vld [vmem:[#allocation59_spill] sm:$0xff]  ;;  %v7459_v17 = vld [vmem:[#allocation28_spill] sm:$0xff] }
 0x186   :  { %7433 = vst [vmem:[#allocation93_spill] sm:$0xff] %v5001_v6  ;;  %7435 = vst [vmem:[#allocation94_spill] sm:$0xff] %v5004_v53  ;;  %v1569_v41 = vsub.f32 %v7459_v17, %v7458_v44  ;;  %v7460_v38 = vld [vmem:[#allocation46_spill] sm:$0xff]  ;;  %v7461_v14 = vld [vmem:[#allocation29_spill] sm:$0xff]  ;;  %v5115_v54 = vand.u32 2147483647, %v1567_v31 }
 0x187   :  { %7437 = vst [vmem:[#allocation95_spill] sm:$0xff] %v5007_v30  ;;  %7439 = vst [vmem:[#allocation96_spill] sm:$0xff] %v5010_v28  ;;  %v1570_v63 = vsub.f32 %v7461_v14, %v7460_v38  ;;  %v7462_v39 = vld [vmem:[#allocation60_spill] sm:$0xff]  ;;  %v7463_v47 = vld [vmem:[#allocation30_spill] sm:$0xff] }
 0x188   :  { %7441 = vst [vmem:[#allocation68_spill] sm:$0xff] %v5013_v33  ;;  %7443 = vst [vmem:[#allocation69_spill] sm:$0xff] %v5016_v62  ;;  %v1571_v50 = vsub.f32 %v7463_v47, %v7462_v39  ;;  %v7464_v25 = vld [vmem:[#allocation47_spill] sm:$0xff]  ;;  %v7466_v9 = vld [vmem:[#allocation61_spill] sm:$0xff] }
 0x189   :  { %v7465_v0 = vld [vmem:[#allocation31_spill] sm:$0xff]  ;;  %v7467_v2 = vld [vmem:[#allocation32_spill] sm:$0xff]  ;;  %v7469_v42 = vld [vmem:[#allocation33_spill] sm:$0xff]  ;;  %v5123_v3 = vand.u32 2147483647, %v1570_v63 }
 0x18a   :  { %v1572_v19 = vsub.f32 %v7465_v0, %v7464_v25  ;;  %v1573_v11 = vsub.f32 %v7467_v2, %v7466_v9  ;;  %v7468_v36 = vld [vmem:[#allocation48_spill] sm:$0xff]  ;;  %v7470_v59 = vld [vmem:[#allocation62_spill] sm:$0xff]  ;;  %v7472_v43 = vld [vmem:[#allocation49_spill] sm:$0xff] }
 0x18b   :  { %v1574_v16 = vsub.f32 %v7469_v42, %v7468_v36  ;;  %v7471_v4 = vld [vmem:[#allocation34_spill] sm:$0xff]  ;;  %v7473_v44 = vld [vmem:[#allocation35_spill] sm:$0xff]  ;;  %v7475_v38 = vld [vmem:[#allocation36_spill] sm:$0xff] }
 0x18c   :  { %v1575_v35 = vsub.f32 %v7471_v4, %v7470_v59  ;;  %v1576_v62 = vsub.f32 %v7473_v44, %v7472_v43  ;;  %v7474_v33 = vld [vmem:[#allocation63_spill] sm:$0xff]  ;;  %v7476_v14 = vld [vmem:[#allocation52_spill] sm:$0xff]  ;;  %v7477_v39 = vld [vmem:[#allocation37_spill] sm:$0xff] }
 0x18d   :  { %v1577_v28 = vsub.f32 %v7475_v38, %v7474_v33  ;;  %v1578_v47 = vsub.f32 %v7477_v39, %v7476_v14  ;;  %v7478_v17 = vld [vmem:[#allocation64_spill] sm:$0xff]  ;;  %v7479_v25 = vld [vmem:[#allocation39_spill] sm:$0xff]  ;;  %v7483_v36 = vld [vmem:[#allocation9_spill] sm:$0xff]  ;;  %v5135_v32 = vand.u32 2147483647, %v1574_v16 }
 0x18e   :  { %v1579_v0 = vsub.f32 %v7479_v25, %v7478_v17  ;;  %v7480_v27 = vld [vmem:[#allocation8_spill] sm:$0xff]  ;;  %v7481_v9 = vld [vmem:[#allocation27_spill] sm:$0xff]  ;;  %v7487_v44 = vld [vmem:[#allocation38_spill] sm:$0xff] }
 0x18f   :  { %v7482_v2 = vsub.f32 %v7480_v27, %v7481_v9  ;;  %v7484_v42 = vld [vmem:[#allocation12_spill] sm:$0xff]  ;;  %v7486_v43 = vld [vmem:[#allocation11_spill] sm:$0xff]  ;;  %v7490_v14 = vld [vmem:[#allocation50_spill] sm:$0xff]  ;;  %7514 = vst [vmem:[#allocation73_spill] sm:$0xff] %v5135_v32 }
 0x190   :  { %v7485_v59 = vsub.f32 %v7483_v36, %v7484_v42  ;;  %v7488_v5 = vsub.f32 %v7486_v43, %v7487_v44  ;;  %v7489_v38 = vld [vmem:[#allocation55_spill] sm:$0xff]  ;;  %v7491_v24 = vld [vmem:[#allocation13_spill] sm:$0xff]  ;;  %v7506_v15 = vld [vmem:[#allocation18_spill] sm:$0xff] }
 0x191   :  { %v5057_v61 = vand.u32 2147483647, %v7482_v2  ;;  %v1580_v39 = vsub.f32 %v7490_v14, %v7489_v38  ;;  %v7492_v17 = vld [vmem:[#allocation23_spill] sm:$0xff]  ;;  %v7494_v2 = vld [vmem:[#allocation14_spill] sm:$0xff]  ;;  %v7501_v44 = vld [vmem:[#allocation53_spill] sm:$0xff] }
 0x192   :  { %v5062_v4 = vand.u32 2147483647, %v7485_v59  ;;  %v5067_v33 = vand.u32 2147483647, %v7488_v5  ;;  %v7493_v25 = vsub.f32 %v7491_v24, %v7492_v17  ;;  %v7495_v9 = vld [vmem:[#allocation51_spill] sm:$0xff]  ;;  %v7498_v59 = vld [vmem:[#allocation40_spill] sm:$0xff] }
 0x193   :  { %v7496_v57 = vsub.f32 %v7494_v2, %v7495_v9  ;;  %v7497_v42 = vld [vmem:[#allocation15_spill] sm:$0xff]  ;;  %v7500_v5 = vld [vmem:[#allocation16_spill] sm:$0xff]  ;;  %v7503_v38 = vld [vmem:[#allocation17_spill] sm:$0xff] }
 0x194   :  { %v5074_v52 = vand.u32 2147483647, %v7493_v25  ;;  %v7499_v30 = vsub.f32 %v7497_v42, %v7498_v59  ;;  %v7502_v6 = vsub.f32 %v7500_v5, %v7501_v44  ;;  %v7504_v14 = vld [vmem:[#allocation41_spill] sm:$0xff]  ;;  %v7507_v46 = vld [vmem:[#allocation54_spill] sm:$0xff]  ;;  %v5107_v44 = vand.u32 2147483647, %v1564_v10 }
 0x195   :  { %v5079_v48 = vand.u32 2147483647, %v7496_v57  ;;  %v7505_v17 = vsub.f32 %v7503_v38, %v7504_v14  ;;  %v7508_v9 = vsub.f32 %v7506_v15, %v7507_v46  ;;  %v5111_v14 = vand.u32 2147483647, %v1565_v34 }
 0x196   :  { %v5084_v53 = vand.u32 2147483647, %v7499_v30  ;;  %v5089_v26 = vand.u32 2147483647, %v7502_v6  ;;  %v5103_v30 = vand.u32 2147483647, %v1562_v40 }
 0x197   :  { %v5094_v25 = vand.u32 2147483647, %v7505_v17  ;;  %v5099_v57 = vand.u32 2147483647, %v7508_v9  ;;  %v5113_v17 = vand.u32 2147483647, %v1566_v20 }
 0x198   :  { %v5119_v9 = vand.u32 2147483647, %v1568_v13  ;;  %v5121_v40 = vand.u32 2147483647, %v1569_v41  ;;  %v5127_v59 = vand.u32 2147483647, %v1571_v50 }
 0x199   :  { %7511 = vst [vmem:[#allocation70_spill] sm:$0xff] %v5113_v17  ;;  %v5129_v34 = vand.u32 2147483647, %v1572_v19  ;;  %v5131_v20 = vand.u32 2147483647, %v1573_v11  ;;  %v7518_v11 = vmin.f32 %v5057_v61, 1.0 }
 0x19a   :  { %7512 = vst [vmem:[#allocation71_spill] sm:$0xff] %v5119_v9  ;;  %7513 = vst [vmem:[#allocation72_spill] sm:$0xff] %v5127_v59  ;;  %v5137_v13 = vand.u32 2147483647, %v1575_v35  ;;  %v5139_v41 = vand.u32 2147483647, %v1576_v62 }
 0x19b   :  { %v5143_v46 = vand.u32 2147483647, %v1577_v28  ;;  %v5145_v50 = vand.u32 2147483647, %v1578_v47  ;;  %v5147_v19 = vand.u32 2147483647, %v1579_v0 }
 0x19c   :  { %v5151_v10 = vand.u32 2147483647, %v1580_v39  ;;  %v1637_v42 = vmul.f32 0.5, %v7518_v11  ;;  %v7519_v16 = vmin.f32 %v5062_v4, 1.0  ;;  %v7520_v62 = vmin.f32 %v5067_v33, 1.0 }
 0x19d   :  { %7515 = vst [vmem:[#allocation74_spill] sm:$0xff] %v5143_v46  ;;  %7516 = vst [vmem:[#allocation75_spill] sm:$0xff] %v5147_v19  ;;  %v7521_v63 = vmin.f32 %v5074_v52, 1.0  ;;  %v7522_v47 = vmin.f32 %v5079_v48, 1.0  ;;  %v7523_v0 = vmin.f32 %v5084_v53, 1.0  ;;  %v7524_v39 = vmin.f32 %v5089_v26, 1.0 }
 0x19e   :  { %7517 = vst [vmem:[#allocation76_spill] sm:$0xff] %v5151_v10  ;;  %v1638_v35 = vmul.f32 0.5, %v7519_v16  ;;  %v1639_v2 = vmul.f32 0.5, %v7520_v62  ;;  %v7525_v11 = vmin.f32 %v5094_v25, 1.0  ;;  %v7526_v16 = vmin.f32 %v5099_v57, 1.0 }
 0x19f   :  { %v1640_v28 = vmul.f32 0.5, %v7521_v63  ;;  %v1641_v24 = vmul.f32 0.5, %v7522_v47  ;;  %v1642_v31 = vmul.f32 0.5, %v7523_v0  ;;  %v1643_v43 = vmul.f32 0.5, %v7524_v39 }
 0x1a0   :  { %v1644_v6 = vmul.f32 0.5, %v7525_v11  ;;  %v1645_v36 = vmul.f32 0.5, %v7526_v16  ;;  %v7527_v62 = vmin.f32 %v5103_v30, 1.0  ;;  %v7528_v63 = vmin.f32 %v5105_v29, 1.0 }
 0x1a1   :  { %v7529_v47 = vmin.f32 %v5107_v44, 1.0  ;;  %v7530_v0 = vmin.f32 %v5111_v14, 1.0  ;;  %v7531_v39 = vmin.f32 %v5113_v17, 1.0  ;;  %v7532_v11 = vmin.f32 %v5115_v54, 1.0 }
 0x1a2   :  { %v1646_v45 = vmul.f32 0.5, %v7527_v62  ;;  %v1647_v27 = vmul.f32 0.5, %v7528_v63  ;;  %v7533_v16 = vmin.f32 %v5119_v9, 1.0  ;;  %v7534_v62 = vmin.f32 %v5121_v40, 1.0 }
 0x1a3   :  { %v1648_v38 = vmul.f32 0.5, %v7529_v47  ;;  %v1649_v15 = vmul.f32 0.5, %v7530_v0  ;;  %v1650_v5 = vmul.f32 0.5, %v7531_v39  ;;  %v1651_v22 = vmul.f32 0.5, %v7532_v11 }
 0x1a4   :  { %v1652_v7 = vmul.f32 0.5, %v7533_v16  ;;  %v1653_v21 = vmul.f32 0.5, %v7534_v62  ;;  %v7535_v63 = vmin.f32 %v5123_v3, 1.0  ;;  %v7536_v47 = vmin.f32 %v5127_v59, 1.0 }
 0x1a5   :  { %v7537_v0 = vmin.f32 %v5129_v34, 1.0  ;;  %v7538_v39 = vmin.f32 %v5131_v20, 1.0  ;;  %v7539_v11 = vmin.f32 %v5135_v32, 1.0  ;;  %v7540_v16 = vmin.f32 %v5137_v13, 1.0 }
 0x1a6   :  { %v1654_v37 = vmul.f32 0.5, %v7535_v63  ;;  %v1655_v18 = vmul.f32 0.5, %v7536_v47  ;;  %v7541_v62 = vmin.f32 %v5139_v41, 1.0  ;;  %v7542_v63 = vmin.f32 %v5143_v46, 1.0 }
 0x1a7   :  { %v1656_v12 = vmul.f32 0.5, %v7537_v0  ;;  %v1657_v58 = vmul.f32 0.5, %v7538_v39  ;;  %v1658_v60 = vmul.f32 0.5, %v7539_v11  ;;  %v1659_v49 = vmul.f32 0.5, %v7540_v16 }
 0x1a8   :  { %v1660_v56 = vmul.f32 0.5, %v7541_v62  ;;  %v1661_v1 = vmul.f32 0.5, %v7542_v63  ;;  %v7543_v47 = vmin.f32 %v5145_v50, 1.0  ;;  %v7544_v0 = vmin.f32 %v5147_v19, 1.0 }
 0x1a9   :  { %v7545_v39 = vmin.f32 %v5151_v10, 1.0  ;;  %v1665_v11 = vsub.f32 %v5057_v61, %v1637_v42  ;;  %v1666_v55 = vsub.f32 %v5062_v4, %v1638_v35  ;;  %v1667_v16 = vsub.f32 %v5067_v33, %v1639_v2 }
 0x1aa   :  { %v1662_v51 = vmul.f32 0.5, %v7543_v47  ;;  %v1663_v23 = vmul.f32 0.5, %v7544_v0  ;;  %v1668_v62 = vsub.f32 %v5074_v52, %v1640_v28  ;;  %v1669_v46 = vsub.f32 %v5079_v48, %v1641_v24 }
 0x1ab   :  { %v1664_v8 = vmul.f32 0.5, %v7545_v39  ;;  %v1670_v63 = vsub.f32 %v5084_v53, %v1642_v31  ;;  %v1671_v47 = vsub.f32 %v5089_v26, %v1643_v43  ;;  %v1672_v19 = vsub.f32 %v5094_v25, %v1644_v6 }
 0x1ac   :  { %v1673_v0 = vsub.f32 %v5099_v57, %v1645_v36  ;;  %v1674_v39 = vsub.f32 %v5103_v30, %v1646_v45  ;;  %v1675_v42 = vsub.f32 %v5105_v29, %v1647_v27  ;;  %v1676_v35 = vsub.f32 %v5107_v44, %v1648_v38 }
 0x1ad   :  { %v1677_v2 = vsub.f32 %v5111_v14, %v1649_v15  ;;  %v1678_v28 = vsub.f32 %v5113_v17, %v1650_v5  ;;  %v1679_v24 = vsub.f32 %v5115_v54, %v1651_v22  ;;  %v1680_v31 = vsub.f32 %v5119_v9, %v1652_v7  ;;  %v7546_v17 = vld [vmem:[#allocation74_spill] sm:$0xff]  ;;  %v7547_v9 = vld [vmem:[#allocation75_spill] sm:$0xff] }
 0x1ae   :  { %v1681_v43 = vsub.f32 %v5121_v40, %v1653_v21  ;;  %v1682_v6 = vsub.f32 %v5123_v3, %v1654_v37  ;;  %v1683_v36 = vsub.f32 %v5127_v59, %v1655_v18  ;;  %v1684_v45 = vsub.f32 %v5129_v34, %v1656_v12 }
 0x1af   :  { %v1685_v27 = vsub.f32 %v5131_v20, %v1657_v58  ;;  %v1686_v38 = vsub.f32 %v5135_v32, %v1658_v60  ;;  %v1687_v15 = vsub.f32 %v5137_v13, %v1659_v49  ;;  %v1688_v5 = vsub.f32 %v5139_v41, %v1660_v56 }
 0x1b0   :  { %v1689_v22 = vsub.f32 %v7546_v17, %v1661_v1  ;;  %v1690_v7 = vsub.f32 %v5145_v50, %v1662_v51  ;;  %v1691_v21 = vsub.f32 %v7547_v9, %v1663_v23  ;;  %v1692_v37 = vsub.f32 %v5151_v10, %v1664_v8 }
 0x1b1   :  { %v7548_v18 = vmin.f32 %v5057_v61, 1.0  ;;  %v7549_v12 = vmin.f32 %v5062_v4, 1.0  ;;  %v7550_v60 = vmin.f32 %v5067_v33, 1.0  ;;  %v7551_v49 = vmin.f32 %v5074_v52, 1.0 }
 0x1b2   :  { %v7552_v1 = vmin.f32 %v5079_v48, 1.0  ;;  %v7553_v51 = vmin.f32 %v5084_v53, 1.0  ;;  %v7554_v8 = vmin.f32 %v5089_v26, 1.0  ;;  %v7555_v61 = vmin.f32 %v5094_v25, 1.0  ;;  %v7561_v26 = vld [vmem:[#allocation70_spill] sm:$0xff] }
 0x1b3   :  { %v1693_v59 = vmul.f32 %v1665_v11, %v7548_v18  ;;  %v1694_v58 = vmul.f32 %v1666_v55, %v7549_v12  ;;  %v1695_v32 = vmul.f32 %v1667_v16, %v7550_v60  ;;  %v1696_v56 = vmul.f32 %v1668_v62, %v7551_v49 }
 0x1b4   :  { %v1697_v17 = vmul.f32 %v1669_v46, %v7552_v1  ;;  %v1698_v23 = vmul.f32 %v1670_v63, %v7553_v51  ;;  %v1699_v10 = vmul.f32 %v1671_v47, %v7554_v8  ;;  %v1700_v11 = vmul.f32 %v1672_v19, %v7555_v61 }
 0x1b5   :  { %v7556_v55 = vmin.f32 %v5099_v57, 1.0  ;;  %v7557_v33 = vmin.f32 %v5103_v30, 1.0  ;;  %v7558_v52 = vmin.f32 %v5105_v29, 1.0  ;;  %v7559_v48 = vmin.f32 %v5107_v44, 1.0  ;;  %v7564_v57 = vld [vmem:[#allocation71_spill] sm:$0xff]  ;;  %v7568_v44 = vld [vmem:[#allocation72_spill] sm:$0xff] }
 0x1b6   :  { %v7560_v53 = vmin.f32 %v5111_v14, 1.0  ;;  %v7562_v47 = vmin.f32 %v7561_v26, 1.0  ;;  %v7563_v25 = vmin.f32 %v5115_v54, 1.0  ;;  %v7566_v30 = vmin.f32 %v5121_v40, 1.0  ;;  %v7572_v54 = vld [vmem:[#allocation73_spill] sm:$0xff] }
 0x1b7   :  { %v1701_v4 = vmul.f32 %v1673_v0, %v7556_v55  ;;  %v1702_v16 = vmul.f32 %v1674_v39, %v7557_v33  ;;  %v1703_v62 = vmul.f32 %v1675_v42, %v7558_v52  ;;  %v1704_v46 = vmul.f32 %v1676_v35, %v7559_v48  ;;  %v7589_v55 = vld [vmem:[#allocation81_spill] sm:$0xff]  ;;  %v7593_v33 = vld [vmem:[#allocation78_spill] sm:$0xff] }
 0x1b8   :  { %v1705_v63 = vmul.f32 %v1677_v2, %v7560_v53  ;;  %v1706_v18 = vmul.f32 %v1678_v28, %v7562_v47  ;;  %v1707_v19 = vmul.f32 %v1679_v24, %v7563_v25  ;;  %v7565_v0 = vmin.f32 %v7564_v57, 1.0 }
 0x1b9   :  { %v1709_v39 = vmul.f32 %v1681_v43, %v7566_v30  ;;  %v7567_v29 = vmin.f32 %v5123_v3, 1.0  ;;  %v7569_v35 = vmin.f32 %v7568_v44, 1.0  ;;  %v7570_v14 = vmin.f32 %v5129_v34, 1.0  ;;  %v7576_v3 = vld [vmem:[#allocation74_spill] sm:$0xff] }
 0x1ba   :  { %v1708_v12 = vmul.f32 %v1680_v31, %v7565_v0  ;;  %v7571_v28 = vmin.f32 %v5131_v20, 1.0  ;;  %v7573_v24 = vmin.f32 %v7572_v54, 1.0  ;;  %v7574_v31 = vmin.f32 %v5137_v13, 1.0  ;;  %v7585_v13 = vld [vmem:[#allocation66_spill] sm:$0xff] }
 0x1bb   :  { %v1710_v42 = vmul.f32 %v1682_v6, %v7567_v29  ;;  %v1711_v60 = vmul.f32 %v1683_v36, %v7569_v35  ;;  %v1712_v2 = vmul.f32 %v1684_v45, %v7570_v14  ;;  %v7575_v40 = vmin.f32 %v5139_v41, 1.0  ;;  %v7582_v45 = vld [vmem:[#allocation76_spill] sm:$0xff]  ;;  %v7587_v41 = vld [vmem:[#allocation65_spill] sm:$0xff] }
 0x1bc   :  { %v1713_v49 = vmul.f32 %v1685_v27, %v7571_v28  ;;  %v1714_v1 = vmul.f32 %v1686_v38, %v7573_v24  ;;  %v1715_v51 = vmul.f32 %v1687_v15, %v7574_v31  ;;  %v7577_v6 = vmin.f32 %v7576_v3, 1.0 }
 0x1bd   :  { %v1716_v43 = vmul.f32 %v1688_v5, %v7575_v40  ;;  %v7578_v36 = vmin.f32 %v5145_v50, 1.0  ;;  %v7580_v34 = vmin.f32 %v7547_v9, 1.0  ;;  %v7583_v27 = vmin.f32 %v7582_v45, 1.0  ;;  %v7591_v50 = vld [vmem:[#allocation77_spill] sm:$0xff]  ;;  %v7638_v45 = vld [vmem:[#allocation19_spill] sm:$0xff] }
 0x1be   :  { %v1717_v8 = vmul.f32 %v1689_v22, %v7577_v6  ;;  %v5330_v15 = vadd.f32 %v1693_v59, %v7585_v13  ;;  %v5333_v5 = vadd.f32 %v1694_v58, %v7587_v41  ;;  %v5336_v22 = vadd.f32 %v1695_v32, %v7589_v55  ;;  %v7599_v59 = vld [vmem:[#allocation86_spill] sm:$0xff]  ;;  %v7603_v32 = vld [vmem:[#allocation83_spill] sm:$0xff] }
 0x1bf   :  { %v5319_v61 = vmul.f32 %v1690_v7, %v7578_v36  ;;  %v5323_v20 = vmul.f32 %v1691_v21, %v7580_v34  ;;  %v5327_v38 = vmul.f32 %v1692_v37, %v7583_v27  ;;  %v5339_v7 = vadd.f32 %v1696_v56, %v7591_v50  ;;  %v7595_v21 = vld [vmem:[#allocation79_spill] sm:$0xff]  ;;  %v7597_v37 = vld [vmem:[#allocation80_spill] sm:$0xff]  ;;  %v7601_v58 = vld [vmem:[#allocation82_spill] sm:$0xff] }
 0x1c0   :  { %7586 = vst [vmem:[#allocation57_spill] sm:$0xff] %v5330_v15  ;;  %7588 = vst [vmem:[#allocation44_spill] sm:$0xff] %v5333_v5  ;;  %v5342_v9 = vadd.f32 %v1697_v17, %v7593_v33  ;;  %v5345_v52 = vadd.f32 %v1698_v23, %v7595_v21  ;;  %v5348_v48 = vadd.f32 %v1699_v10, %v7597_v37  ;;  %v7605_v56 = vld [vmem:[#allocation67_spill] sm:$0xff]  ;;  %v7607_v17 = vld [vmem:[#allocation84_spill] sm:$0xff] }
 0x1c1   :  { %7579 = vst [vmem:[#allocation42_spill] sm:$0xff] %v5319_v61  ;;  %7581 = vst [vmem:[#allocation56_spill] sm:$0xff] %v5323_v20  ;;  %v5351_v53 = vadd.f32 %v1700_v11, %v7599_v59  ;;  %v5354_v26 = vadd.f32 %v1701_v4, %v7601_v58  ;;  %v5357_v47 = vadd.f32 %v1702_v16, %v7603_v32  ;;  %v7609_v23 = vld [vmem:[#allocation85_spill] sm:$0xff]  ;;  %v7613_v11 = vld [vmem:[#allocation123_spill] sm:$0xff] }
 0x1c2   :  { %7584 = vst [vmem:[#allocation43_spill] sm:$0xff] %v5327_v38  ;;  %7590 = vst [vmem:[#allocation58_spill] sm:$0xff] %v5336_v22  ;;  %v5360_v25 = vadd.f32 %v1703_v62, %v7605_v56  ;;  %v5363_v57 = vadd.f32 %v1704_v46, %v7607_v17  ;;  %v5366_v0 = vadd.f32 %v1705_v63, %v7609_v23  ;;  %v7611_v10 = vld [vmem:[#allocation125_spill] sm:$0xff]  ;;  %v7615_v4 = vld [vmem:[#allocation124_spill] sm:$0xff] }
 0x1c3   :  { %7592 = vst [vmem:[#allocation45_spill] sm:$0xff] %v5339_v7  ;;  %7594 = vst [vmem:[#allocation59_spill] sm:$0xff] %v5342_v9  ;;  %v5369_v30 = vadd.f32 %v1706_v18, %v7611_v10  ;;  %v5372_v29 = vadd.f32 %v1707_v19, %v7613_v11  ;;  %v5375_v44 = vadd.f32 %v1708_v12, %v7615_v4  ;;  %v7617_v16 = vld [vmem:[#allocation10_spill] sm:$0xff]  ;;  %v7619_v62 = vld [vmem:[#allocation120_spill] sm:$0xff] }
 0x1c4   :  { %7596 = vst [vmem:[#allocation46_spill] sm:$0xff] %v5345_v52  ;;  %7598 = vst [vmem:[#allocation60_spill] sm:$0xff] %v5348_v48  ;;  %v5378_v35 = vadd.f32 %v1709_v39, %v7617_v16  ;;  %v5381_v14 = vadd.f32 %v1710_v42, %v7619_v62  ;;  %v7621_v46 = vld [vmem:[#allocation121_spill] sm:$0xff]  ;;  %v7623_v63 = vld [vmem:[#allocation122_spill] sm:$0xff] }
 0x1c5   :  { %7600 = vst [vmem:[#allocation47_spill] sm:$0xff] %v5351_v53  ;;  %7602 = vst [vmem:[#allocation61_spill] sm:$0xff] %v5354_v26  ;;  %v5384_v28 = vadd.f32 %v1711_v60, %v7621_v46  ;;  %v5387_v54 = vadd.f32 %v1712_v2, %v7623_v63  ;;  %v7625_v18 = vld [vmem:[#allocation97_spill] sm:$0xff]  ;;  %v7627_v19 = vld [vmem:[#allocation98_spill] sm:$0xff] }
 0x1c6   :  { %7604 = vst [vmem:[#allocation48_spill] sm:$0xff] %v5357_v47  ;;  %7606 = vst [vmem:[#allocation62_spill] sm:$0xff] %v5360_v25  ;;  %v5390_v24 = vadd.f32 %v1713_v49, %v7625_v18  ;;  %v5393_v31 = vadd.f32 %v1714_v1, %v7627_v19  ;;  %v7629_v12 = vld [vmem:[#allocation93_spill] sm:$0xff]  ;;  %v7631_v39 = vld [vmem:[#allocation94_spill] sm:$0xff] }
 0x1c7   :  { %7608 = vst [vmem:[#allocation49_spill] sm:$0xff] %v5363_v57  ;;  %7610 = vst [vmem:[#allocation63_spill] sm:$0xff] %v5366_v0  ;;  %v5396_v40 = vadd.f32 %v1715_v51, %v7629_v12  ;;  %v5399_v3 = vadd.f32 %v1716_v43, %v7631_v39  ;;  %v7633_v42 = vld [vmem:[#allocation95_spill] sm:$0xff]  ;;  %v7635_v60 = vld [vmem:[#allocation16_spill] sm:$0xff] }
 0x1c8   :  { %7612 = vst [vmem:[#allocation52_spill] sm:$0xff] %v5369_v30  ;;  %7614 = vst [vmem:[#allocation64_spill] sm:$0xff] %v5372_v29  ;;  %v5402_v6 = vadd.f32 %v1717_v8, %v7633_v42  ;;  %v7636_v36 = vld [vmem:[#allocation18_spill] sm:$0xff]  ;;  %v7637_v2 = vld [vmem:[#allocation17_spill] sm:$0xff] }
 0x1c9   :  { %7616 = vst [vmem:[#allocation27_spill] sm:$0xff] %v5375_v44  ;;  %7618 = vst [vmem:[#allocation12_spill] sm:$0xff] %v5378_v35  ;;  %v1757_v34 = vsub.f32 %v7636_v36, %v7635_v60  ;;  %v1758_v27 = vsub.f32 %v7638_v45, %v7637_v2  ;;  %v7639_v49 = vld [vmem:[#allocation20_spill] sm:$0xff]  ;;  %v7640_v1 = vld [vmem:[#allocation21_spill] sm:$0xff] }
 0x1ca   :  { %7620 = vst [vmem:[#allocation38_spill] sm:$0xff] %v5381_v14  ;;  %7622 = vst [vmem:[#allocation55_spill] sm:$0xff] %v5384_v28  ;;  %v1759_v13 = vsub.f32 %v7639_v49, %v7636_v36  ;;  %v1760_v41 = vsub.f32 %v7640_v1, %v7638_v45  ;;  %v7641_v51 = vld [vmem:[#allocation22_spill] sm:$0xff]  ;;  %v7642_v43 = vld [vmem:[#allocation24_spill] sm:$0xff] }
 0x1cb   :  { %7624 = vst [vmem:[#allocation23_spill] sm:$0xff] %v5387_v54  ;;  %7626 = vst [vmem:[#allocation51_spill] sm:$0xff] %v5390_v24  ;;  %v1761_v55 = vsub.f32 %v7641_v51, %v7639_v49  ;;  %v1762_v50 = vsub.f32 %v7642_v43, %v7640_v1  ;;  %v7643_v8 = vld [vmem:[#allocation25_spill] sm:$0xff]  ;;  %v7644_v21 = vld [vmem:[#allocation26_spill] sm:$0xff]  ;;  %v5488_v1 = vand.u32 2147483647, %v1758_v27 }
 0x1cc   :  { %7628 = vst [vmem:[#allocation40_spill] sm:$0xff] %v5393_v31  ;;  %7630 = vst [vmem:[#allocation53_spill] sm:$0xff] %v5396_v40  ;;  %v1763_v33 = vsub.f32 %v7643_v8, %v7641_v51  ;;  %v1764_v37 = vsub.f32 %v7644_v21, %v7642_v43  ;;  %v7645_v59 = vld [vmem:[#allocation28_spill] sm:$0xff]  ;;  %v7646_v32 = vld [vmem:[#allocation29_spill] sm:$0xff]  ;;  %v5490_v49 = vand.u32 2147483647, %v1759_v13 }
 0x1cd   :  { %7632 = vst [vmem:[#allocation41_spill] sm:$0xff] %v5399_v3  ;;  %7634 = vst [vmem:[#allocation54_spill] sm:$0xff] %v5402_v6  ;;  %v1765_v58 = vsub.f32 %v7645_v59, %v7643_v8  ;;  %v1766_v56 = vsub.f32 %v7646_v32, %v7644_v21  ;;  %v7647_v17 = vld [vmem:[#allocation30_spill] sm:$0xff]  ;;  %v7648_v10 = vld [vmem:[#allocation31_spill] sm:$0xff]  ;;  %v5494_v36 = vand.u32 2147483647, %v1760_v41 }
 0x1ce   :  { %v1767_v23 = vsub.f32 %v7647_v17, %v7645_v59  ;;  %v1768_v11 = vsub.f32 %v7648_v10, %v7646_v32  ;;  %v7649_v4 = vld [vmem:[#allocation32_spill] sm:$0xff]  ;;  %v7650_v62 = vld [vmem:[#allocation33_spill] sm:$0xff]  ;;  %v7651_v63 = vld [vmem:[#allocation34_spill] sm:$0xff]  ;;  %v5498_v14 = vand.u32 2147483647, %v1762_v50 }
 0x1cf   :  { %v1769_v16 = vsub.f32 %v7649_v4, %v7647_v17  ;;  %v1770_v46 = vsub.f32 %v7650_v62, %v7648_v10  ;;  %v1771_v18 = vsub.f32 %v7651_v63, %v7649_v4  ;;  %v7652_v19 = vld [vmem:[#allocation35_spill] sm:$0xff]  ;;  %v7653_v39 = vld [vmem:[#allocation36_spill] sm:$0xff]  ;;  %v7654_v38 = vld [vmem:[#allocation37_spill] sm:$0xff]  ;;  %v5502_v44 = vand.u32 2147483647, %v1763_v33 }
 0x1d0   :  { %v1772_v12 = vsub.f32 %v7652_v19, %v7650_v62  ;;  %v1773_v42 = vsub.f32 %v7653_v39, %v7651_v63  ;;  %v1774_v6 = vsub.f32 %v7654_v38, %v7652_v19  ;;  %v7655_v20 = vld [vmem:[#allocation39_spill] sm:$0xff]  ;;  %v7656_v61 = vld [vmem:[#allocation8_spill] sm:$0xff]  ;;  %v7657_v40 = vld [vmem:[#allocation5_spill] sm:$0xff]  ;;  %v5506_v27 = vand.u32 2147483647, %v1765_v58 }
 0x1d1   :  { %v1775_v3 = vsub.f32 %v7655_v20, %v7653_v39  ;;  %v7658_v31 = vsub.f32 %v7656_v61, %v7657_v40  ;;  %v7659_v54 = vld [vmem:[#allocation9_spill] sm:$0xff]  ;;  %v7660_v28 = vld [vmem:[#allocation6_spill] sm:$0xff]  ;;  %v7663_v63 = vld [vmem:[#allocation11_spill] sm:$0xff]  ;;  %v5510_v43 = vand.u32 2147483647, %v1766_v56 }
 0x1d2   :  { %v7661_v4 = vsub.f32 %v7659_v54, %v7660_v28  ;;  %v7662_v62 = vld [vmem:[#allocation50_spill] sm:$0xff]  ;;  %v7664_v32 = vsub.f32 %v7663_v63, %v7656_v61  ;;  %v7665_v59 = vld [vmem:[#allocation13_spill] sm:$0xff]  ;;  %v7669_v28 = vld [vmem:[#allocation15_spill] sm:$0xff]  ;;  %v5512_v41 = vand.u32 2147483647, %v1767_v23 }
 0x1d3   :  { %v5445_v24 = vand.u32 2147483647, %v7658_v31  ;;  %v1776_v17 = vsub.f32 %v7662_v62, %v7654_v38  ;;  %v7666_v20 = vsub.f32 %v7665_v59, %v7659_v54  ;;  %v7667_v31 = vld [vmem:[#allocation14_spill] sm:$0xff]  ;;  %v7672_v38 = vsub.f32 %v7637_v2, %v7669_v28 }
 0x1d4   :  { %v5450_v10 = vand.u32 2147483647, %v7661_v4  ;;  %v5457_v19 = vand.u32 2147483647, %v7664_v32  ;;  %v7668_v40 = vsub.f32 %v7667_v31, %v7663_v63  ;;  %v7670_v4 = vsub.f32 %v7669_v28, %v7665_v59  ;;  %7677 = vst [vmem:[#allocation75_spill] sm:$0xff] %v5512_v41 }
 0x1d5   :  { %v5462_v39 = vand.u32 2147483647, %v7666_v20  ;;  %v7671_v62 = vsub.f32 %v7635_v60, %v7667_v31  ;;  %v5482_v20 = vand.u32 2147483647, %v7672_v38  ;;  %v5520_v33 = vand.u32 2147483647, %v1770_v46 }
 0x1d6   :  { %v5467_v21 = vand.u32 2147483647, %v7668_v40  ;;  %v5472_v8 = vand.u32 2147483647, %v7670_v4  ;;  %v5486_v40 = vand.u32 2147483647, %v1757_v34 }
 0x1d7   :  { %v5477_v32 = vand.u32 2147483647, %v7671_v62  ;;  %v5496_v62 = vand.u32 2147483647, %v1761_v55  ;;  %v5504_v34 = vand.u32 2147483647, %v1764_v37 }
 0x1d8   :  { %v5514_v55 = vand.u32 2147483647, %v1768_v11  ;;  %v5518_v4 = vand.u32 2147483647, %v1769_v16  ;;  %7679 = vst [vmem:[#allocation70_spill] sm:$0xff] %v5520_v33  ;;  %v7686_v51 = vmin.f32 %v5445_v24, 1.0 }
 0x1d9   :  { %v5522_v37 = vand.u32 2147483647, %v1771_v18  ;;  %v5526_v38 = vand.u32 2147483647, %v1772_v12  ;;  %v5528_v56 = vand.u32 2147483647, %v1773_v42 }
 0x1da   :  { %v5530_v23 = vand.u32 2147483647, %v1774_v6  ;;  %v5534_v13 = vand.u32 2147483647, %v1775_v3  ;;  %v5536_v16 = vand.u32 2147483647, %v1776_v17 }
 0x1db   :  { %7681 = vst [vmem:[#allocation71_spill] sm:$0xff] %v5528_v56  ;;  %v1833_v18 = vmul.f32 0.5, %v7686_v51  ;;  %v7687_v46 = vmin.f32 %v5450_v10, 1.0  ;;  %v7688_v35 = vmin.f32 %v5457_v19, 1.0  ;;  %v7689_v12 = vmin.f32 %v5462_v39, 1.0 }
 0x1dc   :  { %7683 = vst [vmem:[#allocation72_spill] sm:$0xff] %v5534_v13  ;;  %7684 = vst [vmem:[#allocation73_spill] sm:$0xff] %v5536_v16  ;;  %v7690_v6 = vmin.f32 %v5467_v21, 1.0  ;;  %v7691_v58 = vmin.f32 %v5472_v8, 1.0  ;;  %v7692_v17 = vmin.f32 %v5477_v32, 1.0  ;;  %v7693_v51 = vmin.f32 %v5482_v20, 1.0 }
 0x1dd   :  { %v1834_v45 = vmul.f32 0.5, %v7687_v46  ;;  %v1835_v2 = vmul.f32 0.5, %v7688_v35  ;;  %v1836_v42 = vmul.f32 0.5, %v7689_v12  ;;  %v7694_v46 = vmin.f32 %v5486_v40, 1.0 }
 0x1de   :  { %v1837_v11 = vmul.f32 0.5, %v7690_v6  ;;  %v1838_v3 = vmul.f32 0.5, %v7691_v58  ;;  %v1839_v60 = vmul.f32 0.5, %v7692_v17  ;;  %v1840_v28 = vmul.f32 0.5, %v7693_v51 }
 0x1df   :  { %v1841_v50 = vmul.f32 0.5, %v7694_v46  ;;  %v7695_v35 = vmin.f32 %v5488_v1, 1.0  ;;  %v7696_v12 = vmin.f32 %v5490_v49, 1.0  ;;  %v7697_v6 = vmin.f32 %v5494_v36, 1.0 }
 0x1e0   :  { %v7698_v58 = vmin.f32 %v5496_v62, 1.0  ;;  %v7699_v17 = vmin.f32 %v5498_v14, 1.0  ;;  %v7700_v51 = vmin.f32 %v5502_v44, 1.0  ;;  %v7701_v46 = vmin.f32 %v5504_v34, 1.0 }
 0x1e1   :  { %v1842_v31 = vmul.f32 0.5, %v7695_v35  ;;  %v1843_v59 = vmul.f32 0.5, %v7696_v12  ;;  %v1844_v63 = vmul.f32 0.5, %v7697_v6  ;;  %v7702_v35 = vmin.f32 %v5506_v27, 1.0 }
 0x1e2   :  { %v1845_v54 = vmul.f32 0.5, %v7698_v58  ;;  %v1846_v61 = vmul.f32 0.5, %v7699_v17  ;;  %v1847_v29 = vmul.f32 0.5, %v7700_v51  ;;  %v1848_v30 = vmul.f32 0.5, %v7701_v46 }
 0x1e3   :  { %v1849_v0 = vmul.f32 0.5, %v7702_v35  ;;  %v7703_v12 = vmin.f32 %v5510_v43, 1.0  ;;  %v7704_v6 = vmin.f32 %v5512_v41, 1.0  ;;  %v7705_v58 = vmin.f32 %v5514_v55, 1.0 }
 0x1e4   :  { %v7706_v17 = vmin.f32 %v5518_v4, 1.0  ;;  %v7707_v51 = vmin.f32 %v5520_v33, 1.0  ;;  %v7708_v46 = vmin.f32 %v5522_v37, 1.0  ;;  %v7709_v35 = vmin.f32 %v5526_v38, 1.0 }
 0x1e5   :  { %v1850_v57 = vmul.f32 0.5, %v7703_v12  ;;  %v1851_v25 = vmul.f32 0.5, %v7704_v6  ;;  %v1852_v47 = vmul.f32 0.5, %v7705_v58  ;;  %v7710_v12 = vmin.f32 %v5528_v56, 1.0 }
 0x1e6   :  { %v1853_v26 = vmul.f32 0.5, %v7706_v17  ;;  %v1854_v53 = vmul.f32 0.5, %v7707_v51  ;;  %v1855_v48 = vmul.f32 0.5, %v7708_v46  ;;  %v1856_v52 = vmul.f32 0.5, %v7709_v35 }
 0x1e7   :  { %v1857_v9 = vmul.f32 0.5, %v7710_v12  ;;  %v7711_v6 = vmin.f32 %v5530_v23, 1.0  ;;  %v7712_v58 = vmin.f32 %v5534_v13, 1.0  ;;  %v7713_v17 = vmin.f32 %v5536_v16, 1.0 }
 0x1e8   :  { %v1861_v46 = vsub.f32 %v5445_v24, %v1833_v18  ;;  %v1862_v5 = vsub.f32 %v5450_v10, %v1834_v45  ;;  %v1863_v35 = vsub.f32 %v5457_v19, %v1835_v2  ;;  %v1864_v12 = vsub.f32 %v5462_v39, %v1836_v42 }
 0x1e9   :  { %v5620_v7 = vmul.f32 0.5, %v7711_v6  ;;  %v5624_v22 = vmul.f32 0.5, %v7712_v58  ;;  %v5628_v51 = vmul.f32 0.5, %v7713_v17  ;;  %v1865_v15 = vsub.f32 %v5467_v21, %v1837_v11 }
 0x1ea   :  { %v1866_v6 = vsub.f32 %v5472_v8, %v1838_v3  ;;  %v1867_v13 = vsub.f32 %v5477_v32, %v1839_v60  ;;  %v1868_v58 = vsub.f32 %v5482_v20, %v1840_v28  ;;  %v1869_v16 = vsub.f32 %v5486_v40, %v1841_v50 }
 0x1eb   :  { %v1870_v17 = vsub.f32 %v5488_v1, %v1842_v31  ;;  %v1871_v18 = vsub.f32 %v5490_v49, %v1843_v59  ;;  %v1872_v45 = vsub.f32 %v5494_v36, %v1844_v63  ;;  %v1873_v2 = vsub.f32 %v5496_v62, %v1845_v54 }
 0x1ec   :  { %v1874_v42 = vsub.f32 %v5498_v14, %v1846_v61  ;;  %v1875_v11 = vsub.f32 %v5502_v44, %v1847_v29  ;;  %v1876_v3 = vsub.f32 %v5504_v34, %v1848_v30  ;;  %v1877_v60 = vsub.f32 %v5506_v27, %v1849_v0  ;;  %v7714_v0 = vld [vmem:[#allocation72_spill] sm:$0xff] }
 0x1ed   :  { %v1878_v28 = vsub.f32 %v5510_v43, %v1850_v57  ;;  %v1879_v50 = vsub.f32 %v5512_v41, %v1851_v25  ;;  %v1880_v31 = vsub.f32 %v5514_v55, %v1852_v47  ;;  %v1881_v59 = vsub.f32 %v5518_v4, %v1853_v26  ;;  %v7715_v25 = vld [vmem:[#allocation73_spill] sm:$0xff] }
 0x1ee   :  { %v1882_v63 = vsub.f32 %v5520_v33, %v1854_v53  ;;  %v1883_v54 = vsub.f32 %v5522_v37, %v1855_v48  ;;  %v1884_v61 = vsub.f32 %v5526_v38, %v1856_v52  ;;  %v1885_v29 = vsub.f32 %v5528_v56, %v1857_v9 }
 0x1ef   :  { %v1886_v30 = vsub.f32 %v5530_v23, %v5620_v7  ;;  %v1887_v57 = vsub.f32 %v7714_v0, %v5624_v22  ;;  %v1888_v41 = vsub.f32 %v7715_v25, %v5628_v51  ;;  %v7716_v47 = vmin.f32 %v5445_v24, 1.0 }
 0x1f0   :  { %v7717_v53 = vmin.f32 %v5450_v10, 1.0  ;;  %v7718_v52 = vmin.f32 %v5457_v19, 1.0  ;;  %v7719_v9 = vmin.f32 %v5462_v39, 1.0  ;;  %v7720_v7 = vmin.f32 %v5467_v21, 1.0 }
 0x1f1   :  { %v1889_v26 = vmul.f32 %v1861_v46, %v7716_v47  ;;  %v7721_v0 = vmin.f32 %v5472_v8, 1.0  ;;  %v7722_v24 = vmin.f32 %v5477_v32, 1.0  ;;  %v7724_v19 = vmin.f32 %v5486_v40, 1.0 }
 0x1f2   :  { %v5665_v33 = vmul.f32 %v1862_v5, %v7717_v53  ;;  %v1891_v48 = vmul.f32 %v1863_v35, %v7718_v52  ;;  %v5671_v56 = vmul.f32 %v1864_v12, %v7719_v9  ;;  %v1893_v22 = vmul.f32 %v1865_v15, %v7720_v7 }
 0x1f3   :  { %v5677_v51 = vmul.f32 %v1866_v6, %v7721_v0  ;;  %v1895_v46 = vmul.f32 %v1867_v13, %v7722_v24  ;;  %v7723_v5 = vmin.f32 %v5482_v20, 1.0  ;;  %v1897_v35 = vmul.f32 %v1869_v16, %v7724_v19  ;;  %v7751_v19 = vld [vmem:[#allocation72_spill] sm:$0xff] }
 0x1f4   :  { %v7725_v39 = vmin.f32 %v5488_v1, 1.0  ;;  %v7726_v15 = vmin.f32 %v5490_v49, 1.0  ;;  %v7727_v8 = vmin.f32 %v5494_v36, 1.0  ;;  %v7728_v32 = vmin.f32 %v5496_v62, 1.0  ;;  %v7734_v62 = vld [vmem:[#allocation75_spill] sm:$0xff] }
 0x1f5   :  { %v5683_v10 = vmul.f32 %v1868_v58, %v7723_v5  ;;  %v7729_v20 = vmin.f32 %v5498_v14, 1.0  ;;  %v7730_v40 = vmin.f32 %v5502_v44, 1.0  ;;  %v7731_v1 = vmin.f32 %v5504_v34, 1.0  ;;  %v7739_v34 = vld [vmem:[#allocation70_spill] sm:$0xff] }
 0x1f6   :  { %v5689_v12 = vmul.f32 %v1870_v17, %v7725_v39  ;;  %v1899_v21 = vmul.f32 %v1871_v18, %v7726_v15  ;;  %v5695_v6 = vmul.f32 %v1872_v45, %v7727_v8  ;;  %v1901_v13 = vmul.f32 %v1873_v2, %v7728_v32 }
 0x1f7   :  { %v5701_v58 = vmul.f32 %v1874_v42, %v7729_v20  ;;  %v1903_v16 = vmul.f32 %v1875_v11, %v7730_v40  ;;  %v5707_v17 = vmul.f32 %v1876_v3, %v7731_v1  ;;  %v7732_v49 = vmin.f32 %v5506_v27, 1.0 }
 0x1f8   :  { %v7733_v36 = vmin.f32 %v5510_v43, 1.0  ;;  %v7735_v2 = vmin.f32 %v7734_v62, 1.0  ;;  %v7736_v14 = vmin.f32 %v5514_v55, 1.0  ;;  %v7738_v44 = vmin.f32 %v5518_v4, 1.0 }
 0x1f9   :  { %v1905_v18 = vmul.f32 %v1877_v60, %v7732_v49  ;;  %v7740_v3 = vmin.f32 %v7739_v34, 1.0  ;;  %v7742_v27 = vmin.f32 %v5522_v37, 1.0  ;;  %v7744_v43 = vmin.f32 %v5526_v38, 1.0  ;;  %v7823_v49 = vld [vmem:[#allocation117_spill] sm:$0xff] }
 0x1fa   :  { %v5713_v45 = vmul.f32 %v1878_v28, %v7733_v36  ;;  %v1907_v0 = vmul.f32 %v1879_v50, %v7735_v2  ;;  %v5719_v42 = vmul.f32 %v1880_v31, %v7736_v14  ;;  %v1909_v11 = vmul.f32 %v1881_v59, %v7738_v44  ;;  %v7746_v50 = vld [vmem:[#allocation71_spill] sm:$0xff]  ;;  %v7760_v2 = vld [vmem:[#allocation58_spill] sm:$0xff]  ;;  %v7761_v14 = vld [vmem:[#allocation45_spill] sm:$0xff] }
 0x1fb   :  { %v5725_v47 = vmul.f32 %v1882_v63, %v7740_v3  ;;  %v5729_v60 = vmul.f32 %v1883_v54, %v7742_v27  ;;  %v5733_v28 = vmul.f32 %v1884_v61, %v7744_v43  ;;  %v7747_v53 = vmin.f32 %v7746_v50, 1.0  ;;  %v7763_v3 = vld [vmem:[#allocation46_spill] sm:$0xff]  ;;  %v7764_v43 = vld [vmem:[#allocation60_spill] sm:$0xff] }
 0x1fc   :  { %7737 = vst [vmem:[#allocation74_spill] sm:$0xff] %v5719_v42  ;;  %v1945_v31 = vrot.slane %v1889_v26, 1  ;;  %v1946_v4 = vrot.slane %v5665_v33, 1  ;;  %v1948_v59 = vrot.slane %v1891_v48, 1  ;;  %v1949_v52 = vrot.slane %v5671_v56, 1 }
 0x1fd   :  { %7741 = vst [vmem:[#allocation76_spill] sm:$0xff] %v5725_v47  ;;  %7743 = vst [vmem:[#allocation66_spill] sm:$0xff] %v5729_v60  ;;  %v5737_v55 = vmul.f32 %v1885_v29, %v7747_v53  ;;  %v1951_v63 = vrot.slane %v1893_v22, 1  ;;  %v1952_v9 = vrot.slane %v5677_v51, 1  ;;  %v1954_v37 = vrot.slane %v1895_v46, 1  ;;  %v7765_v53 = vld [vmem:[#allocation47_spill] sm:$0xff] }
 0x1fe   :  { %7745 = vst [vmem:[#allocation65_spill] sm:$0xff] %v5733_v28  ;;  %v1955_v54 = vrot.slane %v5683_v10, 1  ;;  %v1957_v7 = vrot.slane %v1897_v35, 1  ;;  %v1958_v38 = vrot.slane %v5689_v12, 1  ;;  %v1960_v61 = vrot.slane %v1899_v21, 1 }
 0x1ff   :  { %7748 = vst [vmem:[#allocation81_spill] sm:$0xff] %v5737_v55  ;;  %v1961_v24 = vrot.slane %v5695_v6, 1  ;;  %v1963_v29 = vrot.slane %v1901_v13, 1  ;;  %v1964_v26 = vrot.slane %v5701_v58, 1  ;;  %v1966_v5 = vrot.slane %v1903_v16, 1 }
 0x200   :  { %v1967_v33 = vrot.slane %v5707_v17, 1  ;;  %v1969_v48 = vrot.slane %v1905_v18, 1  ;;  %v1970_v56 = vrot.slane %v5713_v45, 1  ;;  %v1972_v22 = vrot.slane %v1907_v0, 1  ;;  %v7758_v18 = vld [vmem:[#allocation57_spill] sm:$0xff]  ;;  %v7759_v45 = vld [vmem:[#allocation44_spill] sm:$0xff] }
 0x201   :  { %v6512_v51 = vrot.slane %v5719_v42, 1  ;;  %v7749_v46 = vmin.f32 %v5530_v23, 1.0  ;;  %v7752_v35 = vmin.f32 %v7751_v19, 1.0  ;;  %v1975_v12 = vrot.slane %v1909_v11, 1  ;;  %v7762_v11 = vld [vmem:[#allocation59_spill] sm:$0xff] }
 0x202   :  { %v6511_v15 = vrot.slane %v5725_v47, 1  ;;  %v7754_v21 = vmin.f32 %v7715_v25, 1.0  ;;  %v1947_v6 = vsel %vm136_vm0, %v1945_v31, %v1946_v4  ;;  %v1950_v32 = vsel %vm136_vm0, %v1948_v59, %v1949_v52  ;;  %v7779_v19 = vld [vmem:[#allocation27_spill] sm:$0xff] }
 0x203   :  { %v5751_v10 = vmul.f32 %v1886_v30, %v7749_v46  ;;  %v5755_v39 = vmul.f32 %v1887_v57, %v7752_v35  ;;  %v1953_v13 = vsel %vm136_vm0, %v1951_v63, %v1952_v9  ;;  %v1956_v23 = vsel %vm136_vm0, %v1954_v37, %v1955_v54  ;;  %v7767_v63 = vld [vmem:[#allocation48_spill] sm:$0xff] }
 0x204   :  { %v5760_v8 = vmul.f32 %v1888_v41, %v7754_v21  ;;  %v1959_v30 = vsel %vm136_vm0, %v1957_v7, %v1958_v38  ;;  %v1962_v57 = vsel %vm136_vm0, %v1960_v61, %v1961_v24  ;;  %v1965_v20 = vsel %vm136_vm0, %v1963_v29, %v1964_v26  ;;  %v7771_v61 = vld [vmem:[#allocation49_spill] sm:$0xff]  ;;  %v7783_v21 = vld [vmem:[#allocation38_spill] sm:$0xff] }
 0x205   :  { %7750 = vst [vmem:[#allocation77_spill] sm:$0xff] %v5751_v10  ;;  %7753 = vst [vmem:[#allocation78_spill] sm:$0xff] %v5755_v39  ;;  %v1968_v58 = vsel %vm136_vm0, %v1966_v5, %v1967_v33  ;;  %v1971_v25 = vsel %vm136_vm0, %v1969_v48, %v1970_v56  ;;  %v5774_v41 = vsel %vm136_vm0, %v1972_v22, %v6512_v51  ;;  %v7775_v48 = vld [vmem:[#allocation52_spill] sm:$0xff]  ;;  %v7827_v51 = vld [vmem:[#allocation14_spill] sm:$0xff] }
 0x206   :  { %7755 = vst [vmem:[#allocation79_spill] sm:$0xff] %v5760_v8  ;;  %7756 = vst [vmem:[#allocation80_spill] sm:$0xff] %v5774_v41  ;;  %v5780_v16 = vsel %vm136_vm0, %v1975_v12, %v6511_v15  ;;  %v5786_v36 = vadd.f32 %v1947_v6, %v7758_v18  ;;  %v5789_v62 = vadd.f32 %v1946_v4, %v7759_v45  ;;  %v7766_v4 = vld [vmem:[#allocation61_spill] sm:$0xff]  ;;  %v7825_v15 = vld [vmem:[#allocation104_spill] sm:$0xff] }
 0x207   :  { %7757 = vst [vmem:[#allocation86_spill] sm:$0xff] %v5780_v16  ;;  %v5792_v0 = vadd.f32 %v1950_v32, %v7760_v2  ;;  %v5795_v44 = vadd.f32 %v1949_v52, %v7761_v14  ;;  %v5798_v34 = vadd.f32 %v1953_v13, %v7762_v11  ;;  %v5801_v27 = vadd.f32 %v1952_v9, %v7763_v3  ;;  %v7769_v52 = vld [vmem:[#allocation62_spill] sm:$0xff]  ;;  %v7773_v9 = vld [vmem:[#allocation63_spill] sm:$0xff]  ;;  %v7792_v45 = vld [vmem:[#allocation21_spill] sm:$0xff] }
 0x208   :  { %v5804_v50 = vadd.f32 %v1956_v23, %v7764_v43  ;;  %v5807_v31 = vadd.f32 %v1955_v54, %v7765_v53  ;;  %v5810_v59 = vadd.f32 %v1959_v30, %v7766_v4  ;;  %v5813_v37 = vadd.f32 %v1958_v38, %v7767_v63  ;;  %v7777_v54 = vld [vmem:[#allocation64_spill] sm:$0xff]  ;;  %v7786_v32 = vld [vmem:[#allocation18_spill] sm:$0xff]  ;;  %v7787_v23 = vld [vmem:[#allocation111_spill] sm:$0xff] }
 0x209   :  { %v5816_v7 = vadd.f32 %v1962_v57, %v7769_v52  ;;  %v5819_v29 = vadd.f32 %v1961_v24, %v7771_v61  ;;  %v5822_v5 = vadd.f32 %v1965_v20, %v7773_v9  ;;  %v5825_v22 = vadd.f32 %v1964_v26, %v7775_v48  ;;  %v7781_v38 = vld [vmem:[#allocation12_spill] sm:$0xff]  ;;  %v7785_v24 = vld [vmem:[#allocation91_spill] sm:$0xff]  ;;  %v7794_v14 = vld [vmem:[#allocation22_spill] sm:$0xff] }
 0x20a   :  { %7768 = vst [vmem:[#allocation82_spill] sm:$0xff] %v5813_v37  ;;  %v5828_v46 = vadd.f32 %v1968_v58, %v7777_v54  ;;  %v5831_v35 = vadd.f32 %v1967_v33, %v7779_v19  ;;  %v5834_v12 = vadd.f32 %v1971_v25, %v7781_v38  ;;  %v5837_v6 = vadd.f32 %v1970_v56, %v7783_v21  ;;  %v7788_v30 = vld [vmem:[#allocation19_spill] sm:$0xff]  ;;  %v7789_v26 = vld [vmem:[#allocation92_spill] sm:$0xff]  ;;  %v7798_v53 = vld [vmem:[#allocation113_spill] sm:$0xff] }
 0x20b   :  { %7770 = vst [vmem:[#allocation83_spill] sm:$0xff] %v5816_v7  ;;  %7772 = vst [vmem:[#allocation67_spill] sm:$0xff] %v5819_v29  ;;  %v2051_v13 = vsub.f32 %v7786_v32, %v7785_v24  ;;  %v2052_v57 = vsub.f32 %v7788_v30, %v7787_v23  ;;  %v7790_v20 = vld [vmem:[#allocation20_spill] sm:$0xff]  ;;  %v7793_v33 = vld [vmem:[#allocation99_spill] sm:$0xff] }
 0x20c   :  { %7774 = vst [vmem:[#allocation84_spill] sm:$0xff] %v5822_v5  ;;  %7776 = vst [vmem:[#allocation85_spill] sm:$0xff] %v5825_v22  ;;  %v2053_v18 = vsub.f32 %v7790_v20, %v7789_v26  ;;  %v7791_v58 = vld [vmem:[#allocation112_spill] sm:$0xff]  ;;  %v2055_v11 = vsub.f32 %v7794_v14, %v7793_v33  ;;  %v7796_v3 = vld [vmem:[#allocation87_spill] sm:$0xff] }
 0x20d   :  { %7778 = vst [vmem:[#allocation125_spill] sm:$0xff] %v5828_v46  ;;  %7780 = vst [vmem:[#allocation123_spill] sm:$0xff] %v5831_v35  ;;  %v2054_v2 = vsub.f32 %v7792_v45, %v7791_v58  ;;  %v7795_v25 = vld [vmem:[#allocation8_spill] sm:$0xff]  ;;  %v7800_v52 = vld [vmem:[#allocation9_spill] sm:$0xff]  ;;  %v5915_v8 = vand.u32 2147483647, %v2051_v13 }
 0x20e   :  { %7782 = vst [vmem:[#allocation124_spill] sm:$0xff] %v5834_v12  ;;  %7784 = vst [vmem:[#allocation10_spill] sm:$0xff] %v5837_v6  ;;  %v7797_v43 = vsub.f32 %v7795_v25, %v7796_v3  ;;  %v7799_v4 = vld [vmem:[#allocation24_spill] sm:$0xff]  ;;  %v7801_v61 = vld [vmem:[#allocation105_spill] sm:$0xff]  ;;  %v5921_v10 = vand.u32 2147483647, %v2053_v18 }
 0x20f   :  { %v2056_v63 = vsub.f32 %v7799_v4, %v7798_v53  ;;  %v7802_v9 = vsub.f32 %v7800_v52, %v7801_v61  ;;  %v7803_v54 = vld [vmem:[#allocation11_spill] sm:$0xff]  ;;  %v7804_v19 = vld [vmem:[#allocation88_spill] sm:$0xff]  ;;  %v7806_v24 = vld [vmem:[#allocation13_spill] sm:$0xff]  ;;  %v5923_v47 = vand.u32 2147483647, %v2054_v2 }
 0x210   :  { %v5852_v56 = vand.u32 2147483647, %v7797_v43  ;;  %v7805_v38 = vsub.f32 %v7803_v54, %v7804_v19  ;;  %v7807_v32 = vld [vmem:[#allocation106_spill] sm:$0xff]  ;;  %v7809_v26 = vld [vmem:[#allocation100_spill] sm:$0xff]  ;;  %v7810_v20 = vld [vmem:[#allocation25_spill] sm:$0xff] }
 0x211   :  { %v5859_v48 = vand.u32 2147483647, %v7802_v9  ;;  %v7808_v23 = vsub.f32 %v7806_v24, %v7807_v32  ;;  %v2057_v58 = vsub.f32 %v7810_v20, %v7809_v26  ;;  %v7811_v45 = vld [vmem:[#allocation114_spill] sm:$0xff]  ;;  %v7813_v25 = vld [vmem:[#allocation101_spill] sm:$0xff]  ;;  %v7814_v3 = vld [vmem:[#allocation28_spill] sm:$0xff] }
 0x212   :  { %v5864_v21 = vand.u32 2147483647, %v7805_v38  ;;  %v7812_v33 = vld [vmem:[#allocation26_spill] sm:$0xff]  ;;  %v2059_v43 = vsub.f32 %v7814_v3, %v7813_v25  ;;  %v7815_v53 = vld [vmem:[#allocation115_spill] sm:$0xff]  ;;  %v7816_v4 = vld [vmem:[#allocation29_spill] sm:$0xff] }
 0x213   :  { %v5869_v30 = vand.u32 2147483647, %v7808_v23  ;;  %v2058_v14 = vsub.f32 %v7812_v33, %v7811_v45  ;;  %v2060_v52 = vsub.f32 %v7816_v4, %v7815_v53  ;;  %v7817_v61 = vld [vmem:[#allocation102_spill] sm:$0xff]  ;;  %v7819_v19 = vld [vmem:[#allocation116_spill] sm:$0xff]  ;;  %v7820_v38 = vld [vmem:[#allocation31_spill] sm:$0xff] }
 0x214   :  { %v7818_v9 = vld [vmem:[#allocation30_spill] sm:$0xff]  ;;  %v2062_v24 = vsub.f32 %v7820_v38, %v7819_v19  ;;  %v7821_v32 = vld [vmem:[#allocation103_spill] sm:$0xff]  ;;  %v7822_v23 = vld [vmem:[#allocation32_spill] sm:$0xff]  ;;  %v5925_v39 = vand.u32 2147483647, %v2055_v11 }
 0x215   :  { %v2061_v54 = vsub.f32 %v7818_v9, %v7817_v61  ;;  %v2063_v17 = vsub.f32 %v7822_v23, %v7821_v32  ;;  %v7824_v26 = vld [vmem:[#allocation33_spill] sm:$0xff]  ;;  %v7826_v45 = vld [vmem:[#allocation34_spill] sm:$0xff]  ;;  %v7830_v53 = vld [vmem:[#allocation15_spill] sm:$0xff]  ;;  %v2100_v23 = vmin.f32 %v5859_v48, 1.0  ;;  %v5927_v16 = vand.u32 2147483647, %v2056_v63 }
 0x216   :  { %v2064_v20 = vsub.f32 %v7824_v26, %v7823_v49  ;;  %v2065_v33 = vsub.f32 %v7826_v45, %v7825_v15  ;;  %v7828_v25 = vld [vmem:[#allocation89_spill] sm:$0xff]  ;;  %v7831_v4 = vld [vmem:[#allocation108_spill] sm:$0xff]  ;;  %v7834_v38 = vld [vmem:[#allocation90_spill] sm:$0xff]  ;;  %v2099_v49 = vmin.f32 %v5852_v56, 1.0  ;;  %v2101_v15 = vmin.f32 %v5864_v21, 1.0 }
 0x217   :  { %v7829_v3 = vsub.f32 %v7827_v51, %v7828_v25  ;;  %v7832_v61 = vsub.f32 %v7830_v53, %v7831_v4  ;;  %v7833_v19 = vld [vmem:[#allocation16_spill] sm:$0xff]  ;;  %v2102_v51 = vmin.f32 %v5869_v30, 1.0  ;;  %v7836_v26 = vld [vmem:[#allocation118_spill] sm:$0xff]  ;;  %v7837_v45 = vld [vmem:[#allocation35_spill] sm:$0xff]  ;;  %v5937_v2 = vand.u32 2147483647, %v2059_v43 }
 0x218   :  { %v7835_v1 = vsub.f32 %v7833_v19, %v7834_v38  ;;  %v2066_v25 = vsub.f32 %v7837_v45, %v7836_v26  ;;  %v7839_v53 = vld [vmem:[#allocation109_spill] sm:$0xff]  ;;  %v7841_v19 = vld [vmem:[#allocation107_spill] sm:$0xff]  ;;  %v7842_v38 = vld [vmem:[#allocation36_spill] sm:$0xff]  ;;  %v5929_v26 = vand.u32 2147483647, %v2057_v58  ;;  %v2112_v7 = vmin.f32 %v5927_v16, 1.0 }
 0x219   :  { %v5892_v40 = vand.u32 2147483647, %v7829_v3  ;;  %v5897_v9 = vand.u32 2147483647, %v7832_v61  ;;  %v7838_v3 = vld [vmem:[#allocation17_spill] sm:$0xff]  ;;  %v2067_v55 = vsub.f32 %v7842_v38, %v7841_v19  ;;  %v7843_v6 = vld [vmem:[#allocation119_spill] sm:$0xff] }
 0x21a   :  { %v5902_v32 = vand.u32 2147483647, %v7835_v1  ;;  %v7840_v4 = vsub.f32 %v7838_v3, %v7839_v53  ;;  %v5917_v1 = vand.u32 2147483647, %v2052_v57  ;;  %v2127_v3 = vmul.f32 0.5, %v2099_v49  ;;  %v7844_v19 = vld [vmem:[#allocation37_spill] sm:$0xff] }
 0x21b   :  { %v2103_v45 = vmin.f32 %v5892_v40, 1.0  ;;  %v2104_v13 = vmin.f32 %v5897_v9, 1.0  ;;  %v2128_v57 = vmul.f32 0.5, %v2100_v23  ;;  %v2129_v53 = vmul.f32 0.5, %v2101_v15  ;;  %v7845_v63 = vld [vmem:[#allocation110_spill] sm:$0xff]  ;;  %v7846_v58 = vld [vmem:[#allocation39_spill] sm:$0xff] }
 0x21c   :  { %v5913_v61 = vand.u32 2147483647, %v7840_v4  ;;  %v2130_v4 = vmul.f32 0.5, %v2102_v51  ;;  %v2068_v18 = vsub.f32 %v7844_v19, %v7843_v6  ;;  %v5935_v38 = vand.u32 2147483647, %v2058_v14 }
 0x21d   :  { %v5939_v11 = vand.u32 2147483647, %v2060_v52  ;;  %v2069_v42 = vsub.f32 %v7846_v58, %v7845_v63  ;;  %v5943_v60 = vand.u32 2147483647, %v2061_v54  ;;  %v5945_v28 = vand.u32 2147483647, %v2062_v24 }
 0x21e   :  { %v5947_v12 = vand.u32 2147483647, %v2063_v17  ;;  %v2105_v35 = vmin.f32 %v5902_v32, 1.0  ;;  %v2106_v41 = vmin.f32 %v5913_v61, 1.0  ;;  %v2131_v6 = vmul.f32 0.5, %v2103_v45  ;;  %v7847_v54 = vld [vmem:[#allocation7_spill] sm:$0xff] }
 0x21f   :  { %v2132_v14 = vmul.f32 0.5, %v2104_v13  ;;  %v2155_v43 = vsub.f32 %v5852_v56, %v2127_v3  ;;  %v2156_v52 = vsub.f32 %v5859_v48, %v2128_v57  ;;  %v2157_v19 = vsub.f32 %v5864_v21, %v2129_v53  ;;  %v7848_v58 = vld [vmem:[#allocation50_spill] sm:$0xff] }
 0x220   :  { %v2158_v63 = vsub.f32 %v5869_v30, %v2130_v4  ;;  %v2070_v24 = vsub.f32 %v7848_v58, %v7847_v54  ;;  %v5957_v46 = vand.u32 2147483647, %v2064_v20  ;;  %v5959_v17 = vand.u32 2147483647, %v2065_v33 }
 0x221   :  { %v5961_v22 = vand.u32 2147483647, %v2066_v25  ;;  %v5963_v5 = vand.u32 2147483647, %v2067_v55  ;;  %v5965_v29 = vand.u32 2147483647, %v2068_v18  ;;  %v2159_v30 = vsub.f32 %v5892_v40, %v2131_v6 }
 0x222   :  { %v2107_v56 = vmin.f32 %v5915_v8, 1.0  ;;  %v2108_v48 = vmin.f32 %v5917_v1, 1.0  ;;  %v2133_v21 = vmul.f32 0.5, %v2105_v35  ;;  %v2134_v3 = vmul.f32 0.5, %v2106_v41 }
 0x223   :  { %v2160_v57 = vsub.f32 %v5897_v9, %v2132_v14  ;;  %v2183_v20 = vmul.f32 %v2155_v43, %v2099_v49  ;;  %v2184_v53 = vmul.f32 %v2156_v52, %v2100_v23  ;;  %v2185_v33 = vmul.f32 %v2157_v19, %v2101_v15 }
 0x224   :  { %v2186_v4 = vmul.f32 %v2158_v63, %v2102_v51  ;;  %v5971_v25 = vand.u32 2147483647, %v2069_v42  ;;  %v5973_v55 = vand.u32 2147483647, %v2070_v24  ;;  %v2109_v18 = vmin.f32 %v5921_v10, 1.0 }
 0x225   :  { %v2110_v54 = vmin.f32 %v5923_v47, 1.0  ;;  %v2111_v58 = vmin.f32 %v5925_v39, 1.0  ;;  %v2135_v37 = vmul.f32 0.5, %v2107_v56  ;;  %v2136_v40 = vmul.f32 0.5, %v2108_v48 }
 0x226   :  { %v2161_v9 = vsub.f32 %v5902_v32, %v2133_v21  ;;  %v2162_v49 = vsub.f32 %v5913_v61, %v2134_v3  ;;  %v2187_v23 = vmul.f32 %v2159_v30, %v2103_v45  ;;  %v2188_v15 = vmul.f32 %v2160_v57, %v2104_v13 }
 0x227   :  { %v2239_v42 = vrot.slane %v2183_v20, 2  ;;  %v2240_v51 = vrot.slane %v2184_v53, 2  ;;  %v2242_v6 = vrot.slane %v2185_v33, 2  ;;  %v2243_v14 = vrot.slane %v2186_v4, 2 }
 0x228   :  { %v2113_v43 = vmin.f32 %v5929_v26, 1.0  ;;  %v2114_v52 = vmin.f32 %v5935_v38, 1.0  ;;  %v2115_v19 = vmin.f32 %v5937_v2, 1.0  ;;  %v2116_v63 = vmin.f32 %v5939_v11, 1.0 }
 0x229   :  { %v2137_v21 = vmul.f32 0.5, %v2109_v18  ;;  %v2138_v61 = vmul.f32 0.5, %v2110_v54  ;;  %v2163_v45 = vsub.f32 %v5915_v8, %v2135_v37  ;;  %v2164_v13 = vsub.f32 %v5917_v1, %v2136_v40 }
 0x22a   :  { %v2189_v3 = vmul.f32 %v2161_v9, %v2105_v35  ;;  %v2190_v30 = vmul.f32 %v2162_v49, %v2106_v41  ;;  %v2241_v57 = vsel %vm964_vm2, %v2239_v42, %v2240_v51  ;;  %v2244_v20 = vsel %vm964_vm2, %v2242_v6, %v2243_v14 }
 0x22b   :  { %v2245_v53 = vrot.slane %v2187_v23, 2  ;;  %v2246_v33 = vrot.slane %v2188_v15, 2  ;;  %v2139_v32 = vmul.f32 0.5, %v2111_v58  ;;  %v2140_v8 = vmul.f32 0.5, %v2112_v7 }
 0x22c   :  { %v2141_v41 = vmul.f32 0.5, %v2113_v43  ;;  %v2165_v35 = vsub.f32 %v5921_v10, %v2137_v21  ;;  %v2166_v1 = vsub.f32 %v5923_v47, %v2138_v61  ;;  %v2191_v40 = vmul.f32 %v2163_v45, %v2107_v56 }
 0x22d   :  { %v2309_v9 = vadd.f32 %v2241_v57, %v5786_v36  ;;  %v2310_v49 = vadd.f32 %v2240_v51, %v5789_v62  ;;  %v2311_v23 = vadd.f32 %v2244_v20, %v5792_v0  ;;  %v2192_v15 = vmul.f32 %v2164_v13, %v2108_v48 }
 0x22e   :  { %v2247_v42 = vsel %vm964_vm2, %v2245_v53, %v2246_v33  ;;  %v2248_v6 = vrot.slane %v2189_v3, 2  ;;  %v2249_v24 = vrot.slane %v2190_v30, 2  ;;  %v2142_v37 = vmul.f32 0.5, %v2114_v52 }
 0x22f   :  { %v2167_v4 = vsub.f32 %v5925_v39, %v2139_v32  ;;  %v2168_v10 = vsub.f32 %v5927_v16, %v2140_v8  ;;  %v2312_v47 = vadd.f32 %v2243_v14, %v5795_v44  ;;  %v2193_v56 = vmul.f32 %v2165_v35, %v2109_v18 }
 0x230   :  { %v2194_v36 = vmul.f32 %v2166_v1, %v2110_v54  ;;  %v2313_v62 = vadd.f32 %v2247_v42, %v5798_v34  ;;  %v2338_v0 = vsel %vm2337_vm3, %v2309_v9, 0.0  ;;  %v2340_v48 = vsel %vm2339_vm4, %v2310_v49, 0.0 }
 0x231   :  { %v2342_v51 = vsel %vm2337_vm3, %v2311_v23, 0.0  ;;  %v2250_v21 = vsel %vm964_vm2, %v2248_v6, %v2249_v24  ;;  %v2251_v61 = vrot.slane %v2191_v40, 2  ;;  %v2252_v32 = vrot.slane %v2192_v15, 2 }
 0x232   :  { %v2341_v45 = vadd.f32 %v2340_v48, %v2338_v0  ;;  %v2122_v13 = vmin.f32 %v5961_v22, 1.0  ;;  %v2143_v44 = vmul.f32 0.5, %v2115_v19  ;;  %v2314_v18 = vadd.f32 %v2246_v33, %v5801_v27 }
 0x233   :  { %v2344_v34 = vsel %vm2339_vm4, %v2312_v47, 0.0  ;;  %v2144_v54 = vmul.f32 0.5, %v2116_v63  ;;  %v2169_v14 = vsub.f32 %v5929_v26, %v2141_v41  ;;  %v2170_v3 = vsub.f32 %v5935_v38, %v2142_v37 }
 0x234   :  { %v2343_v30 = vadd.f32 %v2342_v51, %v2341_v45  ;;  %v2195_v57 = vmul.f32 %v2167_v4, %v2111_v58  ;;  %v2196_v20 = vmul.f32 %v2168_v10, %v2112_v7  ;;  %v2315_v53 = vadd.f32 %v2250_v21, %v5804_v50 }
 0x235   :  { %v2346_v27 = vsel %vm2337_vm3, %v2313_v62, 0.0  ;;  %v2253_v33 = vsel %vm964_vm2, %v2251_v61, %v2252_v32  ;;  %v2254_v8 = vrot.slane %v2193_v56, 2  ;;  %v2255_v35 = vrot.slane %v2194_v36, 2  ;;  %v7852_v62 = vld [vmem:[#allocation82_spill] sm:$0xff]  ;;  %v7854_v61 = vld [vmem:[#allocation83_spill] sm:$0xff] }
 0x236   :  { %v2345_v1 = vadd.f32 %v2344_v34, %v2343_v30  ;;  %v2123_v41 = vmin.f32 %v5963_v5, 1.0  ;;  %v7849_v37 = vmin.f32 %v5943_v60, 1.0  ;;  %v2316_v39 = vadd.f32 %v2249_v24, %v5807_v31 }
 0x237   :  { %v2348_v58 = vsel %vm2339_vm4, %v2314_v18, 0.0  ;;  %v7850_v16 = vmin.f32 %v5945_v28, 1.0  ;;  %v2171_v50 = vsub.f32 %v5937_v2, %v2143_v44  ;;  %v2172_v4 = vsub.f32 %v5939_v11, %v2144_v54 }
 0x238   :  { %v2145_v40 = vmul.f32 0.5, %v7849_v37  ;;  %v2347_v9 = vadd.f32 %v2346_v27, %v2345_v1  ;;  %v2197_v49 = vmul.f32 %v2169_v14, %v2113_v43  ;;  %v2198_v23 = vmul.f32 %v2170_v3, %v2114_v52 }
 0x239   :  { %v2146_v7 = vmul.f32 0.5, %v7850_v16  ;;  %v2317_v15 = vadd.f32 %v2253_v33, %v5810_v59  ;;  %v2350_v31 = vsel %vm2337_vm3, %v2315_v53, 0.0  ;;  %v2256_v24 = vsel %vm964_vm2, %v2254_v8, %v2255_v35 }
 0x23a   :  { %v2257_v42 = vrot.slane %v2195_v57, 2  ;;  %v2258_v6 = vrot.slane %v2196_v20, 2  ;;  %v2349_v10 = vadd.f32 %v2348_v58, %v2347_v9  ;;  %v2124_v47 = vmin.f32 %v5965_v29, 1.0  ;;  %v7856_v57 = vld [vmem:[#allocation67_spill] sm:$0xff]  ;;  %v7860_v9 = vld [vmem:[#allocation85_spill] sm:$0xff] }
 0x23b   :  { %v7851_v56 = vmin.f32 %v5947_v12, 1.0  ;;  %v2318_v26 = vadd.f32 %v2252_v32, %v7852_v62  ;;  %v2352_v43 = vsel %vm2339_vm4, %v2316_v39, 0.0  ;;  %v7853_v38 = vmin.f32 %v5957_v46, 1.0 }
 0x23c   :  { %v2173_v59 = vsub.f32 %v5943_v60, %v2145_v40  ;;  %v2174_v0 = vsub.f32 %v5945_v28, %v2146_v7  ;;  %v2351_v48 = vadd.f32 %v2350_v31, %v2349_v10  ;;  %v2199_v51 = vmul.f32 %v2171_v50, %v2115_v19 }
 0x23d   :  { %v2147_v36 = vmul.f32 0.5, %v7851_v56  ;;  %v2148_v52 = vmul.f32 0.5, %v7853_v38  ;;  %v2200_v21 = vmul.f32 %v2172_v4, %v2116_v63  ;;  %v2319_v45 = vadd.f32 %v2256_v24, %v7854_v61 }
 0x23e   :  { %v2354_v32 = vsel %vm2337_vm3, %v2317_v15, 0.0  ;;  %v2259_v44 = vsel %vm964_vm2, %v2257_v42, %v2258_v6  ;;  %v2260_v18 = vrot.slane %v2197_v49, 2  ;;  %v2261_v34 = vrot.slane %v2198_v23, 2 }
 0x23f   :  { %v2353_v54 = vadd.f32 %v2352_v43, %v2351_v48  ;;  %v2125_v14 = vmin.f32 %v5971_v25, 1.0  ;;  %v7855_v3 = vmin.f32 %v5959_v17, 1.0  ;;  %v2320_v2 = vadd.f32 %v2255_v35, %v7856_v57 }
 0x240   :  { %v2356_v19 = vsel %vm2339_vm4, %v2318_v26, 0.0  ;;  %v2150_v11 = vmul.f32 0.5, %v2122_v13  ;;  %v2175_v63 = vsub.f32 %v5947_v12, %v2147_v36  ;;  %v2176_v20 = vsub.f32 %v5957_v46, %v2148_v52  ;;  %v7863_v36 = vld [vmem:[#allocation125_spill] sm:$0xff]  ;;  %v7866_v12 = vld [vmem:[#allocation123_spill] sm:$0xff] }
 0x241   :  { %v2149_v30 = vmul.f32 0.5, %v7855_v3  ;;  %v2355_v53 = vadd.f32 %v2354_v32, %v2353_v54  ;;  %v7857_v27 = vmov %v7849_v37  ;;  %v7858_v8 = vmov %v7850_v16  ;;  %v7859_v37 = vld [vmem:[#allocation84_spill] sm:$0xff] }
 0x242   :  { %v2201_v33 = vmul.f32 %v2173_v59, %v7857_v27  ;;  %v2202_v1 = vmul.f32 %v2174_v0, %v7858_v8  ;;  %v2321_v40 = vadd.f32 %v2259_v44, %v7859_v37  ;;  %v2358_v35 = vsel %vm2337_vm3, %v2319_v45, 0.0  ;;  %v7864_v59 = vld [vmem:[#allocation55_spill] sm:$0xff]  ;;  %v7865_v0 = vld [vmem:[#allocation80_spill] sm:$0xff]  ;;  %v7871_v27 = vld [vmem:[#allocation66_spill] sm:$0xff] }
 0x243   :  { %v2262_v39 = vsel %vm964_vm2, %v2260_v18, %v2261_v34  ;;  %v2263_v58 = vrot.slane %v2199_v51, 2  ;;  %v2264_v16 = vrot.slane %v2200_v21, 2  ;;  %v2357_v7 = vadd.f32 %v2356_v19, %v2355_v53 }
 0x244   :  { %v2126_v50 = vmin.f32 %v5973_v55, 1.0  ;;  %v2151_v4 = vmul.f32 0.5, %v2123_v41  ;;  %v2322_v60 = vadd.f32 %v2258_v6, %v7860_v9  ;;  %v2360_v49 = vsel %vm2339_vm4, %v2320_v2, 0.0 }
 0x245   :  { %v2152_v28 = vmul.f32 0.5, %v2124_v47  ;;  %v2177_v23 = vsub.f32 %v5959_v17, %v2149_v30  ;;  %v2178_v15 = vsub.f32 %v5961_v22, %v2150_v11  ;;  %v2359_v31 = vadd.f32 %v2358_v35, %v2357_v7  ;;  %v7868_v30 = vld [vmem:[#allocation124_spill] sm:$0xff]  ;;  %v7873_v17 = vld [vmem:[#allocation23_spill] sm:$0xff] }
 0x246   :  { %v7861_v24 = vmov %v7851_v56  ;;  %v7862_v10 = vmov %v7853_v38  ;;  %v2323_v62 = vadd.f32 %v2262_v39, %v7863_v36  ;;  %v2362_v6 = vsel %vm2337_vm3, %v2321_v40, 0.0  ;;  %v7877_v39 = vld [vmem:[#allocation51_spill] sm:$0xff]  ;;  %v7880_v36 = vld [vmem:[#allocation40_spill] sm:$0xff] }
 0x247   :  { %v2203_v42 = vmul.f32 %v2175_v63, %v7861_v24  ;;  %v2204_v56 = vmul.f32 %v2176_v20, %v7862_v10  ;;  %v2265_v26 = vsel %vm964_vm2, %v2263_v58, %v2264_v16  ;;  %v2266_v43 = vrot.slane %v2201_v33, 2  ;;  %v7869_v20 = vld [vmem:[#allocation65_spill] sm:$0xff]  ;;  %v7878_v58 = vld [vmem:[#allocation86_spill] sm:$0xff] }
 0x248   :  { %v2267_v38 = vrot.slane %v2202_v1, 2  ;;  %v2361_v52 = vadd.f32 %v2360_v49, %v2359_v31  ;;  %v2033_v48 = vadd.f32 %v7865_v0, %v7864_v59  ;;  %v2153_v51 = vmul.f32 0.5, %v2125_v14  ;;  %v7874_v1 = vld [vmem:[#allocation74_spill] sm:$0xff]  ;;  %v7887_v59 = vld [vmem:[#allocation79_spill] sm:$0xff] }
 0x249   :  { %v2324_v21 = vadd.f32 %v2261_v34, %v7866_v12  ;;  %v2364_v46 = vsel %vm2339_vm4, %v2322_v60, 0.0  ;;  %v2154_v61 = vmul.f32 0.5, %v2126_v50  ;;  %v2179_v45 = vsub.f32 %v5963_v5, %v2151_v4  ;;  %v7879_v10 = vld [vmem:[#allocation78_spill] sm:$0xff] }
 0x24a   :  { %v2180_v32 = vsub.f32 %v5965_v29, %v2152_v28  ;;  %v2363_v44 = vadd.f32 %v2362_v6, %v2361_v52  ;;  %v7867_v18 = vmov %v7855_v3  ;;  %v2206_v3 = vmul.f32 %v2178_v15, %v2122_v13  ;;  %v7876_v13 = vld [vmem:[#allocation10_spill] sm:$0xff] }
 0x24b   :  { %v2205_v54 = vmul.f32 %v2177_v23, %v7867_v18  ;;  %v2325_v57 = vadd.f32 %v2265_v26, %v7868_v30  ;;  %v2366_v2 = vsel %vm2337_vm3, %v2323_v62, 0.0  ;;  %v2268_v34 = vsel %vm964_vm2, %v2266_v43, %v2267_v38  ;;  %v7881_v62 = vld [vmem:[#allocation76_spill] sm:$0xff] }
 0x24c   :  { %v2269_v19 = vrot.slane %v2203_v42, 2  ;;  %v2270_v11 = vrot.slane %v2204_v56, 2  ;;  %v2365_v63 = vadd.f32 %v2364_v46, %v2363_v44  ;;  %v7870_v53 = vrot.slane %v7869_v20, 1 }
 0x24d   :  { %v7872_v33 = vrot.slane %v7871_v27, 1  ;;  %v7875_v37 = vrot.slane %v7874_v1, 1  ;;  %v2326_v40 = vadd.f32 %v2264_v16, %v7876_v13  ;;  %v2368_v35 = vsel %vm2339_vm4, %v2324_v21, 0.0 }
 0x24e   :  { %v2035_v7 = vadd.f32 %v7878_v58, %v7877_v39  ;;  %v2181_v4 = vsub.f32 %v5971_v25, %v2153_v51  ;;  %v2182_v9 = vsub.f32 %v5973_v55, %v2154_v61  ;;  %v2367_v60 = vadd.f32 %v2366_v2, %v2365_v63 }
 0x24f   :  { %v1980_v8 = vsel %vm136_vm0, %v7872_v33, %v7870_v53  ;;  %v2034_v22 = vadd.f32 %v7875_v37, %v7873_v17  ;;  %v2207_v49 = vmul.f32 %v2179_v45, %v2123_v41  ;;  %v2208_v28 = vmul.f32 %v2180_v32, %v2124_v47  ;;  %v7883_v41 = vld [vmem:[#allocation77_spill] sm:$0xff]  ;;  %v7895_v33 = vld [vmem:[#allocation54_spill] sm:$0xff] }
 0x250   :  { %v2327_v23 = vadd.f32 %v2268_v34, %v2033_v48  ;;  %v2370_v15 = vsel %vm2337_vm3, %v2325_v57, 0.0  ;;  %v2271_v16 = vsel %vm964_vm2, %v2269_v19, %v2270_v11  ;;  %v2272_v31 = vrot.slane %v2205_v54, 2  ;;  %v7885_v47 = vld [vmem:[#allocation81_spill] sm:$0xff]  ;;  %v7889_v54 = vld [vmem:[#allocation96_spill] sm:$0xff] }
 0x251   :  { %v2273_v24 = vrot.slane %v2206_v3, 2  ;;  %v2369_v42 = vadd.f32 %v2368_v35, %v2367_v60  ;;  %v1984_v56 = vrot.slane %v7879_v10, 1  ;;  %v7882_v55 = vrot.slane %v7881_v62, 1  ;;  %v7888_v48 = vld [vmem:[#allocation53_spill] sm:$0xff]  ;;  %v7890_v3 = vld [vmem:[#allocation42_spill] sm:$0xff] }
 0x252   :  { %v2328_v26 = vadd.f32 %v2267_v38, %v2034_v22  ;;  %v2372_v5 = vsel %vm2339_vm4, %v2326_v40, 0.0  ;;  %v7884_v29 = vrot.slane %v7883_v41, 1  ;;  %v7886_v43 = vrot.slane %v7885_v47, 1  ;;  %v7891_v57 = vld [vmem:[#allocation41_spill] sm:$0xff] }
 0x253   :  { %v2036_v6 = vadd.f32 %v7882_v55, %v7880_v36  ;;  %v1985_v0 = vrot.slane %v7887_v59, 1  ;;  %v2037_v51 = vadd.f32 %v1980_v8, %v7888_v48  ;;  %v2371_v12 = vadd.f32 %v2370_v15, %v2369_v42  ;;  %v7896_v40 = vld [vmem:[#allocation69_spill] sm:$0xff] }
 0x254   :  { %v1983_v52 = vsel %vm136_vm0, %v7886_v43, %v7884_v29  ;;  %v2209_v21 = vmul.f32 %v2181_v4, %v2125_v14  ;;  %v2210_v46 = vmul.f32 %v2182_v9, %v2126_v50  ;;  %v2329_v61 = vadd.f32 %v2271_v16, %v2035_v7  ;;  %v7893_v14 = vld [vmem:[#allocation68_spill] sm:$0xff] }
 0x255   :  { %v2374_v38 = vsel %vm2337_vm3, %v2327_v23, 0.0  ;;  %v2274_v45 = vsel %vm964_vm2, %v2272_v31, %v2273_v24  ;;  %v2275_v32 = vrot.slane %v2207_v49, 2  ;;  %v2276_v44 = vrot.slane %v2208_v28, 2  ;;  %v7894_v50 = vld [vmem:[#allocation56_spill] sm:$0xff] }
 0x256   :  { %v2373_v18 = vadd.f32 %v2372_v5, %v2371_v12  ;;  %v1746_v30 = vadd.f32 %v7890_v3, %v7889_v54  ;;  %v7892_v2 = vmov %v7870_v53  ;;  %v2330_v19 = vadd.f32 %v2270_v11, %v2036_v6  ;;  %v7897_v11 = vld [vmem:[#allocation43_spill] sm:$0xff] }
 0x257   :  { %v2038_v34 = vadd.f32 %v7892_v2, %v7891_v57  ;;  %v2376_v25 = vsel %vm2339_vm4, %v2328_v26, 0.0  ;;  %v1747_v63 = vadd.f32 %v7894_v50, %v7893_v14  ;;  %v1986_v27 = vsel %vm136_vm0, %v1984_v56, %v1985_v0 }
 0x258   :  { %v2375_v53 = vadd.f32 %v2374_v38, %v2373_v18  ;;  %v2039_v8 = vadd.f32 %v1983_v52, %v7895_v33  ;;  %v2331_v17 = vadd.f32 %v2274_v45, %v2037_v51  ;;  %v2378_v1 = vsel %vm2337_vm3, %v2329_v61, 0.0 }
 0x259   :  { %v2277_v37 = vsel %vm964_vm2, %v2275_v32, %v2276_v44  ;;  %v2278_v22 = vrot.slane %v2209_v21, 2  ;;  %v2279_v13 = vrot.slane %v2210_v46, 2  ;;  %v1748_v35 = vadd.f32 %v7897_v11, %v7896_v40 }
 0x25a   :  { %v2377_v20 = vadd.f32 %v2376_v25, %v2375_v53  ;;  %v7898_v39 = vmov %v7884_v29  ;;  %v2332_v7 = vadd.f32 %v2273_v24, %v2038_v34  ;;  %v2380_v4 = vsel %vm2339_vm4, %v2330_v19, 0.0 }
 0x25b   :  { %v2040_v58 = vadd.f32 %v7898_v39, %v1746_v30  ;;  %v2041_v60 = vadd.f32 %v1986_v27, %v1747_v63  ;;  %v2333_v49 = vadd.f32 %v2277_v37, %v2039_v8  ;;  %v2382_v28 = vsel %vm2337_vm3, %v2331_v17, 0.0 }
 0x25c   :  { %v2379_v9 = vadd.f32 %v2378_v1, %v2377_v20  ;;  %v2280_v23 = vsel %vm964_vm2, %v2278_v22, %v2279_v13  ;;  %v2042_v16 = vadd.f32 %v1985_v0, %v1748_v35  ;;  %v2384_v42 = vsel %vm2339_vm4, %v2332_v7, 0.0 }
 0x25d   :  { %v2334_v31 = vadd.f32 %v2276_v44, %v2040_v58  ;;  %v2335_v56 = vadd.f32 %v2280_v23, %v2041_v60  ;;  %v2386_v36 = vsel %vm2337_vm3, %v2333_v49, 0.0 }
 0x25e   :  { %v2381_v15 = vadd.f32 %v2380_v4, %v2379_v9  ;;  %v2336_v24 = vadd.f32 %v2279_v13, %v2042_v16 }
 0x25f   :  { %v2388_v55 = vsel %vm2339_vm4, %v2334_v31, 0.0  ;;  %v2390_v26 = vsel %vm2337_vm3, %v2335_v56, 0.0 }
 0x260   :  { %v2383_v10 = vadd.f32 %v2382_v28, %v2381_v15  ;;  %v2392_v41 = vsel %vm2339_vm4, %v2336_v24, 0.0 }
 0x262   :  { %v2385_v62 = vadd.f32 %v2384_v42, %v2383_v10 }
 0x264   :  { %v2387_v6 = vadd.f32 %v2386_v36, %v2385_v62 }
 0x266   :  { %v2389_v5 = vadd.f32 %v2388_v55, %v2387_v6 }
 0x268   :  { %v2391_v29 = vadd.f32 %v2390_v26, %v2389_v5 }
 0x26a   :  { %v2393_v47 = vadd.f32 %v2392_v41, %v2391_v29 }
 0x26c   :  { %v2394_v43 = vrot.slane %v2393_v47, 4 }
 0x26e   :  { %v2395_v52 = vadd.f32 %v2394_v43, %v2393_v47 }
 0x270   :  { %v2396_v59 = vrot.slane %v2395_v52, 2 }
 0x272   :  { %v2397_v0 = vadd.f32 %v2396_v59, %v2395_v52 }
 0x274   :  { %v2398_v48 = vrot.slane %v2397_v0, 1 }
 0x276   :  { %v2399_v51 = vadd.f32 %v2398_v48, %v2397_v0 }
 0x278   :  { %2401 = vst.msk [vmem:[#allocation2] sm:$0x1] %vm2400_vm5, %v2399_v51 }
 0x279   :  { %2428 = shalt.err (!%p2425_p4)
}
 0x27a   :  { %2411 = dma.vmem_to_hbm [thread:$0]  %s2409_s1, 16, %s6176_s2, [#allocation3]  }
 0x27b   :  { %2437 = dma.done.wait [#allocation3], 16  }
 0x27c   :  { %2438 = vsyncadd [#allocation3], 4294967280 }
 0x27d   :  { %2415 = vsyncpa [#allocation3], 1 }

</bundles_post_ra>
